<compile_context>
chip_gen: v7x
topology: tpu7x:2x2x1
jax: 0.10.0
libtpu: 0.0.40
codegen_flags: <defaults>
</compile_context>

<pallas_src>
import math
from functools import partial

import numpy as np
import jax
import jax.numpy as jnp
from jax.experimental import pallas as pl
from jax.experimental.pallas import tpu as pltpu

# Set to jnp.bfloat16 on v6e/v7x for the bf16-native MXU (keep f32 accumulation via
# preferred_element_type); kept f32 here so the demo-scale 1e-5 correctness check holds
# and v5e's f32-only VPU path stays cast-free.
MATMUL_DTYPE = jnp.float32


def slide_net_kernel(xd_ref, w1t_ref, b1_ref, w2g_ref, b2g_ref, out_ref):
    # slide1: dense feature rows @ resident pre-transposed W1^T on the MXU.
    x = xd_ref[...].astype(MATMUL_DTYPE)                                    # (BT, F)
    w1t = w1t_ref[...].astype(MATMUL_DTYPE)                                 # (F, H)
    h = jnp.dot(x, w1t, preferred_element_type=jnp.float32) + b1_ref[...]   # (BT, H)
    h = jnp.maximum(h, 0.0)                                                 # F.relu(val1)

    # slide2: only the gathered (active-label) W2 rows are ever touched.
    # Per-sample contraction over H: VPU multiply + XLU lane-reduce (nOut tiny -> MXU degenerate).
    val2 = jnp.sum(w2g_ref[...] * h[:, None, :], axis=-1) + b2g_ref[...]    # (BT, NOUT_P)
    out_ref[...] = val2.astype(out_ref.dtype)


@partial(jax.jit, static_argnames=("batch_tile",))
def slide_net_forward(in_values, active_in_indices, active_label_indices,
                      w1, b1, w2, b2, *, batch_tile=128):
    B, nA = in_values.shape
    nOut = active_label_indices.shape[1]
    H, F = w1.shape

    BT = batch_tile
    n_tiles = pl.cdiv(B, BT)
    B_pad = n_tiles * BT                           # tail tile padded with zero rows
    NOUT_P = pl.cdiv(max(nOut, 1), 8) * 8          # sublane-quantum padding only (was 128)

    # ---- cheap XLA-side sparse plumbing (O(B*F) scatter, O(B*NOUT_P*H) gather) ----
    # Scatter sparse inputs to dense rows; duplicated indices sum, matching the
    # gather-then-matmul semantics of the sparse linear layer.
    dense_x = jnp.zeros((B_pad, F), jnp.float32).at[
        jnp.arange(B)[:, None], active_in_indices].add(in_values.astype(jnp.float32))
    # Gather ONLY the active W2 rows / bias entries (padding uses row 0, sliced off below).
    lbl_pad = jnp.zeros((B_pad, NOUT_P), jnp.int32).at[:B, :nOut].set(active_label_indices)
    w2_g = w2[lbl_pad].astype(jnp.float32)         # (B_pad, NOUT_P, H)
    b2_g = b2[lbl_pad].astype(jnp.float32)         # (B_pad, NOUT_P)
    w1_t = w1.T.astype(jnp.float32)                # (F, H)  pre-transposed once
    b1_2d = b1.reshape(1, H).astype(jnp.float32)   # (1, H)

    val2_pad = pl.pallas_call(
        slide_net_kernel,
        out_shape=jax.ShapeDtypeStruct((B_pad, NOUT_P), jnp.float32),
        grid_spec=pltpu.PrefetchScalarGridSpec(
            num_scalar_prefetch=0,
            grid=(n_tiles,),
            in_specs=[
                pl.BlockSpec((BT, F), lambda i: (i, 0)),             # dense inputs (batch-tiled)
                pl.BlockSpec((F, H), lambda i: (0, 0)),              # W1^T (resident across steps)
                pl.BlockSpec((1, H), lambda i: (0, 0)),              # b1   (resident across steps)
                pl.BlockSpec((BT, NOUT_P, H), lambda i: (i, 0, 0)),  # gathered W2 rows
                pl.BlockSpec((BT, NOUT_P), lambda i: (i, 0)),        # gathered b2
            ],
            out_specs=pl.BlockSpec((BT, NOUT_P), lambda i: (i, 0)),
        ),
        compiler_params=pltpu.CompilerParams(
            dimension_semantics=("parallel",),       # batch tiles are independent (v7x: 2 TCs)
            vmem_limit_bytes=32 * 1024 * 1024,       # per-step working set << 1 MiB at demo scale
        ),
    )(dense_x, w1_t, b1_2d, w2_g, b2_g)

    val2 = val2_pad[:B, :nOut]
    # Net.forward returns (val2, ind2); ind2 are the active output (label) indices.
    return val2, active_label_indices


def truncated_normal_init(key, shape, std):
    # Deterministic analogue of truncated_normal_init_ (N(0,1) truncated to (-2,2), scaled by std).
    return jax.random.truncated_normal(key, -2.0, 2.0, shape, jnp.float32) * std


if __name__ == "__main__":
    # Small synthetic config consistent with the module's __init__.
    feature_dim = 64
    hidden_dim = 64
    n_classes = 512
    batch = 256          # 2 batch tiles of 128 -> grid=(2,): pipelining + both v7x TensorCores
    n_active_in = 8      # sparse nonzero inputs per sample
    n_active_out = 4     # label / sampled output neurons per sample

    key = jax.random.PRNGKey(0)
    k1, k2, k3, k4, kx, ki, kl = jax.random.split(key, 7)

    std1 = 2.0 / math.sqrt(feature_dim + hidden_dim)
    std2 = 2.0 / math.sqrt(hidden_dim + n_classes)
    W1 = truncated_normal_init(k1, (hidden_dim, feature_dim), std1)
    b1 = truncated_normal_init(k2, (hidden_dim,), std1)
    W2 = truncated_normal_init(k3, (n_classes, hidden_dim), std2)
    b2 = truncated_normal_init(k4, (n_classes,), std2)

    in_values = jax.random.normal(kx, (batch, n_active_in), jnp.float32)
    active_in_indices = jax.random.randint(ki, (batch, n_active_in), 0, feature_dim, jnp.int32)
    active_label_indices = jax.random.randint(kl, (batch, n_active_out), 0, n_classes, jnp.int32)

    val2, ind2 = slide_net_forward(in_values, active_in_indices, active_label_indices,
                                   W1, b1, W2, b2)
    val2 = jax.block_until_ready(val2)

    # Pure-JAX reference for correctness.
    dense = jnp.zeros((batch, feature_dim), jnp.float32).at[
        jnp.arange(batch)[:, None], active_in_indices].add(in_values)
    h_ref = jnp.maximum(dense @ W1.T + b1, 0.0)
    logits_ref = h_ref @ W2.T + b2
    val2_ref = jnp.take_along_axis(logits_ref, active_label_indices, axis=1)

    np.testing.assert_allclose(np.asarray(val2), np.asarray(val2_ref), rtol=1e-5, atol=1e-5)
    assert ind2.shape == active_label_indices.shape
    print("KERNEL_OK")
</pallas_src>

<mosaic_0001>
module attributes {stable_mosaic.version = 11 : i64} {
  func.func private @main(%arg0: i32) attributes {dimension_semantics = [#tpu.dimension_semantics<core_parallel>], iteration_bounds = array<i64: 2>, tpu.core_type = #tpu.core_type<sc_scalar_subcore>, window_params = []} {
    return
  }
}

module attributes {stable_mosaic.version = 11 : i64} {
  func.func private @main(%arg0: i32) attributes {dimension_semantics = [#tpu.dimension_semantics<core_parallel>], iteration_bounds = array<i64: 2>, tpu.core_type = #tpu.core_type<sc_scalar_subcore>, window_params = []} {
    return
  }
}

module attributes {stable_mosaic.version = 11 : i64} {
  func.func @slide_net_kernel(%arg0: i32, %arg1: memref<128x64xf32, #tpu.memory_space<vmem>>, %arg2: memref<64x64xf32, #tpu.memory_space<vmem>>, %arg3: memref<1x64xf32, #tpu.memory_space<vmem>>, %arg4: memref<128x8x64xf32, #tpu.memory_space<vmem>>, %arg5: memref<128x8xf32, #tpu.memory_space<vmem>>, %arg6: memref<128x8xf32, #tpu.memory_space<vmem>>) attributes {dimension_semantics = [#tpu.dimension_semantics<parallel>], iteration_bounds = array<i64: 2>, scalar_prefetch = 0 : i64, scratch_operands = 0 : i64, tpu.core_type = #tpu.core_type<tc>, window_params = [{transform_indices = @transform_0, window_bounds = array<i64: 128, 64>}, {pipeline_mode = #tpu.pipeline_mode<synchronous>, transform_indices = @transform_1, window_bounds = array<i64: 64, 64>}, {pipeline_mode = #tpu.pipeline_mode<synchronous>, transform_indices = @transform_2, window_bounds = array<i64: 1, 64>}, {transform_indices = @transform_3, window_bounds = array<i64: 128, 8, 64>}, {transform_indices = @transform_4, window_bounds = array<i64: 128, 8>}, {transform_indices = @transform_5, window_bounds = array<i64: 128, 8>}]} {
    %c0 = arith.constant 0 : index
    %c0_0 = arith.constant 0 : index
    %0 = vector.load %arg1[%c0, %c0_0] : memref<128x64xf32, #tpu.memory_space<vmem>>, vector<128x64xf32>
    %c0_1 = arith.constant 0 : index
    %c0_2 = arith.constant 0 : index
    %1 = vector.load %arg2[%c0_1, %c0_2] : memref<64x64xf32, #tpu.memory_space<vmem>>, vector<64x64xf32>
    %cst = arith.constant dense<0.000000e+00> : vector<128x64xf32>
    %2 = tpu.matmul %0, %1, %cst {dimension_numbers = #tpu.dot_dimension_numbers<[1], [0], [0], [1], [0, 0, 1, 1], [], []>} : vector<128x64xf32>, vector<64x64xf32>, vector<128x64xf32> -> vector<128x64xf32>
    %c0_3 = arith.constant 0 : index
    %c0_4 = arith.constant 0 : index
    %3 = vector.load %arg3[%c0_3, %c0_4] : memref<1x64xf32, #tpu.memory_space<vmem>>, vector<1x64xf32>
    %4 = vector.broadcast %3 : vector<1x64xf32> to vector<128x64xf32>
    %5 = arith.addf %2, %4 : vector<128x64xf32>
    %cst_5 = arith.constant 0.000000e+00 : f32
    %6 = vector.broadcast %cst_5 : f32 to vector<128x64xf32>
    %7 = arith.maximumf %5, %6 : vector<128x64xf32>
    %c0_6 = arith.constant 0 : index
    %c0_7 = arith.constant 0 : index
    %c0_8 = arith.constant 0 : index
    %8 = vector.load %arg4[%c0_6, %c0_7, %c0_8] : memref<128x8x64xf32, #tpu.memory_space<vmem>>, vector<128x8x64xf32>
    %9 = vector.shape_cast %7 : vector<128x64xf32> to vector<128x1x64xf32>
    %10 = vector.broadcast %9 : vector<128x1x64xf32> to vector<128x8x64xf32>
    %11 = arith.mulf %8, %10 : vector<128x8x64xf32>
    %cst_9 = arith.constant dense<0.000000e+00> : vector<128x8xf32>
    %12 = vector.multi_reduction <add>, %11, %cst_9 [2] : vector<128x8x64xf32> to vector<128x8xf32>
    %c0_10 = arith.constant 0 : index
    %c0_11 = arith.constant 0 : index
    %13 = vector.load %arg5[%c0_10, %c0_11] : memref<128x8xf32, #tpu.memory_space<vmem>>, vector<128x8xf32>
    %14 = arith.addf %12, %13 : vector<128x8xf32>
    %c0_12 = arith.constant 0 : index
    %c0_13 = arith.constant 0 : index
    %15 = vector.load %arg6[%c0_12, %c0_13] : memref<128x8xf32, #tpu.memory_space<vmem>>, vector<128x8xf32>
    tpu.vector_store %arg6[%c0_12, %c0_13], %14 {strides = array<i32>} : memref<128x8xf32, #tpu.memory_space<vmem>>, vector<128x8xf32>,
    return
  }
  func.func @transform_0(%arg0: i32) -> (i32, i32) {
    %c0_i32 = arith.constant 0 : i32
    %c0_i32_0 = arith.constant 0 : i32
    return %arg0, %c0_i32 : i32, i32
  }
  func.func @transform_1(%arg0: i32) -> (i32, i32) {
    %c0_i32 = arith.constant 0 : i32
    %c0_i32_0 = arith.constant 0 : i32
    %c0_i32_1 = arith.constant 0 : i32
    return %c0_i32, %c0_i32_0 : i32, i32
  }
  func.func @transform_2(%arg0: i32) -> (i32, i32) {
    %c0_i32 = arith.constant 0 : i32
    %c0_i32_0 = arith.constant 0 : i32
    %c0_i32_1 = arith.constant 0 : i32
    return %c0_i32, %c0_i32_0 : i32, i32
  }
  func.func @transform_3(%arg0: i32) -> (i32, i32, i32) {
    %c0_i32 = arith.constant 0 : i32
    %c0_i32_0 = arith.constant 0 : i32
    %c0_i32_1 = arith.constant 0 : i32
    return %arg0, %c0_i32, %c0_i32_0 : i32, i32, i32
  }
  func.func @transform_4(%arg0: i32) -> (i32, i32) {
    %c0_i32 = arith.constant 0 : i32
    %c0_i32_0 = arith.constant 0 : i32
    return %arg0, %c0_i32 : i32, i32
  }
  func.func @transform_5(%arg0: i32) -> (i32, i32) {
    %c0_i32 = arith.constant 0 : i32
    %c0_i32_0 = arith.constant 0 : i32
    return %arg0, %c0_i32 : i32, i32
  }
}

</mosaic_0001>

<bundles_post_ra>
// kernel: slide_net_forward.1
= control target key start
LH: loop header
LB: loop body
LE: loop exit
PB: predicated region body
PF: predicated region fallthrough
CT: control target
= control target key end

     0   :  { %10 = vsyncpa [#allocation3], 0  ;;  %s7959_s0 = inlined_call_operand.vmem [shape: f32[256,64], index: 0, kind: input, shape index: {}]   ;;  %s7960_s1 = inlined_call_operand.vmem [shape: f32[64,64], index: 1, kind: input, shape index: {}]   ;;  %s7961_s2 = inlined_call_operand.vmem [shape: f32[1,64], index: 2, kind: input, shape index: {}]   ;;  %s7962_s3 = inlined_call_operand.hbm [shape: f32[256,8,64], index: 3, kind: input, shape index: {}]   ;;  %s7963_s4 = inlined_call_operand.vmem [shape: f32[256,8], index: 4, kind: input, shape index: {}]   ;;  %s7964_s5 = inlined_call_operand.vmem [shape: f32[256,8], index: 5, kind: output, shape index: {}]  }
   0x1   :  { %12 = vsyncpa [#allocation3 + $0x1], 0  ;;  %s5335_s18 = smov 0   ;;  %s5337_s19 = smov 0  }
   0x2   :  { %s5339_s20 = smov 0   ;;  %s5341_s21 = smov 0  }
   0x3 LB: > { %s5065_s22 = sadd.s32 4294967295, %s5298_s21   ;;  %s5355_s23 = sadd.s32 1, %s5298_s21   ;;  %s5298_s21 = sphi %s5341_s21, %s8268_s21   ;;  %s5294_s20 = sphi %s5339_s20, %s8267_s20   ;;  %s5290_s19 = sphi %s5337_s19, %s8266_s19   ;;  %s5286_s18 = sphi %s5335_s18, %s8265_s18  }
   0x4   : > { %s90_s24 = ssub.s32 %s5298_s21, %s5355_s23  ;;  %s93_s25 = sadd.s32 1, %s5294_s20 }
   0x5   : > { %p91_p0 = scmp.eq.s32.totalorder %s90_s24, 0  ;;  %p100_p1 = scmp.ne.s32.totalorder %s5294_s20, %s5290_s19 }
   0x6   : > { %p101_p2 = scmp.eq.s32.totalorder %s5298_s21, 0  ;;  %p106_p3 = scmp.ne.s32.totalorder %s5290_s19, %s5286_s18 }
   0x7   : > { %s5365_s26 = scalar_select %p91_p0, %s5294_s20, %s93_s25  }
   0x8   : > { %p102_p4 = por %p101_p2, %p100_p1  ;;  %p107_p5 = scmp.eq.s32.totalorder %s5065_s22, 0 }
   0x9   : > { %p5194_p6 = scmp.lt.s32.totalorder %s5298_s21, 2  ;;  %s197_s28 = sand.u32 1, %s5294_s20  }
   0xa   : > { %p5370_p7 = por %p107_p5, %p106_p3  ;;  %s5069_s29 = sshll.u32 %s197_s28, 10 }
   0xb   : > { %s5099_s30 = sshll.u32 %s5298_s21, 14  ;;  %s201_s9 = scalar_lea.vmem [#allocation2], %s5069_s29 }
   0xc   : > { %s5379_s8 = scalar_lea.hbm %s7962_s3, %s5099_s30  ;;  %s208_s10 = sshll.u32 %s201_s9, 4  ;;  %s5381_s10 = int_to_ptr.vmem [resolvable:$true] %s208_s10 }
   0xd   : > { %p5383_p8 = pnand %p5194_p6, %p102_p4  ;;  %s5388_s12 = scalar_lea.sflag [#allocation3], %s197_s28 }
   0xe   : > { %s5234_s13 = scalar_lea.hbm %s5379_s8, 16384  ;;  %s5239_s16 = scalar_lea.hbm %s7962_s3, 32768 }
   0xf   : > { %p5235_p10 = scmp.ne.s32.totalorder %s5379_s8, %s5234_s13  ;;  %p5236_p11 = pneg %p5383_p8 }
  0x10   : > { %p5240_p0 = scmp.lt.u32.totalorder %s5379_s8, %s7962_s3  ;;  %p5241_p1 = scmp.lt.u32.totalorder %s5239_s16, %s5234_s13 }
  0x11   : > { %p5237_p12 = pnand %p5236_p11, %p5235_p10  ;;  %p5243_p3 = scmp.lt.u32.totalorder %s5234_s13, %s5379_s8 }
  0x12   : > { %p5242_p2 = por %p5241_p1, %p5240_p0 }
  0x13   : > { %p5238_p13 = pneg %p5237_p12 }
  0x14   : > { %p5244_p4 = por %p5243_p3, %p5242_p2 }
  0x16   : > { %p5245_p5 = pnand %p5244_p4, %p5238_p13 }
  0x18   : > { %5248 = shalt.err (!%p5245_p5)
}
  0x19   : > { %s5249_s24 = scalar_lea.vmem %s5381_s10, 16384  ;;  %s5300_s25 = smov [#allocation2]  }
  0x1a   : > { %p5250_p6 = scmp.ne.s32.totalorder %s5381_s10, %s5249_s24  ;;  %s5254_s28 = sshll.u32 %s5300_s25, 4  ;;  %s5255_s28 = int_to_ptr.vmem [resolvable:$false] %s5254_s28 }
  0x1b   : > { %s5256_s29 = scalar_lea.vmem %s5255_s28, 32768  ;;  %p5257_p9 = scmp.lt.s32.totalorder %s5381_s10, %s5255_s28 }
  0x1c   : > { %p5252_p10 = pnand %p5250_p6, %p5236_p11  ;;  %p5258_p0 = scmp.lt.s32.totalorder %s5256_s29, %s5249_s24 }
  0x1e   : > { %p5253_p12 = pneg %p5252_p10  ;;  %p5259_p1 = por %p5258_p0, %p5257_p9 }
  0x20   : > { %p5260_p2 = pnand %p5259_p1, %p5253_p12 }
  0x22   : > { %5263 = shalt.err (!%p5260_p2)
}
  0x23   : > { %s5301_s30 = smov 128   ;;  %s5302_s6 = smov 8  }
  0x24   : > { %5193 = dma.hbm_to_vmem [thread:$0]  (!%p5383_p8), %s5379_s8, 16384, %s5381_s10, %s5388_s12, %s5301_s30, %s5301_s30, %s5302_s6  }
  0x25   : > { %p225_p11 = scmp.lt.s32.totalorder %s5298_s21, 3  ;;  %p7969_p13 = scmp.ge.s32.totalorder %s5298_s21, 1 }
  0x27   : > { %p226_p3 = pnand %p7969_p13, %p225_p11 }
  0x29   : > { %229 = sbr.rel (%p226_p3) target bundleno = 1257 (0x4e9), region = 40 }
  0x30   : > { %s231_s7 = sand.u32 1, %s5290_s19  }
  0x31   : > { %s5073_s9 = sshll.u32 %s231_s7, 10  ;;  %s232_s13 = scalar_lea.sflag [#allocation3], %s231_s7 }
  0x32   : > { %s5420_s14 = scalar_lea.vmem [#allocation2], %s5073_s9 }
  0x33   : > { %5281 = dma.done.wait (%p5370_p7), %s232_s13, 16384  }
  0x34   : > { %5283 = vsyncadd (%p5370_p7), %s232_s13, 4294950912  ;;  %s5074_s11 = sshll.u32 %s5065_s22, 4  ;;  %v307_v0 = vld [vmem:[%s7960_s1] sm:$0xff]  ;;  %v308_v1 = vld [vmem:[%s7960_s1 + $0x8] sm:$0xff]  ;;  %vm322_vm0 = vcmask 523264   ;;  %v7965_v30 = vlaneseq  ;;  %vm4822_vm1 = vcmask 1041409  }
  0x35   : > { %p273_p8 = scmp.lt.s32.totalorder %s5074_s11, 31  ;;  %v309_v2 = vld [vmem:[%s7960_s1 + $0x10] sm:$0xff]  ;;  %v5164_v3 = vpack.c.bf16 %v308_v1, %v307_v0  ;;  %v310_v4 = vld [vmem:[%s7960_s1 + $0x18] sm:$0xff]  ;;  %v311_v6 = vld [vmem:[%s7960_s1 + $0x20] sm:$0xff]  ;;  %v5303_v28 = vmov 1966171168  }
  0x36   : > { %v5168_v5 = vpack.c.bf16 %v310_v4, %v309_v2  ;;  %v312_v7 = vld [vmem:[%s7960_s1 + $0x28] sm:$0xff]  ;;  %v313_v11 = vld [vmem:[%s7960_s1 + $0x30] sm:$0xff]  ;;  %v314_v12 = vld [vmem:[%s7960_s1 + $0x38] sm:$0xff]  ;;  %v678_v29 = vunpack.c.l.s4 %v5303_v28  ;;  %v5493_v32 = vshrl.u32 %v7965_v30, 7  ;;  %vm4824_vm2 = vcmask 1042434  }
  0x37   : > { %s8270_s11 = smov (!%p273_p8, %s5074_s11), 31  ;;  %5165 = vmatprep.subr.bf16.mxu0 %v5164_v3  ;;  %5180 = vmatprep.subr.bf16.mxu1 %v5164_v3  ;;  %v5172_v10 = vpack.c.bf16 %v312_v7, %v311_v6  ;;  %v5176_v13 = vpack.c.bf16 %v314_v12, %v313_v11  ;;  %v5498_v33 = vld [vmem:[%s7961_s2] ss:$0 sm:$0xff]  ;;  %v540_v63 = vld [vmem:[%s5420_s14 + $0x40] sm:$0xff]  ;;  %v605_v11 = vld [vmem:[%s5420_s14 + $0x248] sm:$0xff]  ;;  %vm4826_vm3 = vcmask 1043459  }
  0x38   : > { %s5428_s8 = sshll.u32 %s8270_s11, 3  ;;  %5167 = vmatpush3.bf16.msra.mxu0 %v5164_v3  ;;  %5184 = vmatpush3.bf16.msra.mxu1 %v5164_v3  ;;  %v679_v31 = vunpack.c.0.s8 %v678_v29  ;;  %7970 = vst [vmem:[#allocation5_spill] sm:$0xff] %v5493_v32  ;;  %v5529_v54 = vsub.s32 0, %v5493_v32  ;;  %v604_v3 = vld [vmem:[%s5420_s14 + $0x240] sm:$0xff]  ;;  %v534_v28 = vld [vmem:[%s5420_s14 + $0x10] sm:$0xff]  ;;  %vm4828_vm4 = vcmask 1044484  }
  0x39   : > { %s5443_s22 = scalar_lea.vmem %s7959_s0, %s5428_s8  ;;  %5169 = vmatprep.subr.bf16.mxu0 %v5168_v5  ;;  %5181 = vmatprep.subr.bf16.mxu1 %v5168_v5  ;;  %s6506_s27 = scalar_lea.vmem %s7963_s4, %s5428_s8  ;;  %vm4830_vm5 = vcmask 1045509   ;;  %vm4832_vm6 = vcmask 1046534   ;;  %vm4834_vm7 = vcmask 1047559   ;;  %vm4957_vm8 = vcmask 64512  }
  0x3a   : > { %v291_v8 = vld [vmem:[%s5443_s22] sm:$0xff]  ;;  %v292_v14 = vld [vmem:[%s5443_s22 + $0x8] sm:$0xff]  ;;  %v293_v16 = vld [vmem:[%s5443_s22 + $0x10] sm:$0xff]  ;;  %v5502_v37 = vsub.s32 %v679_v31, %v5493_v32 }
  0x3b   : > { %v299_v9 = vld [vmem:[%s5443_s22 + $0x40] sm:$0xff]  ;;  %5140 = vmatprep.mubr.msk.f32.mxu0 %vm322_vm0, %v291_v8  ;;  %v300_v15 = vld [vmem:[%s5443_s22 + $0x48] sm:$0xff]  ;;  %v301_v17 = vld [vmem:[%s5443_s22 + $0x50] sm:$0xff] }
  0x3c   : > { %5152 = vmatprep.mubr.msk.f32.mxu1 %vm322_vm0, %v299_v9  ;;  %5171 = vmatpush3.bf16.msra.mxu0 %v5168_v5  ;;  %v294_v18 = vld [vmem:[%s5443_s22 + $0x18] sm:$0xff]  ;;  %v295_v20 = vld [vmem:[%s5443_s22 + $0x20] sm:$0xff]  ;;  %v296_v22 = vld [vmem:[%s5443_s22 + $0x28] sm:$0xff] }
  0x3d   : > { %5185 = vmatpush3.bf16.msra.mxu1 %v5168_v5  ;;  %5173 = vmatprep.subr.bf16.mxu0 %v5172_v10  ;;  %v302_v19 = vld [vmem:[%s5443_s22 + $0x58] sm:$0xff]  ;;  %v303_v21 = vld [vmem:[%s5443_s22 + $0x60] sm:$0xff]  ;;  %v304_v23 = vld [vmem:[%s5443_s22 + $0x68] sm:$0xff] }
  0x3e   : > { %5182 = vmatprep.subr.bf16.mxu1 %v5172_v10  ;;  %v297_v24 = vld [vmem:[%s5443_s22 + $0x30] sm:$0xff]  ;;  %v298_v26 = vld [vmem:[%s5443_s22 + $0x38] sm:$0xff] }
  0x3f   : > { %v305_v25 = vld [vmem:[%s5443_s22 + $0x70] sm:$0xff]  ;;  %v306_v27 = vld [vmem:[%s5443_s22 + $0x78] sm:$0xff]  ;;  %s7487_s22 = scalar_lea.vmem %s7964_s5, %s5428_s8 }
  0x40   : > { %5175 = vmatpush3.bf16.msra.mxu0 %v5172_v10 }
  0x41   : > { %5186 = vmatpush3.bf16.msra.mxu1 %v5172_v10  ;;  %5177 = vmatprep.subr.bf16.mxu0 %v5176_v13  ;;  %v541_v10 = vld [vmem:[%s5420_s14 + $0x48] sm:$0xff] }
  0x42   : > { %5183 = vmatprep.subr.bf16.mxu1 %v5176_v13 }
  0x44   : > { %5179 = vmatpush3.bf16.msra.mxu0 %v5176_v13 }
  0x45   : > { %5187 = vmatpush3.bf16.msra.mxu1 %v5176_v13 }
  0x47   : > { %5141 = vmatmul.mubr.msk.f32.vlgmr.msra.gmra.mrb[0].mxu0 %vm322_vm0, %v292_v14 }
  0x48   : > { %5153 = vmatmul.mubr.msk.f32.vlgmr.msra.gmra.mrb[0].mxu1 %vm322_vm0, %v300_v15  ;;  %5143 = vmatprep.mubr.msk.f32.mxu0 %vm322_vm0, %v293_v16 }
  0x49   : > { %5155 = vmatprep.mubr.msk.f32.mxu1 %vm322_vm0, %v301_v17 }
  0x4b   : > { %5144 = vmatmul.mubr.msk.f32.gmra.mrb[2].mxu0 %vm322_vm0, %v294_v18 }
  0x4c   : > { %5156 = vmatmul.mubr.msk.f32.gmra.mrb[2].mxu1 %vm322_vm0, %v302_v19  ;;  %5146 = vmatprep.mubr.msk.f32.mxu0 %vm322_vm0, %v295_v20 }
  0x4d   : > { %5158 = vmatprep.mubr.msk.f32.mxu1 %vm322_vm0, %v303_v21  ;;  %v532_v21 = vld [vmem:[%s5420_s14] sm:$0xff] }
  0x4f   : > { %5147 = vmatmul.mubr.msk.f32.gmra.mrb[4].mxu0 %vm322_vm0, %v296_v22 }
  0x50   : > { %5159 = vmatmul.mubr.msk.f32.gmra.mrb[4].mxu1 %vm322_vm0, %v304_v23  ;;  %5149 = vmatprep.mubr.msk.f32.mxu0 %vm322_vm0, %v297_v24 }
  0x51   : > { %5161 = vmatprep.mubr.msk.f32.mxu1 %vm322_vm0, %v305_v25 }
  0x53   : > { %5150 = vmatmul.mubr.msk.f32.gmra.mrb[6].mxu0 %vm322_vm0, %v298_v26 }
  0x54   : > { %5162 = vmatmul.mubr.msk.f32.gmra.mrb[6].mxu1 %vm322_vm0, %v306_v27 }
 0x11a   : > { %v5142_v34 = vpop.f32.mrb[0].mxu0 }
 0x11b   : > { %v5154_v35 = vpop.f32.mrb[0].mxu1  ;;  %v443_v36 = vadd.f32 %v5142_v34, %v5498_v33  ;;  %v437_v38 = vpop.f32.mrb[1].mxu0 }
 0x11c   : > { %v483_v39 = vadd.f32 %v5154_v35, %v5498_v33  ;;  %v477_v40 = vpop.f32.mrb[1].mxu1  ;;  %v438_v41 = vadd.f32 %v5498_v33, %v437_v38  ;;  %v596_v35 = vld [vmem:[%s5420_s14 + $0x200] sm:$0xff] }
 0x11d   : > { %v478_v42 = vadd.f32 %v5498_v33, %v477_v40  ;;  %v517_v43 = vmax.f32 %v443_v36, 0.0 }
 0x11e   : > { %v5507_v44 = vmax.f32 %v483_v39, 0.0  ;;  %v5509_v45 = vmax.f32 %v438_v41, 0.0  ;;  %v5513_v47 = vpop.f32.mrb[2].mxu0 }
 0x11f   : > { %v5511_v46 = vmax.f32 %v478_v42, 0.0  ;;  %v5515_v48 = vpop.f32.mrb[2].mxu1  ;;  %v732_v49 = vrot.slane %v517_v43, %v5502_v37  ;;  %v5520_v51 = vpop.f32.mrb[3].mxu0  ;;  %v725_v7 = vcombine.high %v517_v43, %v517_v43 }
 0x120   : > { %v1124_v50 = vrot.slane %v5507_v44, %v5502_v37  ;;  %v5522_v52 = vpop.f32.mrb[3].mxu1  ;;  %v5526_v53 = vrot.slane %v5509_v45, %v5502_v37  ;;  %v1117_v36 = vcombine.high %v5507_v44, %v5507_v44  ;;  %v542_v44 = vld [vmem:[%s5420_s14 + $0x50] sm:$0xff] }
 0x121   : > { %v740_v55 = vcombine.high %v732_v49, %v732_v49  ;;  %v748_v56 = vrot.slane %v732_v49, %v5502_v37  ;;  %v1075_v58 = vrot.slane %v5511_v46, %v5502_v37  ;;  %v739_v23 = vrot.slane %v725_v7, %v5502_v37  ;;  %v597_v49 = vld [vmem:[%s5420_s14 + $0x208] sm:$0xff] }
 0x122   : > { %v1132_v57 = vcombine.high %v1124_v50, %v1124_v50  ;;  %v5534_v59 = vpop.f32.mrb[4].mxu0  ;;  %v699_v61 = vrot.slane %v5526_v53, %v5502_v37  ;;  %v5541_v62 = vrot.slane %v1124_v50, %v5502_v37 }
 0x123   : > { %v5536_v60 = vpop.f32.mrb[4].mxu1  ;;  %v5544_v0 = vpop.f32.mrb[5].mxu0  ;;  %v1495_v2 = vrot.slane %v748_v56, %v5529_v54  ;;  %v762_v4 = vrot.slane %v740_v55, %v5502_v37  ;;  %v1083_v8 = vcombine.high %v1075_v58, %v1075_v58  ;;  %v5562_v16 = vrot.slane %v1075_v58, %v5502_v37 }
 0x124   : > { %v5546_v1 = vpop.f32.mrb[5].mxu1  ;;  %v1751_v5 = vrot.slane %v5541_v62, %v5529_v54  ;;  %v5554_v6 = vrot.slane %v1132_v57, %v5502_v37  ;;  %v721_v15 = vcombine.high %v699_v61, %v699_v61  ;;  %v1463_v18 = vrot.slane %v699_v61, %v5529_v54 }
 0x125   : > { %v2108_v9 = vmul.f32 %v1495_v2, %v540_v63  ;;  %v1499_v12 = vrot.slane %v762_v4, %v5529_v54  ;;  %v5572_v26 = vrot.slane %v1083_v8, %v5502_v37  ;;  %v1719_v29 = vrot.slane %v5562_v16, %v5529_v54  ;;  %v544_v8 = vld [vmem:[%s5420_s14 + $0x60] sm:$0xff] }
 0x126   : > { %v2172_v13 = vmul.f32 %v1751_v5, %v604_v3  ;;  %v1755_v14 = vrot.slane %v5554_v6, %v5529_v54  ;;  %v1471_v25 = vrot.slane %v721_v15, %v5529_v54  ;;  %v2100_v27 = vmul.f32 %v1463_v18, %v532_v21  ;;  %v545_v18 = vld [vmem:[%s5420_s14 + $0x68] sm:$0xff] }
 0x127   : > { %v2252_v17 = vsel %vm322_vm0, %v2108_v9, 0.0  ;;  %v2109_v19 = vmul.f32 %v1499_v12, %v541_v10  ;;  %v770_v31 = vcombine.high %v748_v56, %v748_v56  ;;  %v741_v38 = vcombine.high %v739_v23, %v739_v23 }
 0x128   : > { %2253 = vadd.xlane.f32.xlu0 %v2252_v17  ;;  %v2173_v20 = vmul.f32 %v1755_v14, %v605_v11  ;;  %v2444_v22 = vsel %vm322_vm0, %v2172_v13, 0.0  ;;  %v2102_v39 = vmul.f32 %v1471_v25, %v534_v28  ;;  %v1723_v40 = vrot.slane %v5572_v26, %v5529_v54  ;;  %v607_v28 = vld [vmem:[%s5420_s14 + $0x258] sm:$0xff] }
 0x129   : > { %v2255_v24 = vsel %vm322_vm0, %v2109_v19, 0.0  ;;  %v772_v41 = vcombine.high %v762_v4, %v762_v4  ;;  %v2228_v42 = vsel %vm322_vm0, %v2100_v27, 0.0  ;;  %v2164_v43 = vmul.f32 %v1719_v29, %v596_v35  ;;  %v543_v4 = vld [vmem:[%s5420_s14 + $0x58] sm:$0xff] }
 0x12a   : > { %2256 = vadd.xlane.f32.xlu1 %v2255_v24  ;;  %v2447_v34 = vsel %vm322_vm0, %v2173_v20, 0.0  ;;  %v1503_v50 = vrot.slane %v770_v31, %v5529_v54  ;;  %v5587_v55 = vrot.slane %v739_v23, %v5502_v37  ;;  %v1131_v56 = vrot.slane %v1117_v36, %v5502_v37  ;;  %v608_v31 = vld [vmem:[%s5420_s14 + $0x260] sm:$0xff] }
 0x12b   : > { %v2234_v57 = vsel %vm322_vm0, %v2102_v39, 0.0  ;;  %v2165_v58 = vmul.f32 %v1723_v40, %v597_v49  ;;  %v1507_v61 = vrot.slane %v772_v41, %v5529_v54  ;;  %v5594_v63 = vrot.slane %v741_v38, %v5502_v37 }
 0x12c   : > { %2445 = vadd.xlane.f32.xlu0 %v2444_v22  ;;  %v2420_v2 = vsel %vm322_vm0, %v2164_v43, 0.0  ;;  %v2110_v3 = vmul.f32 %v1503_v50, %v542_v44  ;;  %v1511_v5 = vrot.slane %v5587_v55, %v5529_v54  ;;  %v1162_v7 = vcombine.high %v5541_v62, %v5541_v62  ;;  %v609_v43 = vld [vmem:[%s5420_s14 + $0x268] sm:$0xff] }
 0x12d   : > { %v676_v9 = vcombine.high %v5509_v45, %v5509_v45  ;;  %v691_v10 = vcombine.high %v5526_v53, %v5526_v53  ;;  %v1164_v11 = vcombine.high %v5554_v6, %v5554_v6  ;;  %v1133_v12 = vcombine.high %v1131_v56, %v1131_v56  ;;  %v606_v6 = vld [vmem:[%s5420_s14 + $0x250] sm:$0xff] }
 0x12e   : > { %2448 = vadd.xlane.f32.xlu1 %v2447_v34  ;;  %v2423_v13 = vsel %vm322_vm0, %v2165_v58, 0.0  ;;  %v2111_v14 = vmul.f32 %v1507_v61, %v543_v4  ;;  %v1515_v15 = vrot.slane %v5594_v63, %v5529_v54  ;;  %v2258_v62 = vsel %vm322_vm0, %v2110_v3, 0.0 }
 0x12f   : > { %v2112_v17 = vmul.f32 %v1511_v5, %v544_v8  ;;  %v1759_v45 = vrot.slane %v1162_v7, %v5529_v54  ;;  %v5616_v53 = vrot.slane %v1131_v56, %v5502_v37  ;;  %v690_v19 = vrot.slane %v676_v9, %v5502_v37  ;;  %v535_v5 = vld [vmem:[%s5420_s14 + $0x18] sm:$0xff]  ;;  %v536_v8 = vld [vmem:[%s5420_s14 + $0x20] sm:$0xff] }
 0x130   : > { %2229 = vadd.xlane.f32.xlu0 %v2228_v42  ;;  %v1763_v20 = vrot.slane %v1164_v11, %v5529_v54  ;;  %v2261_v21 = vsel %vm322_vm0, %v2111_v14, 0.0  ;;  %v2113_v22 = vmul.f32 %v1515_v15, %v545_v18  ;;  %v5623_v23 = vrot.slane %v1133_v12, %v5502_v37 }
 0x131   : > { %v713_v24 = vrot.slane %v691_v10, %v5502_v37  ;;  %v2264_v25 = vsel %vm322_vm0, %v2112_v17, 0.0  ;;  %v2174_v27 = vmul.f32 %v1759_v45, %v606_v6  ;;  %v1767_v29 = vrot.slane %v5616_v53, %v5529_v54  ;;  %v598_v6 = vld [vmem:[%s5420_s14 + $0x210] sm:$0xff] }
 0x132   : > { %2235 = vadd.xlane.f32.xlu1 %v2234_v57  ;;  %v692_v34 = vcombine.high %v690_v19, %v690_v19  ;;  %v1068_v35 = vcombine.high %v5511_v46, %v5511_v46  ;;  %v2267_v36 = vsel %vm322_vm0, %v2113_v22, 0.0  ;;  %v2175_v38 = vmul.f32 %v1763_v20, %v607_v28  ;;  %v533_v46 = vld [vmem:[%s5420_s14 + $0x8] sm:$0xff] }
 0x133   : > { %v1771_v39 = vrot.slane %v5623_v23, %v5529_v54  ;;  %v723_v40 = vcombine.high %v713_v24, %v713_v24  ;;  %v2450_v41 = vsel %vm322_vm0, %v2174_v27, 0.0  ;;  %v2176_v42 = vmul.f32 %v1767_v29, %v608_v31  ;;  %v599_v27 = vld [vmem:[%s5420_s14 + $0x218] sm:$0xff]  ;;  %v600_v31 = vld [vmem:[%s5420_s14 + $0x220] sm:$0xff] }
 0x134   : > { %2421 = vadd.xlane.f32.xlu0 %v2420_v2  ;;  %v1467_v49 = vrot.slane %v713_v24, %v5529_v54  ;;  %v5640_v50 = vrot.slane %v690_v19, %v5502_v37  ;;  %v453_v44 = vadd.f32 %v5513_v47, %v5498_v33  ;;  %v1082_v56 = vrot.slane %v1068_v35, %v5502_v37  ;;  %v5690_v35 = vpop.f32.mrb[6].mxu0 }
 0x135   : > { %v2453_v57 = vsel %vm322_vm0, %v2175_v38, 0.0  ;;  %v2177_v58 = vmul.f32 %v1771_v39, %v609_v43  ;;  %v1475_v61 = vrot.slane %v723_v40, %v5529_v54  ;;  %v5649_v2 = vrot.slane %v692_v34, %v5502_v37  ;;  %v5695_v38 = vpop.f32.mrb[7].mxu0 }
 0x136   : > { %2424 = vadd.xlane.f32.xlu1 %v2423_v13  ;;  %v2456_v3 = vsel %vm322_vm0, %v2176_v42, 0.0  ;;  %v2101_v4 = vmul.f32 %v1467_v49, %v533_v46  ;;  %v1479_v7 = vrot.slane %v5640_v50, %v5529_v54  ;;  %v1113_v47 = vcombine.high %v5562_v16, %v5562_v16  ;;  %v601_v49 = vld [vmem:[%s5420_s14 + $0x228] sm:$0xff] }
 0x137   : > { %v5658_v9 = vmax.f32 %v453_v44, 0.0  ;;  %v1084_v10 = vcombine.high %v1082_v56, %v1082_v56  ;;  %v2459_v11 = vsel %vm322_vm0, %v2177_v58, 0.0  ;;  %v2103_v12 = vmul.f32 %v1475_v61, %v535_v5  ;;  %v556_v5 = vld [vmem:[%s5420_s14 + $0xc0] sm:$0xff] }
 0x138   : > { %2259 = vadd.xlane.f32.xlu0 %v2258_v62  ;;  %v1483_v13 = vrot.slane %v5649_v2, %v5529_v54  ;;  %v1115_v14 = vcombine.high %v5572_v26, %v5572_v26  ;;  %v2231_v15 = vsel %vm322_vm0, %v2101_v4, 0.0  ;;  %v2104_v16 = vmul.f32 %v1479_v7, %v536_v8  ;;  %v537_v62 = vld [vmem:[%s5420_s14 + $0x28] sm:$0xff]  ;;  %v547_v8 = vld [vmem:[%s5420_s14 + $0x78] sm:$0xff] }
 0x139   : > { %v1727_v17 = vrot.slane %v1113_v47, %v5529_v54  ;;  %v5669_v18 = vrot.slane %v1082_v56, %v5502_v37  ;;  %v830_v45 = vrot.slane %v5658_v9, %v5502_v37  ;;  %v493_v26 = vadd.f32 %v5515_v48, %v5498_v33  ;;  %v546_v56 = vld [vmem:[%s5420_s14 + $0x70] sm:$0xff] }
 0x13a   : > { %2262 = vadd.xlane.f32.xlu1 %v2261_v21  ;;  %v2237_v19 = vsel %vm322_vm0, %v2103_v12, 0.0  ;;  %v2105_v20 = vmul.f32 %v1483_v13, %v537_v62  ;;  %v1731_v21 = vrot.slane %v1115_v14, %v5529_v54  ;;  %v5679_v22 = vrot.slane %v1084_v10, %v5502_v37  ;;  %v5724_v12 = vpop.f32.mrb[6].mxu1 }
 0x13b   : > { %v2240_v24 = vsel %vm322_vm0, %v2104_v16, 0.0  ;;  %v1735_v28 = vrot.slane %v5669_v18, %v5529_v54  ;;  %v771_v48 = vcombine.high %v5587_v55, %v5587_v55  ;;  %v838_v29 = vcombine.high %v830_v45, %v830_v45  ;;  %v5730_v16 = vpop.f32.mrb[7].mxu1 }
 0x13c   : > { %2265 = vadd.xlane.f32.xlu0 %v2264_v25  ;;  %v2166_v25 = vmul.f32 %v1727_v17, %v598_v6  ;;  %v5688_v34 = vmax.f32 %v493_v26, 0.0  ;;  %v2243_v39 = vsel %vm322_vm0, %v2105_v20, 0.0  ;;  %v2167_v40 = vmul.f32 %v1731_v21, %v599_v27  ;;  %v610_v20 = vld [vmem:[%s5420_s14 + $0x270] sm:$0xff] }
 0x13d   : > { %v773_v55 = vcombine.high %v5594_v63, %v5594_v63  ;;  %v2168_v43 = vmul.f32 %v1735_v28, %v600_v31  ;;  %v1519_v46 = vrot.slane %v771_v48, %v5529_v54  ;;  %v448_v63 = vadd.f32 %v5498_v33, %v5520_v51 }
 0x13e   : > { %2268 = vadd.xlane.f32.xlu1 %v2267_v36  ;;  %v5693_v36 = vrot.slane %v830_v45, %v5502_v37  ;;  %v2426_v42 = vsel %vm322_vm0, %v2166_v25, 0.0  ;;  %v1222_v44 = vrot.slane %v5688_v34, %v5502_v37  ;;  %v2429_v61 = vsel %vm322_vm0, %v2167_v40, 0.0 }
 0x13f   : > { %v1523_v4 = vrot.slane %v773_v55, %v5529_v54  ;;  %v2432_v7 = vsel %vm322_vm0, %v2168_v43, 0.0  ;;  %v2114_v47 = vmul.f32 %v1519_v46, %v546_v56  ;;  %v1163_v10 = vcombine.high %v5616_v53, %v5616_v53 }
 0x140   : > { %2451 = vadd.xlane.f32.xlu0 %v2450_v41  ;;  %v1739_v41 = vrot.slane %v5679_v22, %v5529_v54  ;;  %v1559_v58 = vrot.slane %v5693_v36, %v5529_v54  ;;  %v5727_v13 = vrot.slane %v1222_v44, %v5502_v37  ;;  %v5732_v62 = vmax.f32 %v448_v63, 0.0 }
 0x141   : > { %v2115_v53 = vmul.f32 %v1523_v4, %v547_v8  ;;  %v1165_v45 = vcombine.high %v5623_v23, %v5623_v23  ;;  %v2270_v6 = vsel %vm322_vm0, %v2114_v47, 0.0  ;;  %v1775_v26 = vrot.slane %v1163_v10, %v5529_v54  ;;  %v539_v8 = vld [vmem:[%s5420_s14 + $0x38] sm:$0xff] }
 0x142   : > { %2454 = vadd.xlane.f32.xlu1 %v2453_v57  ;;  %v5709_v57 = vrot.slane %v838_v29, %v5502_v37  ;;  %v2124_v14 = vmul.f32 %v1559_v58, %v556_v5  ;;  %v1815_v25 = vrot.slane %v5727_v13, %v5529_v54  ;;  %v781_v23 = vrot.slane %v5732_v62, %v5502_v37  ;;  %v620_v29 = vld [vmem:[%s5420_s14 + $0x2c0] sm:$0xff] }
 0x143   : > { %v488_v27 = vadd.f32 %v5498_v33, %v5522_v52  ;;  %v2273_v28 = vsel %vm322_vm0, %v2115_v53, 0.0  ;;  %v1779_v48 = vrot.slane %v1165_v45, %v5529_v54  ;;  %v2178_v31 = vmul.f32 %v1775_v26, %v610_v20  ;;  %v621_v52 = vld [vmem:[%s5420_s14 + $0x2c8] sm:$0xff] }
 0x144   : > { %2457 = vadd.xlane.f32.xlu0 %v2456_v3  ;;  %v2169_v3 = vmul.f32 %v1739_v41, %v601_v49  ;;  %v1563_v51 = vrot.slane %v5709_v57, %v5529_v54  ;;  %v722_v40 = vcombine.high %v5640_v50, %v5640_v50  ;;  %v789_v43 = vcombine.high %v781_v23, %v781_v23  ;;  %v549_v20 = vld [vmem:[%s5420_s14 + $0x88] sm:$0xff] }
 0x145   : > { %v5760_v49 = vmax.f32 %v488_v27, 0.0  ;;  %v5765_v56 = vrot.slane %v781_v23, %v5502_v37  ;;  %v2462_v50 = vsel %vm322_vm0, %v2178_v31, 0.0  ;;  %v603_v31 = vld [vmem:[%s5420_s14 + $0x238] sm:$0xff] }
 0x146   : > { %2460 = vadd.xlane.f32.xlu1 %v2459_v11  ;;  %v1230_v11 = vcombine.high %v1222_v44, %v1222_v44  ;;  %v2435_v17 = vsel %vm322_vm0, %v2169_v3, 0.0  ;;  %v724_v44 = vcombine.high %v5649_v2, %v5649_v2  ;;  %v1487_v58 = vrot.slane %v722_v40, %v5529_v54 }
 0x147   : > { %v1173_v4 = vrot.slane %v5760_v49, %v5502_v37  ;;  %v1527_v10 = vrot.slane %v5765_v56, %v5529_v54  ;;  %v868_v40 = vcombine.high %v5693_v36, %v5693_v36 }
 0x148   : > { %2232 = vadd.xlane.f32.xlu0 %v2231_v15  ;;  %v557_v15 = vld [vmem:[%s5420_s14 + $0xc8] sm:$0xff]  ;;  %v5741_v21 = vrot.slane %v1230_v11, %v5502_v37  ;;  %v1491_v2 = vrot.slane %v724_v44, %v5529_v54  ;;  %v1114_v11 = vcombine.high %v5669_v18, %v5669_v18  ;;  %v870_v44 = vcombine.high %v5709_v57, %v5709_v57 }
 0x149   : > { %v5792_v26 = vrot.slane %v1173_v4, %v5502_v37 }
 0x14a   : > { %2238 = vadd.xlane.f32.xlu1 %v2237_v19  ;;  %v2125_v19 = vmul.f32 %v1563_v51, %v557_v15  ;;  %v1819_v55 = vrot.slane %v5741_v21, %v5529_v54  ;;  %v823_v15 = vcombine.high %v5658_v9, %v5658_v9  ;;  %v2107_v53 = vmul.f32 %v1491_v2, %v539_v8 }
 0x14b   : > { %v1743_v9 = vrot.slane %v1114_v11, %v5529_v54  ;;  %v1571_v57 = vrot.slane %v870_v44, %v5529_v54 }
 0x14c   : > { %2241 = vadd.xlane.f32.xlu0 %v2240_v24  ;;  %v2300_v24 = vsel %vm322_vm0, %v2124_v14, 0.0  ;;  %v2303_v41 = vsel %vm322_vm0, %v2125_v19, 0.0  ;;  %v2189_v63 = vmul.f32 %v1819_v55, %v621_v52  ;;  %v548_v14 = vld [vmem:[%s5420_s14 + $0x80] sm:$0xff]  ;;  %v2249_v23 = vsel %vm322_vm0, %v2107_v53, 0.0 }
 0x14d   : > { %v2116_v19 = vmul.f32 %v1527_v10, %v548_v14  ;;  %v559_v10 = vld [vmem:[%s5420_s14 + $0xd8] sm:$0xff]  ;;  %v560_v14 = vld [vmem:[%s5420_s14 + $0xe0] sm:$0xff] }
 0x14e   : > { %2244 = vadd.xlane.f32.xlu1 %v2243_v39  ;;  %v611_v39 = vld [vmem:[%s5420_s14 + $0x278] sm:$0xff]  ;;  %v2495_v51 = vsel %vm322_vm0, %v2189_v63, 0.0  ;;  %v1567_v63 = vrot.slane %v868_v40, %v5529_v54  ;;  %v819_v40 = vcombine.high %v5765_v56, %v5765_v56 }
 0x14f   : > { %v2179_v46 = vmul.f32 %v1779_v48, %v611_v39  ;;  %v2276_v48 = vsel %vm322_vm0, %v2116_v19, 0.0  ;;  %v1783_v39 = vrot.slane %v5792_v26, %v5529_v54 }
 0x150   : > { %2427 = vadd.xlane.f32.xlu0 %v2426_v42  ;;  %v2188_v42 = vmul.f32 %v1815_v25, %v620_v29  ;;  %v837_v25 = vrot.slane %v823_v15, %v5502_v37  ;;  %v774_v15 = vcombine.high %v5732_v62, %v5732_v62 }
 0x151   : > { %v2465_v5 = vsel %vm322_vm0, %v2179_v46, 0.0 }
 0x152   : > { %2430 = vadd.xlane.f32.xlu1 %v2429_v61  ;;  %v538_v61 = vld [vmem:[%s5420_s14 + $0x30] sm:$0xff]  ;;  %v2492_v3 = vsel %vm322_vm0, %v2188_v42, 0.0  ;;  %v839_v55 = vcombine.high %v837_v25, %v837_v25  ;;  %v1215_v42 = vcombine.high %v5688_v34, %v5688_v34  ;;  %v5822_v34 = vrot.slane %v837_v25, %v5502_v37 }
 0x153   : > { %v2106_v47 = vmul.f32 %v1487_v58, %v538_v61  ;;  %v613_v58 = vld [vmem:[%s5420_s14 + $0x288] sm:$0xff]  ;;  %v558_v61 = vld [vmem:[%s5420_s14 + $0xd0] sm:$0xff]  ;;  %v788_v25 = vrot.slane %v774_v15, %v5502_v37 }
 0x154   : > { %2433 = vadd.xlane.f32.xlu0 %v2432_v7  ;;  %v5776_v7 = vrot.slane %v789_v43, %v5502_v37  ;;  %v5829_v2 = vrot.slane %v839_v55, %v5502_v37  ;;  %v2126_v8 = vmul.f32 %v1567_v63, %v558_v61  ;;  %v1575_v11 = vrot.slane %v5822_v34, %v5529_v54 }
 0x155   : > { %v2246_v18 = vsel %vm322_vm0, %v2106_v47, 0.0  ;;  %v790_v55 = vcombine.high %v788_v25, %v788_v25  ;;  %v5876_v63 = vrot.slane %v788_v25, %v5502_v37  ;;  %v463_v61 = vadd.f32 %v5534_v59, %v5498_v33 }
 0x156   : > { %2436 = vadd.xlane.f32.xlu1 %v2435_v17  ;;  %v1181_v17 = vcombine.high %v1173_v4, %v1173_v4  ;;  %v1531_v45 = vrot.slane %v5776_v7, %v5529_v54  ;;  %v2128_v19 = vmul.f32 %v1575_v11, %v560_v14  ;;  %v821_v44 = vcombine.high %v5776_v7, %v5776_v7 }
 0x157   : > { %v1543_v11 = vrot.slane %v5876_v63, %v5529_v54  ;;  %v1211_v59 = vcombine.high %v5792_v26, %v5792_v26  ;;  %v5894_v14 = vmax.f32 %v463_v61, 0.0 }
 0x158   : > { %2271 = vadd.xlane.f32.xlu0 %v2270_v6  ;;  %v1116_v6 = vcombine.high %v5679_v22, %v5679_v22  ;;  %v2117_v27 = vmul.f32 %v1531_v45, %v549_v20  ;;  %v2127_v45 = vmul.f32 %v1571_v57, %v559_v10  ;;  %v561_v20 = vld [vmem:[%s5420_s14 + $0xe8] sm:$0xff]  ;;  %v5885_v57 = vrot.slane %v790_v55, %v5502_v37  ;;  %v551_v10 = vld [vmem:[%s5420_s14 + $0x98] sm:$0xff] }
 0x15a   : > { %2274 = vadd.xlane.f32.xlu1 %v2273_v28  ;;  %v1747_v22 = vrot.slane %v1116_v6, %v5529_v54  ;;  %v5802_v28 = vrot.slane %v1181_v17, %v5502_v37  ;;  %v2279_v52 = vsel %vm322_vm0, %v2117_v27, 0.0  ;;  %v1579_v6 = vrot.slane %v5829_v2, %v5529_v54 }
 0x15c   : > { %2301 = vadd.xlane.f32.xlu0 %v2300_v24  ;;  %v602_v24 = vld [vmem:[%s5420_s14 + $0x230] sm:$0xff]  ;;  %v2171_v43 = vmul.f32 %v1747_v22, %v603_v31  ;;  %v1787_v46 = vrot.slane %v5802_v28, %v5529_v54  ;;  %v2129_v27 = vmul.f32 %v1579_v6, %v561_v20  ;;  %v623_v31 = vld [vmem:[%s5420_s14 + $0x2d8] sm:$0xff]  ;;  %v1213_v6 = vcombine.high %v5802_v28, %v5802_v28 }
 0x15d   : > { %v2170_v29 = vmul.f32 %v1743_v9, %v602_v24  ;;  %v622_v24 = vld [vmem:[%s5420_s14 + $0x2d0] sm:$0xff]  ;;  %v503_v28 = vadd.f32 %v5536_v60, %v5498_v33  ;;  %v869_v60 = vcombine.high %v5822_v34, %v5822_v34 }
 0x15e   : > { %2304 = vadd.xlane.f32.xlu1 %v2303_v41  ;;  %v612_v41 = vld [vmem:[%s5420_s14 + $0x280] sm:$0xff]  ;;  %v2441_v4 = vsel %vm322_vm0, %v2171_v43, 0.0 }
 0x15f   : > { %v2438_v36 = vsel %vm322_vm0, %v2170_v29, 0.0  ;;  %v5924_v55 = vmax.f32 %v503_v28, 0.0 }
 0x160   : > { %2463 = vadd.xlane.f32.xlu0 %v2462_v50  ;;  %v2180_v50 = vmul.f32 %v1783_v39, %v612_v41  ;;  %v624_v41 = vld [vmem:[%s5420_s14 + $0x2e0] sm:$0xff] }
 0x162   : > { %2466 = vadd.xlane.f32.xlu1 %v2465_v5  ;;  %v2181_v5 = vmul.f32 %v1787_v46, %v613_v58  ;;  %v2468_v47 = vsel %vm322_vm0, %v2180_v50, 0.0  ;;  %v625_v50 = vld [vmem:[%s5420_s14 + $0x2e8] sm:$0xff]  ;;  %v1535_v58 = vrot.slane %v819_v40, %v5529_v54 }
 0x164   : > { %2493 = vadd.xlane.f32.xlu0 %v2492_v3  ;;  %v1229_v3 = vrot.slane %v1215_v42, %v5502_v37  ;;  %v2471_v53 = vsel %vm322_vm0, %v2181_v5, 0.0  ;;  %v1166_v42 = vcombine.high %v5760_v49, %v5760_v49  ;;  %v550_v49 = vld [vmem:[%s5420_s14 + $0x90] sm:$0xff]  ;;  %v1539_v5 = vrot.slane %v821_v44, %v5529_v54 }
 0x165   : > { %v871_v44 = vcombine.high %v5829_v2, %v5829_v2  ;;  %v458_v2 = vadd.f32 %v5498_v33, %v5544_v0 }
 0x166   : > { %2496 = vadd.xlane.f32.xlu1 %v2495_v51  ;;  %v1260_v51 = vcombine.high %v5727_v13, %v5727_v13  ;;  %v1231_v17 = vcombine.high %v1229_v3, %v1229_v3  ;;  %v2306_v13 = vsel %vm322_vm0, %v2126_v8, 0.0  ;;  %v5849_v62 = vrot.slane %v1229_v3, %v5502_v37 }
 0x167   : > { %v1180_v3 = vrot.slane %v1166_v42, %v5502_v37  ;;  %v2118_v8 = vmul.f32 %v1535_v58, %v550_v49  ;;  %v1320_v58 = vrot.slane %v5924_v55, %v5502_v37  ;;  %v562_v49 = vld [vmem:[%s5420_s14 + $0xf0] sm:$0xff] }
 0x168   : > { %2247 = vadd.xlane.f32.xlu0 %v2246_v18  ;;  %v1262_v18 = vcombine.high %v5741_v21, %v5741_v21  ;;  %v1823_v9 = vrot.slane %v1260_v51, %v5529_v54  ;;  %v5856_v22 = vrot.slane %v1231_v17, %v5502_v37  ;;  %v1831_v39 = vrot.slane %v5849_v62, %v5529_v54  ;;  %v552_v51 = vld [vmem:[%s5420_s14 + $0xa0] sm:$0xff] }
 0x169   : > { %v1182_v15 = vcombine.high %v1180_v3, %v1180_v3  ;;  %v2120_v26 = vmul.f32 %v1543_v11, %v552_v51  ;;  %v5905_v20 = vrot.slane %v1180_v3, %v5502_v37  ;;  %v563_v11 = vld [vmem:[%s5420_s14 + $0xf8] sm:$0xff]  ;;  %v1328_v51 = vcombine.high %v1320_v58, %v1320_v58 }
 0x16a   : > { %2250 = vadd.xlane.f32.xlu1 %v2249_v23  ;;  %v2309_v23 = vsel %vm322_vm0, %v2127_v45, 0.0  ;;  %v1827_v21 = vrot.slane %v1262_v18, %v5529_v54  ;;  %v2190_v29 = vmul.f32 %v1823_v9, %v622_v24  ;;  %v1835_v46 = vrot.slane %v5856_v22, %v5529_v54  ;;  %v614_v24 = vld [vmem:[%s5420_s14 + $0x290] sm:$0xff] }
 0x16b   : > { %v2192_v56 = vmul.f32 %v1831_v39, %v624_v41  ;;  %v1547_v45 = vrot.slane %v5885_v57, %v5529_v54  ;;  %v2282_v18 = vsel %vm322_vm0, %v2118_v8, 0.0  ;;  %v928_v9 = vrot.slane %v5894_v14, %v5502_v37  ;;  %v616_v41 = vld [vmem:[%s5420_s14 + $0x2a0] sm:$0xff] }
 0x16c   : > { %2277 = vadd.xlane.f32.xlu0 %v2276_v48  ;;  %v2312_v48 = vsel %vm322_vm0, %v2128_v19, 0.0  ;;  %v2191_v43 = vmul.f32 %v1827_v21, %v623_v31  ;;  %v1791_v19 = vrot.slane %v1211_v59, %v5529_v54  ;;  %v5915_v21 = vrot.slane %v1182_v15, %v5502_v37  ;;  %v615_v31 = vld [vmem:[%s5420_s14 + $0x298] sm:$0xff] }
 0x16d   : > { %v1799_v39 = vrot.slane %v5905_v20, %v5529_v54  ;;  %v936_v40 = vcombine.high %v928_v9, %v928_v9  ;;  %v5927_v42 = vrot.slane %v928_v9, %v5502_v37  ;;  %v1261_v59 = vcombine.high %v5849_v62, %v5849_v62  ;;  %v626_v9 = vld [vmem:[%s5420_s14 + $0x2f0] sm:$0xff] }
 0x16e   : > { %2280 = vadd.xlane.f32.xlu1 %v2279_v52  ;;  %v2315_v52 = vsel %vm322_vm0, %v2129_v27, 0.0  ;;  %v2501_v7 = vsel %vm322_vm0, %v2191_v43, 0.0  ;;  %v1795_v27 = vrot.slane %v1213_v6, %v5529_v54  ;;  %v5957_v15 = vrot.slane %v1320_v58, %v5502_v37 }
 0x16f   : > { %v5941_v61 = vrot.slane %v936_v40, %v5502_v37  ;;  %v1623_v3 = vrot.slane %v5927_v42, %v5529_v54  ;;  %v1263_v62 = vcombine.high %v5856_v22, %v5856_v22 }
 0x170   : > { %2439 = vadd.xlane.f32.xlu0 %v2438_v36  ;;  %v2498_v36 = vsel %vm322_vm0, %v2190_v29, 0.0  ;;  %v2182_v29 = vmul.f32 %v1791_v19, %v614_v24  ;;  %v2183_v43 = vmul.f32 %v1795_v27, %v615_v31  ;;  %v5969_v24 = vrot.slane %v1328_v51, %v5502_v37 }
 0x171   : > { %v1627_v0 = vrot.slane %v5941_v61, %v5529_v54 }
 0x172   : > { %2442 = vadd.xlane.f32.xlu1 %v2441_v4  ;;  %v2193_v4 = vmul.f32 %v1835_v46, %v625_v50  ;;  %v1803_v46 = vrot.slane %v5915_v21, %v5529_v54  ;;  %v2474_v34 = vsel %vm322_vm0, %v2182_v29, 0.0  ;;  %v1583_v50 = vrot.slane %v869_v60, %v5529_v54  ;;  %v636_v29 = vld [vmem:[%s5420_s14 + $0x340] sm:$0xff] }
 0x173   : > { %v820_v60 = vcombine.high %v5876_v63, %v5876_v63 }
 0x174   : > { %2469 = vadd.xlane.f32.xlu0 %v2468_v47  ;;  %v2504_v47 = vsel %vm322_vm0, %v2192_v56, 0.0  ;;  %v2507_v17 = vsel %vm322_vm0, %v2193_v4, 0.0  ;;  %v617_v56 = vld [vmem:[%s5420_s14 + $0x2a8] sm:$0xff] }
 0x175   : > { %v2185_v4 = vmul.f32 %v1803_v46, %v617_v56 }
 0x176   : > { %2472 = vadd.xlane.f32.xlu1 %v2471_v53  ;;  %v2119_v53 = vmul.f32 %v1539_v5, %v551_v10  ;;  %v1587_v5 = vrot.slane %v871_v44, %v5529_v54  ;;  %v2130_v10 = vmul.f32 %v1583_v50, %v562_v49  ;;  %v822_v44 = vcombine.high %v5885_v57, %v5885_v57  ;;  %v554_v50 = vld [vmem:[%s5420_s14 + $0xb0] sm:$0xff] }
 0x177   : > { %v2483_v6 = vsel %vm322_vm0, %v2185_v4, 0.0  ;;  %v555_v4 = vld [vmem:[%s5420_s14 + $0xb8] sm:$0xff] }
 0x178   : > { %2307 = vadd.xlane.f32.xlu0 %v2306_v13  ;;  %v553_v13 = vld [vmem:[%s5420_s14 + $0xa8] sm:$0xff]  ;;  %v2285_v25 = vsel %vm322_vm0, %v2119_v53, 0.0  ;;  %v1555_v57 = vrot.slane %v822_v44, %v5529_v54 }
 0x179   : > { %v573_v53 = vld [vmem:[%s5420_s14 + $0x148] sm:$0xff] }
 0x17a   : > { %2310 = vadd.xlane.f32.xlu1 %v2309_v23  ;;  %v2121_v23 = vmul.f32 %v1547_v45, %v553_v13  ;;  %v5960_v45 = vmax.f32 %v458_v2, 0.0  ;;  %v1839_v13 = vrot.slane %v1261_v59, %v5529_v54  ;;  %v2141_v19 = vmul.f32 %v1627_v0, %v573_v53 }
 0x17b   : > { %v2123_v51 = vmul.f32 %v1555_v57, %v555_v4  ;;  %v1358_v57 = vcombine.high %v5957_v15, %v5957_v15 }
 0x17c   : > { %2313 = vadd.xlane.f32.xlu0 %v2312_v48  ;;  %v2288_v48 = vsel %vm322_vm0, %v2120_v26, 0.0  ;;  %v2318_v26 = vsel %vm322_vm0, %v2130_v10, 0.0  ;;  %v879_v22 = vrot.slane %v5960_v45, %v5502_v37  ;;  %v2194_v31 = vmul.f32 %v1839_v13, %v626_v9  ;;  %v564_v10 = vld [vmem:[%s5420_s14 + $0x100] sm:$0xff] }
 0x17d   : > { %v2351_v40 = vsel %vm322_vm0, %v2141_v19, 0.0  ;;  %v2297_v13 = vsel %vm322_vm0, %v2123_v51, 0.0  ;;  %v872_v4 = vcombine.high %v5960_v45, %v5960_v45  ;;  %v1887_v45 = vrot.slane %v1358_v57, %v5529_v54 }
 0x17e   : > { %2316 = vadd.xlane.f32.xlu1 %v2315_v52  ;;  %v2291_v52 = vsel %vm322_vm0, %v2121_v23, 0.0  ;;  %v498_v23 = vadd.f32 %v5498_v33, %v5546_v1  ;;  %v637_v33 = vld [vmem:[%s5420_s14 + $0x348] sm:$0xff]  ;;  %v887_v1 = vcombine.high %v879_v22, %v879_v22  ;;  %v2510_v63 = vsel %vm322_vm0, %v2194_v31, 0.0 }
 0x17f   : > { %v1313_v31 = vcombine.high %v5924_v55, %v5924_v55 }
 0x180   : > { %2499 = vadd.xlane.f32.xlu0 %v2498_v36  ;;  %v2184_v36 = vmul.f32 %v1799_v39, %v616_v41  ;;  %v627_v39 = vld [vmem:[%s5420_s14 + $0x2f8] sm:$0xff]  ;;  %v1883_v41 = vrot.slane %v5969_v24, %v5529_v54  ;;  %v6004_v2 = vrot.slane %v887_v1, %v5502_v37 }
 0x181   : > { %v1327_v44 = vrot.slane %v1313_v31, %v5502_v37 }
 0x182   : > { %2502 = vadd.xlane.f32.xlu1 %v2501_v7  ;;  %v2477_v7 = vsel %vm322_vm0, %v2183_v43, 0.0  ;;  %v2480_v8 = vsel %vm322_vm0, %v2184_v36, 0.0  ;;  %v5988_v43 = vmax.f32 %v498_v23, 0.0  ;;  %v1551_v36 = vrot.slane %v820_v60, %v5529_v54 }
 0x183   : > { %v2205_v56 = vmul.f32 %v1883_v41, %v637_v33  ;;  %v1595_v0 = vrot.slane %v6004_v2, %v5529_v54  ;;  %v968_v41 = vcombine.high %v5941_v61, %v5941_v61  ;;  %v629_v33 = vld [vmem:[%s5420_s14 + $0x308] sm:$0xff] }
 0x184   : > { %2505 = vadd.xlane.f32.xlu0 %v2504_v47  ;;  %v572_v47 = vld [vmem:[%s5420_s14 + $0x140] sm:$0xff]  ;;  %v1271_v49 = vrot.slane %v5988_v43, %v5502_v37 }
 0x185   : > { %v1635_v61 = vrot.slane %v968_v41, %v5529_v54 }
 0x186   : > { %2508 = vadd.xlane.f32.xlu1 %v2507_v17  ;;  %v2140_v17 = vmul.f32 %v1623_v3, %v572_v47  ;;  %v1212_v47 = vcombine.high %v5905_v20, %v5905_v20  ;;  %v1279_v59 = vcombine.high %v1271_v49, %v1271_v49  ;;  %v6020_v53 = vrot.slane %v1271_v49, %v5502_v37  ;;  %v575_v49 = vld [vmem:[%s5420_s14 + $0x158] sm:$0xff] }
 0x188   : > { %2283 = vadd.xlane.f32.xlu0 %v2282_v18  ;;  %v2131_v18 = vmul.f32 %v1587_v5, %v563_v11  ;;  %v2348_v28 = vsel %vm322_vm0, %v2140_v17, 0.0  ;;  %v921_v11 = vcombine.high %v5894_v14, %v5894_v14  ;;  %v1214_v17 = vcombine.high %v5915_v21, %v5915_v21 }
 0x189   : > { %v1807_v14 = vrot.slane %v1212_v47, %v5529_v54  ;;  %v6030_v9 = vrot.slane %v1279_v59, %v5502_v37  ;;  %v1847_v23 = vrot.slane %v6020_v53, %v5529_v54  ;;  %v1360_v59 = vcombine.high %v5969_v24, %v5969_v24 }
 0x18a   : > { %2286 = vadd.xlane.f32.xlu1 %v2285_v25  ;;  %v1879_v25 = vrot.slane %v5957_v15, %v5529_v54  ;;  %v2321_v27 = vsel %vm322_vm0, %v2131_v18, 0.0  ;;  %v565_v18 = vld [vmem:[%s5420_s14 + $0x108] sm:$0xff]  ;;  %v1811_v21 = vrot.slane %v1214_v17, %v5529_v54  ;;  %v6079_v17 = vrot.slane %v1327_v44, %v5502_v37 }
 0x18b   : > { %v2133_v19 = vmul.f32 %v1595_v0, %v565_v18  ;;  %v577_v0 = vld [vmem:[%s5420_s14 + $0x168] sm:$0xff]  ;;  %v886_v18 = vrot.slane %v872_v4, %v5502_v37  ;;  %v1309_v4 = vcombine.high %v6020_v53, %v6020_v53 }
 0x18c   : > { %2289 = vadd.xlane.f32.xlu0 %v2288_v48  ;;  %v1843_v48 = vrot.slane %v1263_v62, %v5529_v54  ;;  %v618_v62 = vld [vmem:[%s5420_s14 + $0x2b0] sm:$0xff] }
 0x18e   : > { %2292 = vadd.xlane.f32.xlu1 %v2291_v52  ;;  %v2204_v52 = vmul.f32 %v1879_v25, %v636_v29  ;;  %v2195_v46 = vmul.f32 %v1843_v48, %v627_v39  ;;  %v2186_v25 = vmul.f32 %v1807_v14, %v618_v62  ;;  %v628_v48 = vld [vmem:[%s5420_s14 + $0x300] sm:$0xff]  ;;  %v2327_v39 = vsel %vm322_vm0, %v2133_v19, 0.0 }
 0x190   : > { %2475 = vadd.xlane.f32.xlu0 %v2474_v34  ;;  %v5993_v34 = vrot.slane %v879_v22, %v5502_v37  ;;  %v2540_v58 = vsel %vm322_vm0, %v2204_v52, 0.0  ;;  %v2513_v3 = vsel %vm322_vm0, %v2195_v46, 0.0  ;;  %v619_v22 = vld [vmem:[%s5420_s14 + $0x2b8] sm:$0xff]  ;;  %v2196_v52 = vmul.f32 %v1847_v23, %v628_v48  ;;  %v574_v46 = vld [vmem:[%s5420_s14 + $0x150] sm:$0xff] }
 0x191   : > { %v2187_v60 = vmul.f32 %v1811_v21, %v619_v22  ;;  %v888_v48 = vcombine.high %v886_v18, %v886_v18 }
 0x192   : > { %2478 = vadd.xlane.f32.xlu1 %v2477_v7  ;;  %v2122_v7 = vmul.f32 %v1551_v36, %v554_v50  ;;  %v1591_v5 = vrot.slane %v5993_v34, %v5529_v54  ;;  %v2516_v50 = vsel %vm322_vm0, %v2196_v52, 0.0  ;;  %v917_v22 = vcombine.high %v5993_v34, %v5993_v34  ;;  %v641_v52 = vld [vmem:[%s5420_s14 + $0x368] sm:$0xff] }
 0x193   : > { %v919_v34 = vcombine.high %v6004_v2, %v6004_v2 }
 0x194   : > { %2481 = vadd.xlane.f32.xlu0 %v2480_v8  ;;  %v2543_v8 = vsel %vm322_vm0, %v2205_v56, 0.0  ;;  %v2294_v20 = vsel %vm322_vm0, %v2122_v7, 0.0  ;;  %v576_v7 = vld [vmem:[%s5420_s14 + $0x160] sm:$0xff] }
 0x196   : > { %2484 = vadd.xlane.f32.xlu1 %v2483_v6  ;;  %v2132_v6 = vmul.f32 %v1591_v5, %v564_v10  ;;  %v1329_v5 = vcombine.high %v1327_v44, %v1327_v44  ;;  %v2143_v10 = vmul.f32 %v1635_v61, %v575_v49  ;;  %v6122_v44 = vld [vmem:[%s7961_s2] ss:$0 sm:$0xff]  ;;  %v6132_v49 = vrot.slane %v888_v48, %v5502_v37 }
 0x197   : > { %v473_v2 = vadd.f32 %v6122_v44, %v5690_v35 }
 0x198   : > { %2319 = vadd.xlane.f32.xlu0 %v2318_v26  ;;  %v935_v26 = vrot.slane %v921_v11, %v5502_v37  ;;  %v2357_v24 = vsel %vm322_vm0, %v2143_v10, 0.0 }
 0x199   : > { %v6143_v10 = vmax.f32 %v473_v2, 0.0 }
 0x19a   : > { %2322 = vadd.xlane.f32.xlu1 %v2321_v27  ;;  %v966_v27 = vcombine.high %v5927_v42, %v5927_v42  ;;  %v937_v29 = vcombine.high %v935_v26, %v935_v26  ;;  %v2486_v42 = vsel %vm322_vm0, %v2186_v25, 0.0  ;;  %v6050_v55 = vrot.slane %v935_v26, %v5502_v37 }
 0x19b   : > { %v1891_v26 = vrot.slane %v1360_v59, %v5529_v54  ;;  %v1895_v25 = vrot.slane %v6079_v17, %v5529_v54 }
 0x19c   : > { %2349 = vadd.xlane.f32.xlu0 %v2348_v28  ;;  %v2324_v28 = vsel %vm322_vm0, %v2132_v6, 0.0  ;;  %v1631_v1 = vrot.slane %v966_v27, %v5529_v54  ;;  %v6057_v56 = vrot.slane %v937_v29, %v5502_v37  ;;  %v638_v6 = vld [vmem:[%s5420_s14 + $0x350] sm:$0xff]  ;;  %v640_v27 = vld [vmem:[%s5420_s14 + $0x360] sm:$0xff]  ;;  %v1264_v29 = vcombine.high %v5988_v43, %v5988_v43 }
 0x19d   : > { %v2206_v21 = vmul.f32 %v1887_v45, %v638_v6  ;;  %v6114_v43 = vrot.slane %v886_v18, %v5502_v37  ;;  %v1311_v45 = vcombine.high %v6030_v9, %v6030_v9  ;;  %v569_v18 = vld [vmem:[%s5420_s14 + $0x128] sm:$0xff] }
 0x19e   : > { %2352 = vadd.xlane.f32.xlu1 %v2351_v40  ;;  %v1851_v40 = vrot.slane %v6030_v9, %v5529_v54  ;;  %v1643_v11 = vrot.slane %v6057_v56, %v5529_v54  ;;  %v513_v9 = vadd.f32 %v6122_v44, %v5724_v12  ;;  %v967_v12 = vcombine.high %v6050_v55, %v6050_v55 }
 0x19f   : > { %v2546_v41 = vsel %vm322_vm0, %v2206_v21, 0.0  ;;  %v1607_v35 = vrot.slane %v6114_v43, %v5529_v54  ;;  %v630_v21 = vld [vmem:[%s5420_s14 + $0x310] sm:$0xff] }
 0x1a0   : > { %2511 = vadd.xlane.f32.xlu0 %v2510_v63  ;;  %v2489_v63 = vsel %vm322_vm0, %v2187_v60, 0.0  ;;  %v2197_v36 = vmul.f32 %v1851_v40, %v629_v33  ;;  %v2145_v62 = vmul.f32 %v1643_v11, %v577_v0  ;;  %v1599_v33 = vrot.slane %v917_v22, %v5529_v54 }
 0x1a1   : > { %v1611_v0 = vrot.slane %v6132_v49, %v5529_v54 }
 0x1a2   : > { %2514 = vadd.xlane.f32.xlu1 %v2513_v3  ;;  %v1639_v3 = vrot.slane %v6050_v55, %v5529_v54  ;;  %v969_v55 = vcombine.high %v6057_v56, %v6057_v56 }
 0x1a3   : > { %v2137_v22 = vmul.f32 %v1611_v0, %v569_v18 }
 0x1a4   : > { %2541 = vadd.xlane.f32.xlu0 %v2540_v58  ;;  %v2142_v58 = vmul.f32 %v1631_v1, %v574_v46  ;;  %v2144_v51 = vmul.f32 %v1639_v3, %v576_v7  ;;  %v566_v46 = vld [vmem:[%s5420_s14 + $0x110] sm:$0xff]  ;;  %v567_v7 = vld [vmem:[%s5420_s14 + $0x118] sm:$0xff] }
 0x1a5   : > { %v2134_v57 = vmul.f32 %v1599_v33, %v566_v46  ;;  %v2339_v2 = vsel %vm322_vm0, %v2137_v22, 0.0 }
 0x1a6   : > { %2544 = vadd.xlane.f32.xlu1 %v2543_v8  ;;  %v2519_v8 = vsel %vm322_vm0, %v2197_v36, 0.0  ;;  %v2354_v15 = vsel %vm322_vm0, %v2142_v58, 0.0  ;;  %v2360_v19 = vsel %vm322_vm0, %v2144_v51, 0.0  ;;  %v1603_v58 = vrot.slane %v919_v34, %v5529_v54 }
 0x1a7   : > { %v2330_v53 = vsel %vm322_vm0, %v2134_v57, 0.0  ;;  %v1647_v57 = vrot.slane %v967_v12, %v5529_v54 }
 0x1a8   : > { %2295 = vadd.xlane.f32.xlu0 %v2294_v20  ;;  %v2135_v51 = vmul.f32 %v1603_v58, %v567_v7 }
 0x1aa   : > { %2298 = vadd.xlane.f32.xlu1 %v2297_v13  ;;  %v6090_v13 = vrot.slane %v1329_v5, %v5502_v37 }
 0x1ac   : > { %2325 = vadd.xlane.f32.xlu0 %v2324_v28  ;;  %v639_v28 = vld [vmem:[%s5420_s14 + $0x358] sm:$0xff]  ;;  %v1899_v40 = vrot.slane %v6090_v13, %v5529_v54 }
 0x1ad   : > { %v2207_v60 = vmul.f32 %v1891_v26, %v639_v28 }
 0x1ae   : > { %2328 = vadd.xlane.f32.xlu1 %v2327_v39  ;;  %v2363_v39 = vsel %vm322_vm0, %v2145_v62, 0.0 }
 0x1af   : > { %v2549_v61 = vsel %vm322_vm0, %v2207_v60, 0.0  ;;  %v631_v60 = vld [vmem:[%s5420_s14 + $0x318] sm:$0xff] }
 0x1b0   : > { %2487 = vadd.xlane.f32.xlu0 %v2486_v42  ;;  %v2208_v42 = vmul.f32 %v1895_v25, %v640_v27  ;;  %v2333_v25 = vsel %vm322_vm0, %v2135_v51, 0.0  ;;  %v1859_v27 = vrot.slane %v1311_v45, %v5529_v54  ;;  %v1651_v45 = vrot.slane %v969_v55, %v5529_v54 }
 0x1b2   : > { %2490 = vadd.xlane.f32.xlu1 %v2489_v63  ;;  %v1278_v63 = vrot.slane %v1264_v29, %v5502_v37  ;;  %v2552_v3 = vsel %vm322_vm0, %v2208_v42, 0.0  ;;  %v632_v42 = vld [vmem:[%s5420_s14 + $0x320] sm:$0xff] }
 0x1b4   : > { %2517 = vadd.xlane.f32.xlu0 %v2516_v50  ;;  %v2209_v50 = vmul.f32 %v1899_v40, %v641_v52  ;;  %v1280_v11 = vcombine.high %v1278_v63, %v1278_v63  ;;  %v6156_v62 = vrot.slane %v1278_v63, %v5502_v37  ;;  %v6181_v52 = vmax.f32 %v513_v9, 0.0 }
 0x1b5   : > { %v6068_v47 = vpop.xlane.xlu0 %2253  ;;  %v2199_v63 = vmul.f32 %v1859_v27, %v631_v60 }
 0x1b6   : > { %2520 = vadd.xlane.f32.xlu1 %v2519_v8  ;;  %v568_v8 = vld [vmem:[%s5420_s14 + $0x120] sm:$0xff]  ;;  %v6170_v48 = vrot.slane %v1280_v11, %v5502_v37  ;;  %v1863_v40 = vrot.slane %v6156_v62, %v5529_v54 }
 0x1b7   : > { %v6081_v20 = vpop.xlane.xlu1 %2256  ;;  %v2136_v6 = vmul.f32 %v1607_v35, %v568_v8  ;;  %v1418_v35 = vrot.slane %v6181_v52, %v5502_v37  ;;  %v2525_v51 = vsel %vm322_vm0, %v2199_v63, 0.0  ;;  %v642_v63 = vld [vmem:[%s5420_s14 + $0x370] sm:$0xff] }
 0x1b8   : > { %2355 = vadd.xlane.f32.xlu0 %v2354_v15  ;;  %v2555_v15 = vsel %vm322_vm0, %v2209_v50, 0.0  ;;  %v2200_v58 = vmul.f32 %v1863_v40, %v632_v42  ;;  %v1361_v40 = vcombine.high %v6090_v13, %v6090_v13 }
 0x1b9   : > { %v6085_v14 = vpop.xlane.xlu0 %2445  ;;  %v2336_v29 = vsel %vm322_vm0, %v2136_v6, 0.0  ;;  %v1426_v9 = vcombine.high %v1418_v35, %v1418_v35 }
 0x1ba   : > { %7971 = vst [vmem:[#allocation6_spill] sm:$0xff] %v6085_v14  ;;  %2358 = vadd.xlane.f32.xlu1 %v2357_v24  ;;  %v1855_v24 = vrot.slane %v1309_v4, %v5529_v54  ;;  %v578_v4 = vld [vmem:[%s5420_s14 + $0x170] sm:$0xff]  ;;  %v2528_v6 = vsel %vm322_vm0, %v2200_v58, 0.0 }
 0x1bb   : > { %v6098_v23 = vpop.xlane.xlu1 %2448  ;;  %v2146_v18 = vmul.f32 %v1647_v57, %v578_v4  ;;  %v652_v4 = vld [vmem:[%s5420_s14 + $0x3c0] sm:$0xff] }
 0x1bc   : > { %7972 = vst [vmem:[#allocation7_spill] sm:$0xff] %v6098_v23  ;;  %2361 = vadd.xlane.f32.xlu0 %v2360_v19  ;;  %v1026_v19 = vrot.slane %v6143_v10, %v5502_v37 }
 0x1bd   : > { %v6103_v31 = vpop.xlane.xlu0 %2229  ;;  %v2366_v12 = vsel %vm322_vm0, %v2146_v18, 0.0 }
 0x1be   : > { %2364 = vadd.xlane.f32.xlu1 %v2363_v39  ;;  %v2198_v39 = vmul.f32 %v1855_v24, %v630_v21  ;;  %v6184_v33 = vrot.slane %v1026_v19, %v5502_v37  ;;  %v579_v24 = vld [vmem:[%s5420_s14 + $0x178] sm:$0xff] }
 0x1bf   : > { %v6116_v1 = vpop.xlane.xlu1 %2235 }
 0x1c0   : > { %2547 = vadd.xlane.f32.xlu0 %v2546_v41  ;;  %v1034_v41 = vcombine.high %v1026_v19, %v1026_v19  ;;  %v2522_v50 = vsel %vm322_vm0, %v2198_v39, 0.0  ;;  %v1687_v11 = vrot.slane %v6184_v33, %v5529_v54  ;;  %v1359_v19 = vcombine.high %v6079_v17, %v6079_v17 }
 0x1c1   : > { %v6127_v36 = vpop.xlane.xlu0 %2421  ;;  %v2147_v17 = vmul.f32 %v1651_v45, %v579_v24 }
 0x1c2   : > { %7973 = vst [vmem:[#allocation8_spill] sm:$0xff] %v6127_v36  ;;  %2550 = vadd.xlane.f32.xlu1 %v2549_v61  ;;  %v1867_v61 = vrot.slane %v6170_v48, %v5529_v54  ;;  %v6202_v8 = vrot.slane %v1034_v41, %v5502_v37  ;;  %v1903_v41 = vrot.slane %v1359_v19, %v5529_v54 }
 0x1c3   : > { %v6140_v5 = vpop.xlane.xlu1 %2424  ;;  %v2369_v57 = vsel %vm322_vm0, %v2147_v17, 0.0  ;;  %v570_v17 = vld [vmem:[%s5420_s14 + $0x130] sm:$0xff] }
 0x1c4   : > { %7974 = vst [vmem:[#allocation9_spill] sm:$0xff] %v6140_v5  ;;  %2553 = vadd.xlane.f32.xlu0 %v2552_v3  ;;  %v633_v3 = vld [vmem:[%s5420_s14 + $0x328] sm:$0xff] }
 0x1c5   : > { %v6145_v59 = vpop.xlane.xlu0 %2259  ;;  %v2201_v0 = vmul.f32 %v1867_v61, %v633_v3  ;;  %v6238_v61 = vrot.slane %v1426_v9, %v5502_v37  ;;  %v508_v3 = vadd.f32 %v6122_v44, %v5730_v16 }
 0x1c6   : > { %7975 = vst [vmem:[#allocation10_spill] sm:$0xff] %v6145_v59  ;;  %2556 = vadd.xlane.f32.xlu1 %v2555_v15  ;;  %v468_v15 = vadd.f32 %v6122_v44, %v5695_v38  ;;  %v1691_v38 = vrot.slane %v6202_v8, %v5529_v54 }
 0x1c7   : > { %v6158_v26 = vpop.xlane.xlu1 %2262  ;;  %v2531_v60 = vsel %vm322_vm0, %v2201_v0, 0.0  ;;  %v1947_v16 = vrot.slane %v6238_v61, %v5529_v54  ;;  %v6263_v24 = vmax.f32 %v508_v3, 0.0  ;;  %v1310_v3 = vcombine.high %v6156_v62, %v6156_v62 }
 0x1c8   : > { %2331 = vadd.xlane.f32.xlu0 %v2330_v53  ;;  %v588_v53 = vld [vmem:[%s5420_s14 + $0x1c0] sm:$0xff]  ;;  %v6227_v39 = vmax.f32 %v468_v15, 0.0  ;;  %v643_v15 = vld [vmem:[%s5420_s14 + $0x378] sm:$0xff]  ;;  %v1312_v62 = vcombine.high %v6170_v48, %v6170_v48 }
 0x1c9   : > { %v6165_v28 = vpop.xlane.xlu0 %2265  ;;  %v2156_v27 = vmul.f32 %v1687_v11, %v588_v53  ;;  %v2210_v11 = vmul.f32 %v1903_v41, %v642_v63  ;;  %v1369_v41 = vrot.slane %v6263_v24, %v5502_v37 }
 0x1ca   : > { %7976 = vst [vmem:[#allocation11_spill] sm:$0xff] %v6165_v28  ;;  %2334 = vadd.xlane.f32.xlu1 %v2333_v25  ;;  %v6222_v25 = vrot.slane %v1418_v35, %v5502_v37  ;;  %v977_v58 = vrot.slane %v6227_v39, %v5502_v37  ;;  %v1907_v35 = vrot.slane %v1361_v40, %v5529_v54 }
 0x1cb   : > { %v6178_v34 = vpop.xlane.xlu1 %2268 }
 0x1cc   : > { %2337 = vadd.xlane.f32.xlu0 %v2336_v29  ;;  %v589_v29 = vld [vmem:[%s5420_s14 + $0x1c8] sm:$0xff]  ;;  %v1943_v13 = vrot.slane %v6222_v25, %v5529_v54  ;;  %v985_v18 = vcombine.high %v977_v58, %v977_v58  ;;  %v2211_v19 = vmul.f32 %v1907_v35, %v643_v15  ;;  %v6268_v9 = vrot.slane %v977_v58, %v5502_v37 }
 0x1cd   : > { %v6186_v46 = vpop.xlane.xlu0 %2451 }
 0x1ce   : > { %7977 = vst [vmem:[#allocation12_spill] sm:$0xff] %v6186_v46  ;;  %2340 = vadd.xlane.f32.xlu1 %v2339_v2  ;;  %v2157_v2 = vmul.f32 %v1691_v38, %v589_v29  ;;  %v2220_v53 = vmul.f32 %v1943_v13, %v652_v4  ;;  %v2558_v38 = vsel %vm322_vm0, %v2210_v11, 0.0  ;;  %v571_v13 = vld [vmem:[%s5420_s14 + $0x138] sm:$0xff]  ;;  %v1655_v58 = vrot.slane %v6268_v9, %v5529_v54  ;;  %v580_v4 = vld [vmem:[%s5420_s14 + $0x180] sm:$0xff] }
 0x1cf   : > { %v6196_v7 = vpop.xlane.xlu1 %2454  ;;  %v1019_v11 = vcombine.high %v6143_v10, %v6143_v10  ;;  %v1871_v10 = vrot.slane %v1310_v3, %v5529_v54 }
 0x1d0   : > { %7978 = vst [vmem:[#allocation13_spill] sm:$0xff] %v6196_v7  ;;  %2523 = vadd.xlane.f32.xlu0 %v2522_v50  ;;  %v2396_v50 = vsel %vm322_vm0, %v2156_v27, 0.0  ;;  %v2399_v45 = vsel %vm322_vm0, %v2157_v2, 0.0  ;;  %v2561_v2 = vsel %vm322_vm0, %v2211_v19, 0.0  ;;  %v581_v19 = vld [vmem:[%s5420_s14 + $0x188] sm:$0xff]  ;;  %v659_v7 = vld [vmem:[%s5420_s14 + $0x3f8] sm:$0xff] }
 0x1d1   : > { %v6204_v56 = vpop.xlane.xlu0 %2457 }
 0x1d2   : > { %7979 = vst [vmem:[#allocation14_spill] sm:$0xff] %v6204_v56  ;;  %2526 = vadd.xlane.f32.xlu1 %v2525_v51  ;;  %v918_v51 = vcombine.high %v6114_v43, %v6114_v43  ;;  %v920_v43 = vcombine.high %v6132_v49, %v6132_v49  ;;  %v6279_v49 = vrot.slane %v985_v18, %v5502_v37 }
 0x1d3   : > { %v6217_v21 = vpop.xlane.xlu1 %2460  ;;  %v2148_v18 = vmul.f32 %v1655_v58, %v580_v4 }
 0x1d4   : > { %7980 = vst [vmem:[#allocation15_spill] sm:$0xff] %v6217_v21  ;;  %2529 = vadd.xlane.f32.xlu0 %v2528_v6  ;;  %v653_v6 = vld [vmem:[%s5420_s14 + $0x3c8] sm:$0xff]  ;;  %v1615_v27 = vrot.slane %v918_v51, %v5529_v54  ;;  %v1619_v63 = vrot.slane %v920_v43, %v5529_v54  ;;  %v1377_v51 = vcombine.high %v1369_v41, %v1369_v41 }
 0x1d5   : > { %v6224_v22 = vpop.xlane.xlu0 %2232 }
 0x1d6   : > { %2532 = vadd.xlane.f32.xlu1 %v2531_v60  ;;  %v2221_v60 = vmul.f32 %v1947_v16, %v653_v6  ;;  %v1659_v16 = vrot.slane %v6279_v49, %v5529_v54  ;;  %v6315_v48 = vrot.slane %v1377_v51, %v5502_v37 }
 0x1d7   : > { %v6234_v42 = vpop.xlane.xlu1 %2238 }
 0x1d8   : > { %2367 = vadd.xlane.f32.xlu0 %v2366_v12  ;;  %v2588_v12 = vsel %vm322_vm0, %v2220_v53, 0.0  ;;  %v2591_v35 = vsel %vm322_vm0, %v2221_v60, 0.0  ;;  %v6303_v53 = vrot.slane %v1369_v41, %v5502_v37  ;;  %v1875_v41 = vrot.slane %v1312_v62, %v5529_v54 }
 0x1d9   : > { %v6240_v55 = vpop.xlane.xlu0 %2241  ;;  %v1066_v62 = vcombine.high %v6202_v8, %v6202_v8 }
 0x1da   : > { %2370 = vadd.xlane.f32.xlu1 %v2369_v57  ;;  %v1911_v58 = vrot.slane %v6303_v53, %v5529_v54 }
 0x1db   : > { %v6255_v0 = vpop.xlane.xlu1 %2244 }
 0x1dc   : > { %2397 = vadd.xlane.f32.xlu0 %v2396_v50  ;;  %v2138_v50 = vmul.f32 %v1615_v27, %v570_v17  ;;  %v1033_v27 = vrot.slane %v1019_v11, %v5502_v37  ;;  %v1411_v11 = vcombine.high %v6181_v52, %v6181_v52  ;;  %v645_v52 = vld [vmem:[%s5420_s14 + $0x388] sm:$0xff] }
 0x1dd   : > { %v6260_v44 = vpop.xlane.xlu0 %2427 }
 0x1de   : > { %7981 = vst [vmem:[#allocation16_spill] sm:$0xff] %v6260_v44  ;;  %2400 = vadd.xlane.f32.xlu1 %v2399_v45  ;;  %v2139_v45 = vmul.f32 %v1619_v63, %v571_v13  ;;  %v2342_v6 = vsel %vm322_vm0, %v2138_v50, 0.0  ;;  %v2372_v63 = vsel %vm322_vm0, %v2148_v18, 0.0  ;;  %v635_v13 = vld [vmem:[%s5420_s14 + $0x338] sm:$0xff]  ;;  %v1035_v4 = vcombine.high %v1033_v27, %v1033_v27 }
 0x1df   : > { %v6272_v29 = vpop.xlane.xlu1 %2430 }
 0x1e0   : > { %7982 = vst [vmem:[#allocation17_spill] sm:$0xff] %v6272_v29  ;;  %2559 = vadd.xlane.f32.xlu0 %v2558_v38  ;;  %v634_v38 = vld [vmem:[%s5420_s14 + $0x330] sm:$0xff]  ;;  %v2345_v17 = vsel %vm322_vm0, %v2139_v45, 0.0  ;;  %v2203_v45 = vmul.f32 %v1875_v41, %v635_v13  ;;  %v6678_v29 = vld [vmem:[%s6506_s27 + $0x20] sm:$0xff] }
 0x1e1   : > { %v6275_v40 = vpop.xlane.xlu0 %2433  ;;  %v2202_v50 = vmul.f32 %v1871_v10, %v634_v38 }
 0x1e2   : > { %7983 = vst [vmem:[#allocation18_spill] sm:$0xff] %v6275_v40  ;;  %2562 = vadd.xlane.f32.xlu1 %v2561_v2  ;;  %v1064_v2 = vcombine.high %v6184_v33, %v6184_v33  ;;  %v2537_v8 = vsel %vm322_vm0, %v2203_v45, 0.0  ;;  %v592_v45 = vld [vmem:[%s5420_s14 + $0x1e0] sm:$0xff] }
 0x1e3   : > { %v6290_v57 = vpop.xlane.xlu1 %2436  ;;  %v2534_v18 = vsel %vm322_vm0, %v2202_v50, 0.0  ;;  %v6352_v50 = vrot.slane %v1035_v4, %v5502_v37  ;;  %v970_v4 = vcombine.high %v6227_v39, %v6227_v39  ;;  %v593_v39 = vld [vmem:[%s5420_s14 + $0x1e8] sm:$0xff] }
 0x1e4   : > { %7984 = vst [vmem:[#allocation19_spill] sm:$0xff] %v6290_v57  ;;  %2589 = vadd.xlane.f32.xlu0 %v2588_v12  ;;  %v2149_v12 = vmul.f32 %v1659_v16, %v581_v19  ;;  %v1915_v16 = vrot.slane %v6315_v48, %v5529_v54  ;;  %v1695_v10 = vrot.slane %v1064_v2, %v5529_v54 }
 0x1e5   : > { %v6296_v15 = vpop.xlane.xlu0 %2271  ;;  %v1456_v2 = vcombine.high %v6222_v25, %v6222_v25 }
 0x1e6   : > { %7985 = vst [vmem:[#allocation20_spill] sm:$0xff] %v6296_v15  ;;  %2592 = vadd.xlane.f32.xlu1 %v2591_v35  ;;  %v644_v35 = vld [vmem:[%s5420_s14 + $0x380] sm:$0xff]  ;;  %v2375_v33 = vsel %vm322_vm0, %v2149_v12, 0.0  ;;  %v1425_v12 = vrot.slane %v1411_v11, %v5502_v37 }
 0x1e7   : > { %v6308_v43 = vpop.xlane.xlu1 %2274  ;;  %v2212_v19 = vmul.f32 %v1911_v58, %v644_v35  ;;  %v591_v35 = vld [vmem:[%s5420_s14 + $0x1d8] sm:$0xff] }
 0x1e8   : > { %2343 = vadd.xlane.f32.xlu0 %v2342_v6  ;;  %v6338_v6 = vrot.slane %v1033_v27, %v5502_v37  ;;  %v2213_v27 = vmul.f32 %v1915_v16, %v645_v52  ;;  %v1427_v16 = vcombine.high %v1425_v12, %v1425_v12  ;;  %v1458_v52 = vcombine.high %v6238_v61, %v6238_v61 }
 0x1e9   : > { %v6312_v60 = vpop.xlane.xlu0 %2301  ;;  %v2564_v13 = vsel %vm322_vm0, %v2212_v19, 0.0  ;;  %v1707_v19 = vrot.slane %v6352_v50, %v5529_v54 }
 0x1ea   : > { %7986 = vst [vmem:[#allocation21_spill] sm:$0xff] %v6312_v60  ;;  %2346 = vadd.xlane.f32.xlu1 %v2345_v17  ;;  %v590_v17 = vld [vmem:[%s5420_s14 + $0x1d0] sm:$0xff]  ;;  %v1703_v11 = vrot.slane %v6338_v6, %v5529_v54  ;;  %v2567_v25 = vsel %vm322_vm0, %v2213_v27, 0.0 }
 0x1eb   : > { %v6325_v3 = vpop.xlane.xlu1 %2304  ;;  %v2158_v58 = vmul.f32 %v1695_v10, %v590_v17  ;;  %v6373_v10 = vrot.slane %v1425_v12, %v5502_v37  ;;  %v654_v27 = vld [vmem:[%s5420_s14 + $0x3d0] sm:$0xff]  ;;  %v2161_v12 = vmul.f32 %v1707_v19, %v593_v39 }
 0x1ec   : > { %2373 = vadd.xlane.f32.xlu0 %v2372_v63  ;;  %v1699_v63 = vrot.slane %v1066_v62, %v5529_v54 }
 0x1ed   : > { %v6330_v51 = vpop.xlane.xlu0 %2463  ;;  %v2402_v17 = vsel %vm322_vm0, %v2158_v58, 0.0  ;;  %v6387_v58 = vrot.slane %v1427_v16, %v5502_v37  ;;  %v1362_v16 = vcombine.high %v6263_v24, %v6263_v24  ;;  %v657_v24 = vld [vmem:[%s5420_s14 + $0x3e8] sm:$0xff] }
 0x1ee   : > { %7987 = vst [vmem:[#allocation22_spill] sm:$0xff] %v6330_v51  ;;  %2376 = vadd.xlane.f32.xlu1 %v2375_v33 }
 0x1ef   : > { %v6343_v38 = vpop.xlane.xlu1 %2466  ;;  %v1963_v39 = vrot.slane %v6387_v58, %v5529_v54 }
 0x1f0   : > { %7988 = vst [vmem:[#allocation23_spill] sm:$0xff] %v6343_v38  ;;  %2535 = vadd.xlane.f32.xlu0 %v2534_v18  ;;  %v2159_v18 = vmul.f32 %v1699_v63, %v591_v35  ;;  %v984_v63 = vrot.slane %v970_v4, %v5502_v37  ;;  %v1959_v4 = vrot.slane %v6373_v10, %v5529_v54 }
 0x1f1   : > { %v6347_v41 = vpop.xlane.xlu0 %2493 }
 0x1f2   : > { %7989 = vst [vmem:[#allocation24_spill] sm:$0xff] %v6347_v41  ;;  %2538 = vadd.xlane.f32.xlu1 %v2537_v8  ;;  %v2160_v8 = vmul.f32 %v1703_v11, %v592_v45  ;;  %v2405_v61 = vsel %vm322_vm0, %v2159_v18, 0.0  ;;  %v656_v18 = vld [vmem:[%s5420_s14 + $0x3e0] sm:$0xff]  ;;  %v986_v19 = vcombine.high %v984_v63, %v984_v63 }
 0x1f3   : > { %v6360_v33 = vpop.xlane.xlu1 %2496 }
 0x1f4   : > { %7990 = vst [vmem:[#allocation25_spill] sm:$0xff] %v6360_v33  ;;  %2565 = vadd.xlane.f32.xlu0 %v2564_v13  ;;  %v1951_v13 = vrot.slane %v1456_v2, %v5529_v54  ;;  %v1015_v2 = vcombine.high %v6268_v9, %v6268_v9  ;;  %v2408_v11 = vsel %vm322_vm0, %v2160_v8, 0.0  ;;  %v2411_v9 = vsel %vm322_vm0, %v2161_v12, 0.0  ;;  %v582_v12 = vld [vmem:[%s5420_s14 + $0x190] sm:$0xff] }
 0x1f5   : > { %v6365_v62 = vpop.xlane.xlu0 %2247 }
 0x1f6   : > { %2568 = vadd.xlane.f32.xlu1 %v2567_v25  ;;  %v1955_v25 = vrot.slane %v1458_v52, %v5529_v54  ;;  %v2222_v45 = vmul.f32 %v1951_v13, %v654_v27  ;;  %v1017_v13 = vcombine.high %v6279_v49, %v6279_v49  ;;  %v6408_v27 = vrot.slane %v984_v63, %v5502_v37 }
 0x1f7   : > { %v6378_v30 = vpop.xlane.xlu1 %2250  ;;  %v1663_v51 = vrot.slane %v1015_v2, %v5529_v54  ;;  %v2225_v63 = vmul.f32 %v1963_v39, %v657_v24  ;;  %v1407_v2 = vcombine.high %v6303_v53, %v6303_v53 }
 0x1f8   : > { %2403 = vadd.xlane.f32.xlu0 %v2402_v17  ;;  %v655_v17 = vld [vmem:[%s5420_s14 + $0x3d8] sm:$0xff] }
 0x1f9   : > { %v6382_v35 = vpop.xlane.xlu0 %2277  ;;  %v2223_v8 = vmul.f32 %v1955_v25, %v655_v17  ;;  %v1376_v25 = vrot.slane %v1362_v16, %v5502_v37  ;;  %v1671_v16 = vrot.slane %v6408_v27, %v5529_v54  ;;  %v1919_v46 = vrot.slane %v1407_v2, %v5529_v54 }
 0x1fa   : > { %7991 = vst [vmem:[#allocation26_spill] sm:$0xff] %v6382_v35  ;;  %2406 = vadd.xlane.f32.xlu1 %v2405_v61  ;;  %v2594_v61 = vsel %vm322_vm0, %v2222_v45, 0.0  ;;  %v6422_v45 = vrot.slane %v986_v19, %v5502_v37 }
 0x1fb   : > { %v6395_v41 = vpop.xlane.xlu1 %2280  ;;  %v2597_v49 = vsel %vm322_vm0, %v2223_v8, 0.0  ;;  %v584_v8 = vld [vmem:[%s5420_s14 + $0x1a0] sm:$0xff]  ;;  %v1378_v39 = vcombine.high %v1376_v25, %v1376_v25  ;;  %v1392_v24 = vrot.slane %v1376_v25, %v5502_v37 }
 0x1fc   : > { %2409 = vadd.xlane.f32.xlu0 %v2408_v11  ;;  %v2224_v11 = vmul.f32 %v1959_v4, %v656_v18  ;;  %v2150_v18 = vmul.f32 %v1663_v51, %v582_v12  ;;  %v1409_v51 = vcombine.high %v6315_v48, %v6315_v48  ;;  %v1018_v21 = vcombine.high %v6422_v45, %v6422_v45 }
 0x1fd   : > { %v6400_v52 = vpop.xlane.xlu0 %2439 }
 0x1fe   : > { %7992 = vst [vmem:[#allocation27_spill] sm:$0xff] %v6400_v52  ;;  %2412 = vadd.xlane.f32.xlu1 %v2411_v9  ;;  %v1667_v9 = vrot.slane %v1017_v13, %v5529_v54  ;;  %v2600_v4 = vsel %vm322_vm0, %v2224_v11, 0.0  ;;  %v2603_v13 = vsel %vm322_vm0, %v2225_v63, 0.0  ;;  %v1675_v11 = vrot.slane %v6422_v45, %v5529_v54  ;;  %v646_v63 = vld [vmem:[%s5420_s14 + $0x390] sm:$0xff] }
 0x1ff   : > { %v6413_v56 = vpop.xlane.xlu1 %2442  ;;  %v2378_v12 = vsel %vm322_vm0, %v2150_v18, 0.0  ;;  %v1923_v25 = vrot.slane %v1409_v51, %v5529_v54  ;;  %v2214_v2 = vmul.f32 %v1919_v46, %v646_v63  ;;  %v1457_v63 = vcombine.high %v6373_v10, %v6373_v10 }
 0x200   : > { %7993 = vst [vmem:[#allocation28_spill] sm:$0xff] %v6413_v56  ;;  %2595 = vadd.xlane.f32.xlu0 %v2594_v61  ;;  %v583_v61 = vld [vmem:[%s5420_s14 + $0x198] sm:$0xff] }
 0x201   : > { %v6417_v17 = vpop.xlane.xlu0 %2469  ;;  %v2151_v53 = vmul.f32 %v1667_v9, %v583_v61  ;;  %v2570_v46 = vsel %vm322_vm0, %v2214_v2, 0.0 }
 0x202   : > { %7994 = vst [vmem:[#allocation29_spill] sm:$0xff] %v6417_v17  ;;  %2598 = vadd.xlane.f32.xlu1 %v2597_v49  ;;  %v2152_v49 = vmul.f32 %v1671_v16, %v584_v8  ;;  %v647_v16 = vld [vmem:[%s5420_s14 + $0x398] sm:$0xff]  ;;  %v1927_v8 = vrot.slane %v1392_v24, %v5529_v54 }
 0x203   : > { %v6430_v17 = vpop.xlane.xlu1 %2472  ;;  %v2381_v61 = vsel %vm322_vm0, %v2151_v53, 0.0  ;;  %v648_v53 = vld [vmem:[%s5420_s14 + $0x3a0] sm:$0xff] }
 0x204   : > { %7995 = vst [vmem:[#allocation30_spill] sm:$0xff] %v6430_v17  ;;  %2601 = vadd.xlane.f32.xlu0 %v2600_v4  ;;  %v585_v4 = vld [vmem:[%s5420_s14 + $0x1a8] sm:$0xff]  ;;  %v2384_v18 = vsel %vm322_vm0, %v2152_v49, 0.0  ;;  %v2216_v49 = vmul.f32 %v1927_v8, %v648_v53  ;;  %v1967_v53 = vrot.slane %v1457_v63, %v5529_v54 }
 0x205   : > { %v6433_v19 = vpop.xlane.xlu0 %2307  ;;  %v2153_v48 = vmul.f32 %v1675_v11, %v585_v4  ;;  %v649_v4 = vld [vmem:[%s5420_s14 + $0x3a8] sm:$0xff] }
 0x206   : > { %7996 = vst [vmem:[#allocation31_spill] sm:$0xff] %v6433_v19  ;;  %2604 = vadd.xlane.f32.xlu1 %v2603_v13  ;;  %v6452_v13 = vrot.slane %v1378_v39, %v5502_v37  ;;  %v2215_v39 = vmul.f32 %v1923_v25, %v647_v16  ;;  %v2576_v2 = vsel %vm322_vm0, %v2216_v49, 0.0 }
 0x207   : > { %v6444_v14 = vpop.xlane.xlu1 %2310  ;;  %v2387_v37 = vsel %vm322_vm0, %v2153_v48, 0.0 }
 0x208   : > { %2379 = vadd.xlane.f32.xlu0 %v2378_v12  ;;  %v1065_v12 = vcombine.high %v6338_v6, %v6338_v6  ;;  %v1931_v51 = vrot.slane %v6452_v13, %v5529_v54  ;;  %v2573_v25 = vsel %vm322_vm0, %v2215_v39, 0.0 }
 0x209   : > { %v6447_v9 = vpop.xlane.xlu0 %2313 }
 0x20a   : > { %7997 = vst [vmem:[#allocation32_spill] sm:$0xff] %v6447_v9  ;;  %2382 = vadd.xlane.f32.xlu1 %v2381_v61  ;;  %v1711_v6 = vrot.slane %v1065_v12, %v5529_v54  ;;  %v2217_v16 = vmul.f32 %v1931_v51, %v649_v4  ;;  %v1016_v12 = vcombine.high %v6408_v27, %v6408_v27  ;;  %v586_v27 = vld [vmem:[%s5420_s14 + $0x1b0] sm:$0xff] }
 0x20b   : > { %v6459_v52 = vpop.xlane.xlu1 %2316 }
 0x20c   : > { %2385 = vadd.xlane.f32.xlu0 %v2384_v18  ;;  %v594_v18 = vld [vmem:[%s5420_s14 + $0x1f0] sm:$0xff]  ;;  %v2579_v39 = vsel %vm322_vm0, %v2217_v16, 0.0  ;;  %v1679_v4 = vrot.slane %v1016_v12, %v5529_v54 }
 0x20d   : > { %v6462_v11 = vpop.xlane.xlu0 %2499  ;;  %v2162_v8 = vmul.f32 %v1711_v6, %v594_v18  ;;  %v1408_v6 = vcombine.high %v1392_v24, %v1392_v24 }
 0x20e   : > { %7998 = vst [vmem:[#allocation33_spill] sm:$0xff] %v6462_v11  ;;  %2388 = vadd.xlane.f32.xlu1 %v2387_v37  ;;  %v658_v37 = vld [vmem:[%s5420_s14 + $0x3f0] sm:$0xff] }
 0x20f   : > { %v6472_v61 = vpop.xlane.xlu1 %2502  ;;  %v2414_v51 = vsel %vm322_vm0, %v2162_v8, 0.0  ;;  %v2226_v49 = vmul.f32 %v1967_v53, %v658_v37  ;;  %v6512_v37 = vsub.s32 1, %v5493_v32 }
 0x210   : > { %7999 = vst [vmem:[#allocation34_spill] sm:$0xff] %v6472_v61  ;;  %2571 = vadd.xlane.f32.xlu0 %v2570_v46  ;;  %v6563_v61 = vld [vmem:[%s6506_s27 + $0x8] sm:$0xff] }
 0x211   : > { %v6475_v48 = vpop.xlane.xlu0 %2505 }
 0x212   : > { %8000 = vst [vmem:[#allocation35_spill] sm:$0xff] %v6475_v48  ;;  %2574 = vadd.xlane.f32.xlu1 %v2573_v25  ;;  %v2606_v25 = vsel %vm322_vm0, %v2226_v49, 0.0  ;;  %v1935_v48 = vrot.slane %v1408_v6, %v5529_v54  ;;  %v6517_v49 = vld [vmem:[%s6506_s27] sm:$0xff] }
 0x213   : > { %v6482_v10 = vpop.xlane.xlu1 %2508 }
 0x214   : > { %8001 = vst [vmem:[#allocation36_spill] sm:$0xff] %v6482_v10  ;;  %2577 = vadd.xlane.f32.xlu0 %v2576_v2  ;;  %v2154_v2 = vmul.f32 %v1679_v4, %v586_v27  ;;  %v2654_v27 = vrot.slane %v6517_v49, %v6512_v37 }
 0x215   : > { %v6485_v46 = vpop.xlane.xlu0 %2283 }
 0x216   : > { %8002 = vst [vmem:[#allocation37_spill] sm:$0xff] %v6485_v46  ;;  %2580 = vadd.xlane.f32.xlu1 %v2579_v39  ;;  %v650_v39 = vld [vmem:[%s5420_s14 + $0x3b0] sm:$0xff]  ;;  %v2390_v24 = vsel %vm322_vm0, %v2154_v2, 0.0 }
 0x217   : > { %v6490_v63 = vpop.xlane.xlu1 %2286  ;;  %v2218_v53 = vmul.f32 %v1935_v48, %v650_v39 }
 0x218   : > { %2415 = vadd.xlane.f32.xlu0 %v2414_v51 }
 0x219   : > { %v6493_v18 = vpop.xlane.xlu0 %2289  ;;  %v2582_v4 = vsel %vm322_vm0, %v2218_v53, 0.0 }
 0x21a   : > { %8003 = vst [vmem:[#allocation38_spill] sm:$0xff] %v6493_v18 }
 0x21b   : > { %v6497_v16 = vpop.xlane.xlu1 %2292 }
 0x21c   : > { %2607 = vadd.xlane.f32.xlu0 %v2606_v25 }
 0x21d   : > { %v6500_v8 = vpop.xlane.xlu0 %2475 }
 0x21e   : > { %8004 = vst [vmem:[#allocation39_spill] sm:$0xff] %v6500_v8  ;;  %v6545_v8 = vsub.s32 4, %v5493_v32 }
 0x21f   : > { %v6509_v12 = vpop.xlane.xlu1 %2478 }
 0x220   : > { %8005 = vst [vmem:[#allocation40_spill] sm:$0xff] %v6509_v12  ;;  %2391 = vadd.xlane.f32.xlu0 %v2390_v24  ;;  %v1459_v12 = vcombine.high %v6387_v58, %v6387_v58 }
 0x221   : > { %v6514_v51 = vpop.xlane.xlu0 %2481 }
 0x222   : > { %8006 = vst [vmem:[#allocation41_spill] sm:$0xff] %v6514_v51 }
 0x223   : > { %v6520_v6 = vpop.xlane.xlu1 %2484 }
 0x224   : > { %8007 = vst [vmem:[#allocation42_spill] sm:$0xff] %v6520_v6  ;;  %2583 = vadd.xlane.f32.xlu0 %v2582_v4  ;;  %v2703_v6 = vrot.slane %v6563_v61, %v5529_v54 }
 0x225   : > { %v6524_v25 = vpop.xlane.xlu0 %2319 }
 0x226   : > { %8008 = vst [vmem:[#allocation43_spill] sm:$0xff] %v6524_v25 }
 0x227   : > { %2656 = vbcast.lane.b32.xlu1 %v2654_v27, 256  ;;  %v6526_v48 = vpop.xlane.xlu1 %2322  ;;  %v2647_v27 = vrot.slane %v6517_v49, %v5529_v54 }
 0x229   : > { %v6528_v2 = vpop.xlane.xlu0 %2349 }
 0x22a   : > { %8009 = vst [vmem:[#allocation44_spill] sm:$0xff] %v6528_v2 }
 0x22b   : > { %v6530_v39 = vpop.xlane.xlu1 %2352 }
 0x22c   : > { %8010 = vst [vmem:[#allocation45_spill] sm:$0xff] %v6530_v39 }
 0x22d   : > { %v6532_v24 = vpop.xlane.xlu0 %2511 }
 0x22e   : > { %8011 = vst [vmem:[#allocation46_spill] sm:$0xff] %v6532_v24  ;;  %v2675_v24 = vrot.slane %v6517_v49, %v6545_v8 }
 0x22f   : > { %v6534_v11 = vpop.xlane.xlu1 %2514 }
 0x230   : > { %8012 = vst [vmem:[#allocation47_spill] sm:$0xff] %v6534_v11 }
 0x231   : > { %v6536_v53 = vpop.xlane.xlu0 %2541 }
 0x232   : > { %8013 = vst [vmem:[#allocation48_spill] sm:$0xff] %v6536_v53  ;;  %v6554_v53 = vsub.s32 6, %v5493_v32 }
 0x233   : > { %v6538_v4 = vpop.xlane.xlu1 %2544 }
 0x234   : > { %8014 = vst [vmem:[#allocation49_spill] sm:$0xff] %v6538_v4  ;;  %v2689_v44 = vrot.slane %v6517_v49, %v6554_v53 }
 0x235   : > { %v6540_v51 = vpop.xlane.xlu0 %2295 }
 0x236   : > { %8015 = vst [vmem:[#allocation50_spill] sm:$0xff] %v6540_v51 }
 0x237   : > { %v6547_v40 = vpop.xlane.xlu1 %2298 }
 0x239   : > { %v6549_v10 = vpop.xlane.xlu0 %2325 }
 0x23a   : > { %8016 = vst [vmem:[#allocation51_spill] sm:$0xff] %v6549_v10  ;;  %2649 = vbcast.lane.b32.xlu0 %v2647_v27, 256  ;;  %v1067_v27 = vcombine.high %v6352_v50, %v6352_v50  ;;  %v595_v50 = vld [vmem:[%s5420_s14 + $0x1f8] sm:$0xff] }
 0x23b   : > { %v6556_v4 = vpop.xlane.xlu1 %2328 }
 0x23d   : > { %v6558_v11 = vpop.xlane.xlu0 %2487 }
 0x23e   : > { %8017 = vst [vmem:[#allocation52_spill] sm:$0xff] %v6558_v11  ;;  %2677 = vbcast.lane.b32.xlu0 %v2675_v24, 256  ;;  %v6574_v11 = vsub.s32 2, %v5493_v32  ;;  %v1715_v24 = vrot.slane %v1067_v27, %v5529_v54 }
 0x23f   : > { %v6567_v36 = vpop.xlane.xlu1 %2490 }
 0x240   : > { %8018 = vst [vmem:[#allocation53_spill] sm:$0xff] %v6567_v36  ;;  %v1971_v36 = vrot.slane %v1459_v12, %v5529_v54  ;;  %v1410_v12 = vcombine.high %v6452_v13, %v6452_v13 }
 0x241   : > { %v6569_v33 = vpop.xlane.xlu0 %2517 }
 0x242   : > { %8019 = vst [vmem:[#allocation54_spill] sm:$0xff] %v6569_v33  ;;  %2691 = vbcast.lane.b32.xlu0 %v2689_v44, 256  ;;  %v2717_v44 = vrot.slane %v6563_v61, %v6574_v11  ;;  %v2163_v33 = vmul.f32 %v1715_v24, %v595_v50  ;;  %v2227_v23 = vmul.f32 %v1971_v36, %v659_v7  ;;  %v587_v50 = vld [vmem:[%s5420_s14 + $0x1b8] sm:$0xff] }
 0x243   : > { %v6579_v17 = vpop.xlane.xlu1 %2520  ;;  %v1683_v24 = vrot.slane %v1018_v21, %v5529_v54  ;;  %v1939_v36 = vrot.slane %v1410_v12, %v5529_v54  ;;  %v651_v7 = vld [vmem:[%s5420_s14 + $0x3b8] sm:$0xff] }
 0x244   : > { %8020 = vst [vmem:[#allocation55_spill] sm:$0xff] %v6579_v17  ;;  %v2417_v17 = vsel %vm322_vm0, %v2163_v33, 0.0  ;;  %v6609_v33 = vld [vmem:[%s6506_s27 + $0x10] sm:$0xff] }
 0x245   : > { %v6582_v38 = vpop.xlane.xlu0 %2355  ;;  %v2155_v57 = vmul.f32 %v1683_v24, %v587_v50  ;;  %v2759_v13 = vrot.slane %v6609_v33, %v5529_v54 }
 0x246   : > { %8021 = vst [vmem:[#allocation56_spill] sm:$0xff] %v6582_v38  ;;  %2705 = vbcast.lane.b32.xlu0 %v2703_v6, 256  ;;  %v2731_v6 = vrot.slane %v6563_v61, %v6545_v8 }
 0x247   : > { %v6589_v27 = vpop.xlane.xlu1 %2358 }
 0x248   : > { %8022 = vst [vmem:[#allocation57_spill] sm:$0xff] %v6589_v27 }
 0x249   : > { %v6592_v58 = vpop.xlane.xlu0 %2361 }
 0x24a   : > { %8023 = vst [vmem:[#allocation58_spill] sm:$0xff] %v6592_v58  ;;  %2719 = vbcast.lane.b32.xlu0 %v2717_v44, 256  ;;  %v2745_v44 = vrot.slane %v6563_v61, %v6554_v53  ;;  %v2609_v58 = vsel %vm322_vm0, %v2227_v23, 0.0 }
 0x24b   : > { %2418 = vadd.xlane.f32.xlu1 %v2417_v17  ;;  %v6600_v45 = vpop.xlane.xlu1 %2364 }
 0x24c   : > { %8024 = vst [vmem:[#allocation59_spill] sm:$0xff] %v6600_v45 }
 0x24d   : > { %v6603_v56 = vpop.xlane.xlu0 %2547 }
 0x24e   : > { %8025 = vst [vmem:[#allocation60_spill] sm:$0xff] %v6603_v56  ;;  %2733 = vbcast.lane.b32.xlu0 %v2731_v6, 256  ;;  %v2393_v6 = vsel %vm322_vm0, %v2155_v57, 0.0  ;;  %v2219_v56 = vmul.f32 %v1939_v36, %v651_v7  ;;  %v2787_v57 = vrot.slane %v6609_v33, %v6545_v8  ;;  %v2801_v7 = vrot.slane %v6609_v33, %v6554_v53 }
 0x24f   : > { %2610 = vadd.xlane.f32.xlu1 %v2609_v58  ;;  %v6613_v21 = vpop.xlane.xlu1 %2550  ;;  %v2773_v58 = vrot.slane %v6609_v33, %v6574_v11 }
 0x250   : > { %8026 = vst [vmem:[#allocation61_spill] sm:$0xff] %v6613_v21  ;;  %v2585_v12 = vsel %vm322_vm0, %v2219_v56, 0.0  ;;  %v6662_v21 = vsub.s32 5, %v5493_v32 }
 0x251   : > { %v6615_v17 = vpop.xlane.xlu0 %2553 }
 0x252   : > { %8027 = vst [vmem:[#allocation62_spill] sm:$0xff] %v6615_v17  ;;  %2747 = vbcast.lane.b32.xlu0 %v2745_v44, 256  ;;  %v2661_v17 = vrot.slane %v6517_v49, %v6574_v11  ;;  %v2682_v38 = vrot.slane %v6517_v49, %v6662_v21 }
 0x253   : > { %2394 = vadd.xlane.f32.xlu1 %v2393_v6  ;;  %v6624_v24 = vpop.xlane.xlu1 %2556 }
 0x254   : > { %8029 = vst [vmem:[#allocation64_spill] sm:$0xff] %v6624_v24 }
 0x255   : > { %v6620_v23 = vpop.xlane.xlu0 %2331 }
 0x256   : > { %8028 = vst [vmem:[#allocation63_spill] sm:$0xff] %v6620_v23  ;;  %2761 = vbcast.lane.b32.xlu0 %v2759_v13, 256  ;;  %v6638_v13 = vld [vmem:[%s6506_s27 + $0x18] sm:$0xff] }
 0x257   : > { %2586 = vadd.xlane.f32.xlu1 %v2585_v12  ;;  %v6631_v44 = vpop.xlane.xlu1 %2334  ;;  %v2815_v56 = vrot.slane %v6638_v13, %v5529_v54 }
 0x259   : > { %v6627_v50 = vpop.xlane.xlu0 %2337 }
 0x25a   : > { %8030 = vst [vmem:[#allocation65_spill] sm:$0xff] %v6627_v50  ;;  %2775 = vbcast.lane.b32.xlu0 %v2773_v58, 256 }
 0x25b   : > { %v6644_v58 = vpop.xlane.xlu1 %2340 }
 0x25c   : > { %8033 = vst [vmem:[#allocation68_spill] sm:$0xff] %v6644_v58 }
 0x25d   : > { %v6633_v36 = vpop.xlane.xlu0 %2523 }
 0x25e   : > { %8031 = vst [vmem:[#allocation66_spill] sm:$0xff] %v6633_v36  ;;  %2789 = vbcast.lane.b32.xlu0 %v2787_v57, 256  ;;  %v6651_v57 = vsub.s32 3, %v5493_v32  ;;  %v2829_v36 = vrot.slane %v6638_v13, %v6574_v11 }
 0x260   : > { %v2668_v24 = vrot.slane %v6517_v49, %v6651_v57 }
 0x261   : > { %v6640_v6 = vpop.xlane.xlu0 %2529 }
 0x262   : > { %8032 = vst [vmem:[#allocation67_spill] sm:$0xff] %v6640_v6  ;;  %2803 = vbcast.lane.b32.xlu0 %v2801_v7, 256  ;;  %v6655_v6 = vpop.xlane.xlu1 %2526 }
 0x263   : > { %8035 = vst [vmem:[#allocation70_spill] sm:$0xff] %v6655_v6  ;;  %v2857_v6 = vrot.slane %v6638_v13, %v6554_v53 }
 0x265   : > { %v6646_v12 = vpop.xlane.xlu0 %2367 }
 0x266   : > { %8034 = vst [vmem:[#allocation69_spill] sm:$0xff] %v6646_v12  ;;  %2817 = vbcast.lane.b32.xlu0 %v2815_v56, 256  ;;  %v2843_v12 = vrot.slane %v6638_v13, %v6545_v8 }
 0x268   : > { %2663 = vbcast.lane.b32.xlu1 %v2661_v17, 256  ;;  %v6671_v17 = vsub.s32 7, %v5493_v32 }
 0x269   : > { %v6657_v7 = vpop.xlane.xlu0 %2397 }
 0x26a   : > { %8036 = vst [vmem:[#allocation71_spill] sm:$0xff] %v6657_v7  ;;  %2831 = vbcast.lane.b32.xlu0 %v2829_v36, 256  ;;  %v6675_v7 = vpop.xlane.xlu1 %2532 }
 0x26b   : > { %8038 = vst [vmem:[#allocation73_spill] sm:$0xff] %v6675_v7  ;;  %v2710_v7 = vrot.slane %v6563_v61, %v6512_v37 }
 0x26c   : > { %2670 = vbcast.lane.b32.xlu1 %v2668_v24, 256  ;;  %v2696_v24 = vrot.slane %v6517_v49, %v6671_v17  ;;  %v2724_v49 = vrot.slane %v6563_v61, %v6651_v57 }
 0x26d   : > { %v6666_v56 = vpop.xlane.xlu0 %2559 }
 0x26e   : > { %8037 = vst [vmem:[#allocation72_spill] sm:$0xff] %v6666_v56  ;;  %2845 = vbcast.lane.b32.xlu0 %v2843_v12, 256  ;;  %v2871_v56 = vrot.slane %v6678_v29, %v5529_v54  ;;  %v6686_v32 = vpop.xlane.xlu1 %2370 }
 0x26f   : > { %8040 = vst [vmem:[#allocation75_spill] sm:$0xff] %v6686_v32 }
 0x270   : > { %2684 = vbcast.lane.b32.xlu1 %v2682_v38, 256  ;;  %v2885_v38 = vrot.slane %v6678_v29, %v6574_v11 }
 0x271   : > { %v6680_v36 = vpop.xlane.xlu0 %2589 }
 0x272   : > { %8039 = vst [vmem:[#allocation74_spill] sm:$0xff] %v6680_v36  ;;  %2859 = vbcast.lane.b32.xlu0 %v2857_v6, 256  ;;  %v2899_v6 = vrot.slane %v6678_v29, %v6545_v8 }
 0x274   : > { %2698 = vbcast.lane.b32.xlu1 %v2696_v24, 256  ;;  %v6700_v24 = vpop.xlane.xlu1 %2400 }
 0x275   : > { %v6688_v12 = vpop.xlane.xlu0 %2343  ;;  %8043 = vst [vmem:[#allocation78_spill] sm:$0xff] %v6700_v24 }
 0x276   : > { %8041 = vst [vmem:[#allocation76_spill] sm:$0xff] %v6688_v12  ;;  %2873 = vbcast.lane.b32.xlu0 %v2871_v56, 256  ;;  %v2738_v56 = vrot.slane %v6563_v61, %v6662_v21  ;;  %v2752_v12 = vrot.slane %v6563_v61, %v6671_v17  ;;  %v2780_v61 = vrot.slane %v6609_v33, %v6651_v57 }
 0x278   : > { %2712 = vbcast.lane.b32.xlu1 %v2710_v7, 256  ;;  %v2913_v7 = vrot.slane %v6678_v29, %v6554_v53  ;;  %v6711_v5 = vpop.xlane.xlu1 %2562 }
 0x279   : > { %v6694_v36 = vpop.xlane.xlu0 %2373  ;;  %8045 = vst [vmem:[#allocation80_spill] sm:$0xff] %v6711_v5 }
 0x27a   : > { %8042 = vst [vmem:[#allocation77_spill] sm:$0xff] %v6694_v36  ;;  %2887 = vbcast.lane.b32.xlu0 %v2885_v38, 256  ;;  %v6709_v36 = vld [vmem:[%s6506_s27 + $0x28] sm:$0xff] }
 0x27c   : > { %2726 = vbcast.lane.b32.xlu1 %v2724_v49, 256  ;;  %v2927_v49 = vrot.slane %v6709_v36, %v5529_v54  ;;  %v6725_v5 = vpop.xlane.xlu1 %2592 }
 0x27d   : > { %v6702_v2 = vpop.xlane.xlu0 %2535  ;;  %8048 = vst [vmem:[#allocation83_spill] sm:$0xff] %v6725_v5  ;;  %v6742_v5 = vld [vmem:[%s6506_s27 + $0x30] sm:$0xff] }
 0x27e   : > { %8044 = vst [vmem:[#allocation79_spill] sm:$0xff] %v6702_v2  ;;  %2901 = vbcast.lane.b32.xlu0 %v2899_v6, 256  ;;  %v2766_v6 = vrot.slane %v6609_v33, %v6512_v37 }
 0x280   : > { %2740 = vbcast.lane.b32.xlu1 %v2738_v56, 256  ;;  %v2941_v56 = vrot.slane %v6709_v36, %v6574_v11 }
 0x281   : > { %v6713_v38 = vpop.xlane.xlu0 %2565 }
 0x282   : > { %8046 = vst [vmem:[#allocation81_spill] sm:$0xff] %v6713_v38  ;;  %2915 = vbcast.lane.b32.xlu0 %v2913_v7, 256  ;;  %v6733_v7 = vpop.xlane.xlu1 %2346 }
 0x283   : > { %8050 = vst [vmem:[#allocation85_spill] sm:$0xff] %v6733_v7 }
 0x284   : > { %2754 = vbcast.lane.b32.xlu1 %v2752_v12, 256  ;;  %v2955_v12 = vrot.slane %v6709_v36, %v6545_v8 }
 0x285   : > { %v6719_v2 = vpop.xlane.xlu0 %2403 }
 0x286   : > { %8047 = vst [vmem:[#allocation82_spill] sm:$0xff] %v6719_v2  ;;  %2929 = vbcast.lane.b32.xlu0 %v2927_v49, 256  ;;  %v2794_v49 = vrot.slane %v6609_v33, %v6662_v21 }
 0x288   : > { %2768 = vbcast.lane.b32.xlu1 %v2766_v6, 256  ;;  %v2969_v6 = vrot.slane %v6709_v36, %v6554_v53 }
 0x289   : > { %v6727_v38 = vpop.xlane.xlu0 %2409 }
 0x28a   : > { %8049 = vst [vmem:[#allocation84_spill] sm:$0xff] %v6727_v38  ;;  %2943 = vbcast.lane.b32.xlu0 %v2941_v56, 256  ;;  %v2808_v56 = vrot.slane %v6609_v33, %v6671_v17 }
 0x28c   : > { %2782 = vbcast.lane.b32.xlu1 %v2780_v61, 256  ;;  %v2983_v61 = vrot.slane %v6742_v5, %v5529_v54 }
 0x28d   : > { %v6735_v2 = vpop.xlane.xlu0 %2595 }
 0x28e   : > { %8051 = vst [vmem:[#allocation86_spill] sm:$0xff] %v6735_v2  ;;  %2957 = vbcast.lane.b32.xlu0 %v2955_v12, 256  ;;  %v6750_v2 = vpop.xlane.xlu1 %2376  ;;  %v2822_v12 = vrot.slane %v6638_v13, %v6512_v37 }
 0x28f   : > { %8053 = vst [vmem:[#allocation88_spill] sm:$0xff] %v6750_v2 }
 0x290   : > { %2796 = vbcast.lane.b32.xlu1 %v2794_v49, 256  ;;  %v2997_v49 = vrot.slane %v6742_v5, %v6574_v11 }
 0x291   : > { %v6744_v38 = vpop.xlane.xlu0 %2601 }
 0x292   : > { %8052 = vst [vmem:[#allocation87_spill] sm:$0xff] %v6744_v38  ;;  %2971 = vbcast.lane.b32.xlu0 %v2969_v6, 256  ;;  %v6758_v38 = vpop.xlane.xlu1 %2538  ;;  %v2836_v6 = vrot.slane %v6638_v13, %v6651_v57 }
 0x293   : > { %8055 = vst [vmem:[#allocation90_spill] sm:$0xff] %v6758_v38  ;;  %v3025_v38 = vrot.slane %v6742_v5, %v6554_v53 }
 0x294   : > { %2810 = vbcast.lane.b32.xlu1 %v2808_v56, 256  ;;  %v3011_v56 = vrot.slane %v6742_v5, %v6545_v8 }
 0x295   : > { %v6752_v50 = vpop.xlane.xlu0 %2379 }
 0x296   : > { %8054 = vst [vmem:[#allocation89_spill] sm:$0xff] %v6752_v50  ;;  %2985 = vbcast.lane.b32.xlu0 %v2983_v61, 256  ;;  %v2850_v61 = vrot.slane %v6638_v13, %v6662_v21 }
 0x298   : > { %2824 = vbcast.lane.b32.xlu1 %v2822_v12, 256  ;;  %v6772_v12 = vpop.xlane.xlu1 %2568 }
 0x299   : > { %v6760_v33 = vpop.xlane.xlu0 %2385  ;;  %8058 = vst [vmem:[#allocation93_spill] sm:$0xff] %v6772_v12  ;;  %v2878_v12 = vrot.slane %v6678_v29, %v6512_v37 }
 0x29a   : > { %8056 = vst [vmem:[#allocation91_spill] sm:$0xff] %v6760_v33  ;;  %2999 = vbcast.lane.b32.xlu0 %v2997_v49, 256  ;;  %v6775_v33 = vld [vmem:[%s6506_s27 + $0x38] sm:$0xff]  ;;  %v2864_v49 = vrot.slane %v6638_v13, %v6671_v17  ;;  %v2892_v13 = vrot.slane %v6678_v29, %v6651_v57 }
 0x29c   : > { %2838 = vbcast.lane.b32.xlu1 %v2836_v6, 256  ;;  %v3039_v6 = vrot.slane %v6775_v33, %v5529_v54 }
 0x29d   : > { %v6766_v50 = vpop.xlane.xlu0 %2571 }
 0x29e   : > { %8057 = vst [vmem:[#allocation92_spill] sm:$0xff] %v6766_v50  ;;  %3013 = vbcast.lane.b32.xlu0 %v3011_v56, 256  ;;  %v6783_v50 = vpop.xlane.xlu1 %2406 }
 0x29f   : > { %8060 = vst [vmem:[#allocation95_spill] sm:$0xff] %v6783_v50 }
 0x2a0   : > { %2852 = vbcast.lane.b32.xlu1 %v2850_v61, 256  ;;  %v3053_v61 = vrot.slane %v6775_v33, %v6574_v11 }
 0x2a1   : > { %v6777_v23 = vpop.xlane.xlu0 %2577 }
 0x2a2   : > { %8059 = vst [vmem:[#allocation94_spill] sm:$0xff] %v6777_v23  ;;  %3027 = vbcast.lane.b32.xlu0 %v3025_v38, 256  ;;  %v3067_v38 = vrot.slane %v6775_v33, %v6545_v8 }
 0x2a4   : > { %2866 = vbcast.lane.b32.xlu1 %v2864_v49, 256  ;;  %v6797_v49 = vpop.xlane.xlu1 %2412 }
 0x2a5   : > { %v6785_v56 = vpop.xlane.xlu0 %2415  ;;  %8063 = vst [vmem:[#allocation98_spill] sm:$0xff] %v6797_v49  ;;  %v2920_v49 = vrot.slane %v6678_v29, %v6671_v17 }
 0x2a6   : > { %8061 = vst [vmem:[#allocation96_spill] sm:$0xff] %v6785_v56  ;;  %3041 = vbcast.lane.b32.xlu0 %v3039_v6, 256  ;;  %v2906_v6 = vrot.slane %v6678_v29, %v6662_v21 }
 0x2a8   : > { %2880 = vbcast.lane.b32.xlu1 %v2878_v12, 256  ;;  %v3081_v12 = vrot.slane %v6775_v33, %v6554_v53  ;;  %v6808_v50 = vpop.xlane.xlu1 %2598 }
 0x2a9   : > { %v6791_v23 = vpop.xlane.xlu0 %2607  ;;  %8065 = vst [vmem:[#allocation100_spill] sm:$0xff] %v6808_v50 }
 0x2aa   : > { %8062 = vst [vmem:[#allocation97_spill] sm:$0xff] %v6791_v23  ;;  %3055 = vbcast.lane.b32.xlu0 %v3053_v61, 256  ;;  %v6806_v23 = vld [vmem:[%s6506_s27 + $0x40] sm:$0xff] }
 0x2ab   : > { %v3109_v50 = vrot.slane %v6806_v23, %v6574_v11 }
 0x2ac   : > { %2894 = vbcast.lane.b32.xlu1 %v2892_v13, 256  ;;  %v3095_v13 = vrot.slane %v6806_v23, %v5529_v54 }
 0x2ad   : > { %v6799_v56 = vpop.xlane.xlu0 %2391 }
 0x2ae   : > { %8064 = vst [vmem:[#allocation99_spill] sm:$0xff] %v6799_v56  ;;  %3069 = vbcast.lane.b32.xlu0 %v3067_v38, 256  ;;  %v2934_v38 = vrot.slane %v6709_v36, %v6512_v37 }
 0x2b0   : > { %2908 = vbcast.lane.b32.xlu1 %v2906_v6, 256  ;;  %v6822_v6 = vpop.xlane.xlu1 %2604 }
 0x2b1   : > { %v6810_v61 = vpop.xlane.xlu0 %2583  ;;  %8067 = vst [vmem:[#allocation102_spill] sm:$0xff] %v6822_v6  ;;  %v2962_v6 = vrot.slane %v6709_v36, %v6662_v21 }
 0x2b2   : > { %8066 = vst [vmem:[#allocation101_spill] sm:$0xff] %v6810_v61  ;;  %3083 = vbcast.lane.b32.xlu0 %v3081_v12, 256  ;;  %v5304_v61 = vmov 0   ;;  %v3123_v12 = vrot.slane %v6806_v23, %v6545_v8 }
 0x2b3   : > { %5231 = vset.pattern.permute.xlu0 %v5304_v61  ;;  %5232 = vset.pattern.permute.xlu1 %v5304_v61  ;;  %v3137_v61 = vrot.slane %v6806_v23, %v6554_v53 }
 0x2b4   : > { %2922 = vbcast.lane.b32.xlu1 %v2920_v49, 256  ;;  %v2948_v49 = vrot.slane %v6709_v36, %v6651_v57 }
 0x2b5   : > { %v6816_v56 = vpop.permute.xlu0 %2649 }
 0x2b6   : > { %3097 = vbcast.lane.b32.xlu0 %v3095_v13, 256  ;;  %v6830_v13 = vpop.xlane.xlu1 %2382 }
 0x2b7   : > { %8068 = vst [vmem:[#allocation103_spill] sm:$0xff] %v6830_v13  ;;  %v6872_v13 = vld [vmem:[%s6506_s27 + $0x50] sm:$0xff] }
 0x2b8   : > { %2936 = vbcast.lane.b32.xlu1 %v2934_v38, 256  ;;  %v6839_v38 = vld [vmem:[%s6506_s27 + $0x48] sm:$0xff] }
 0x2b9   : > { %v6824_v29 = vpop.permute.xlu0 %2677 }
 0x2ba   : > { %3111 = vbcast.lane.b32.xlu0 %v3109_v50, 256  ;;  %v2976_v50 = vrot.slane %v6709_v36, %v6671_v17  ;;  %v6847_v25 = vpop.xlane.xlu1 %2388 }
 0x2bb   : > { %8069 = vst [vmem:[#allocation104_spill] sm:$0xff] %v6847_v25 }
 0x2bc   : > { %2950 = vbcast.lane.b32.xlu1 %v2948_v49, 256  ;;  %v3151_v49 = vrot.slane %v6839_v38, %v5529_v54 }
 0x2bd   : > { %v6832_v10 = vpop.permute.xlu0 %2691 }
 0x2be   : > { %3125 = vbcast.lane.b32.xlu0 %v3123_v12, 256  ;;  %v2990_v12 = vrot.slane %v6742_v5, %v6512_v37  ;;  %v6855_v19 = vpop.xlane.xlu1 %2574 }
 0x2bf   : > { %8071 = vst [vmem:[#allocation106_spill] sm:$0xff] %v6855_v19  ;;  %v3193_v19 = vrot.slane %v6839_v38, %v6554_v53 }
 0x2c0   : > { %2964 = vbcast.lane.b32.xlu1 %v2962_v6, 256  ;;  %v3165_v6 = vrot.slane %v6839_v38, %v6574_v11 }
 0x2c1   : > { %v6841_v24 = vpop.permute.xlu0 %2705 }
 0x2c2   : > { %3139 = vbcast.lane.b32.xlu0 %v3137_v61, 256  ;;  %v3004_v61 = vrot.slane %v6742_v5, %v6651_v57 }
 0x2c4   : > { %2978 = vbcast.lane.b32.xlu1 %v2976_v50, 256  ;;  %v3179_v50 = vrot.slane %v6839_v38, %v6545_v8 }
 0x2c5   : > { %v6849_v9 = vpop.permute.xlu0 %2719 }
 0x2c6   : > { %8070 = vst [vmem:[#allocation105_spill] sm:$0xff] %v6849_v9  ;;  %3153 = vbcast.lane.b32.xlu0 %v3151_v49, 256  ;;  %v3018_v49 = vrot.slane %v6742_v5, %v6662_v21 }
 0x2c8   : > { %2992 = vbcast.lane.b32.xlu1 %v2990_v12, 256  ;;  %v6869_v12 = vpop.xlane.xlu1 %2580 }
 0x2c9   : > { %v6857_v36 = vpop.permute.xlu0 %2733  ;;  %8074 = vst [vmem:[#allocation109_spill] sm:$0xff] %v6869_v12  ;;  %v3046_v12 = vrot.slane %v6775_v33, %v6512_v37 }
 0x2ca   : > { %8072 = vst [vmem:[#allocation107_spill] sm:$0xff] %v6857_v36  ;;  %3167 = vbcast.lane.b32.xlu0 %v3165_v6, 256  ;;  %v3032_v6 = vrot.slane %v6742_v5, %v6671_v17 }
 0x2cc   : > { %3006 = vbcast.lane.b32.xlu1 %v3004_v61, 256  ;;  %v3207_v61 = vrot.slane %v6872_v13, %v5529_v54  ;;  %v6880_v2 = vpop.permute.xlu1 %2656 }
 0x2cd   : > { %v6863_v25 = vpop.permute.xlu0 %2747 }
 0x2ce   : > { %8073 = vst [vmem:[#allocation108_spill] sm:$0xff] %v6863_v25  ;;  %3181 = vbcast.lane.b32.xlu0 %v3179_v50, 256 }
 0x2d0   : > { %3020 = vbcast.lane.b32.xlu1 %v3018_v49, 256  ;;  %v3221_v49 = vrot.slane %v6872_v13, %v6574_v11 }
 0x2d1   : > { %v6874_v60 = vpop.permute.xlu0 %2761 }
 0x2d2   : > { %8075 = vst [vmem:[#allocation110_spill] sm:$0xff] %v6874_v60  ;;  %3195 = vbcast.lane.b32.xlu0 %v3193_v19, 256  ;;  %v3060_v19 = vrot.slane %v6775_v33, %v6651_v57 }
 0x2d4   : > { %3034 = vbcast.lane.b32.xlu1 %v3032_v6, 256  ;;  %v3235_v6 = vrot.slane %v6872_v13, %v6545_v8 }
 0x2d5   : > { %v6882_v50 = vpop.permute.xlu0 %2775 }
 0x2d6   : > { %8076 = vst [vmem:[#allocation111_spill] sm:$0xff] %v6882_v50  ;;  %3209 = vbcast.lane.b32.xlu0 %v3207_v61, 256  ;;  %v3074_v61 = vrot.slane %v6775_v33, %v6662_v21 }
 0x2d8   : > { %3048 = vbcast.lane.b32.xlu1 %v3046_v12, 256  ;;  %v6888_v51 = vpop.xlane.xlu1 %2418  ;;  %v3249_v12 = vrot.slane %v6872_v13, %v6554_v53 }
 0x2d9   : > { %8077 = vst [vmem:[#allocation112_spill] sm:$0xff] %v6888_v51  ;;  %v6890_v5 = vpop.permute.xlu0 %2789  ;;  %v6905_v51 = vld [vmem:[%s6506_s27 + $0x58] sm:$0xff] }
 0x2da   : > { %8078 = vst [vmem:[#allocation113_spill] sm:$0xff] %v6890_v5  ;;  %3223 = vbcast.lane.b32.xlu0 %v3221_v49, 256 }
 0x2dc   : > { %3062 = vbcast.lane.b32.xlu1 %v3060_v19, 256  ;;  %v6896_v32 = vpop.xlane.xlu1 %2610  ;;  %v3088_v19 = vrot.slane %v6775_v33, %v6671_v17 }
 0x2dd   : > { %8079 = vst [vmem:[#allocation114_spill] sm:$0xff] %v6896_v32  ;;  %v6898_v18 = vpop.permute.xlu0 %2803  ;;  %v3263_v32 = vrot.slane %v6905_v51, %v5529_v54 }
 0x2de   : > { %8080 = vst [vmem:[#allocation115_spill] sm:$0xff] %v6898_v18  ;;  %3237 = vbcast.lane.b32.xlu0 %v3235_v6, 256 }
 0x2e0   : > { %3076 = vbcast.lane.b32.xlu1 %v3074_v61, 256  ;;  %v6907_v5 = vpop.xlane.xlu1 %2394  ;;  %v3102_v61 = vrot.slane %v6806_v23, %v6512_v37 }
 0x2e1   : > { %8081 = vst [vmem:[#allocation116_spill] sm:$0xff] %v6907_v5  ;;  %v6909_v49 = vpop.permute.xlu0 %2817  ;;  %v3277_v5 = vrot.slane %v6905_v51, %v6574_v11 }
 0x2e2   : > { %8082 = vst [vmem:[#allocation117_spill] sm:$0xff] %v6909_v49  ;;  %3251 = vbcast.lane.b32.xlu0 %v3249_v12, 256  ;;  %v3116_v12 = vrot.slane %v6806_v23, %v6651_v57 }
 0x2e4   : > { %3090 = vbcast.lane.b32.xlu1 %v3088_v19, 256  ;;  %v6915_v18 = vpop.xlane.xlu1 %2586  ;;  %v3291_v19 = vrot.slane %v6905_v51, %v6545_v8 }
 0x2e5   : > { %8083 = vst [vmem:[#allocation118_spill] sm:$0xff] %v6915_v18  ;;  %v6917_v6 = vpop.permute.xlu0 %2831 }
 0x2e6   : > { %8084 = vst [vmem:[#allocation119_spill] sm:$0xff] %v6917_v6  ;;  %3265 = vbcast.lane.b32.xlu0 %v3263_v32, 256  ;;  %v3130_v32 = vrot.slane %v6806_v23, %v6662_v21 }
 0x2e8   : > { %3104 = vbcast.lane.b32.xlu1 %v3102_v61, 256  ;;  %v6923_v49 = vpop.permute.xlu1 %2663  ;;  %v3305_v61 = vrot.slane %v6905_v51, %v6554_v53 }
 0x2e9   : > { %v6925_v33 = vpop.permute.xlu0 %2845 }
 0x2ea   : > { %8085 = vst [vmem:[#allocation120_spill] sm:$0xff] %v6925_v33  ;;  %3279 = vbcast.lane.b32.xlu0 %v3277_v5, 256  ;;  %v6940_v33 = vld [vmem:[%s6506_s27 + $0x60] sm:$0xff] }
 0x2eb   : > { %v3326_v59 = vrot.slane %v6940_v33, %v6512_v37 }
 0x2ec   : > { %3118 = vbcast.lane.b32.xlu1 %v3116_v12, 256  ;;  %v6931_v18 = vpop.permute.xlu1 %2670  ;;  %v3144_v12 = vrot.slane %v6806_v23, %v6671_v17 }
 0x2ed   : > { %v6933_v6 = vpop.permute.xlu0 %2859 }
 0x2ee   : > { %8086 = vst [vmem:[#allocation121_spill] sm:$0xff] %v6933_v6  ;;  %3293 = vbcast.lane.b32.xlu0 %v3291_v19, 256  ;;  %v3319_v6 = vrot.slane %v6940_v33, %v5529_v54 }
 0x2f0   : > { %3132 = vbcast.lane.b32.xlu1 %v3130_v32, 256  ;;  %v6942_v45 = vpop.permute.xlu1 %2684  ;;  %v3158_v32 = vrot.slane %v6839_v38, %v6512_v37 }
 0x2f1   : > { %v6944_v5 = vpop.permute.xlu0 %2873 }
 0x2f2   : > { %8087 = vst [vmem:[#allocation122_spill] sm:$0xff] %v6944_v5  ;;  %3307 = vbcast.lane.b32.xlu0 %v3305_v61, 256  ;;  %v3333_v5 = vrot.slane %v6940_v33, %v6574_v11  ;;  %v3172_v61 = vrot.slane %v6839_v38, %v6651_v57 }
 0x2f4   : > { %3146 = vbcast.lane.b32.xlu1 %v3144_v12, 256  ;;  %v6950_v50 = vpop.permute.xlu1 %2698  ;;  %v3347_v12 = vrot.slane %v6940_v33, %v6545_v8 }
 0x2f5   : > { %v6952_v19 = vpop.permute.xlu0 %2887 }
 0x2f6   : > { %8088 = vst [vmem:[#allocation123_spill] sm:$0xff] %v6952_v19  ;;  %3321 = vbcast.lane.b32.xlu0 %v3319_v6, 256  ;;  %v3186_v6 = vrot.slane %v6839_v38, %v6662_v21 }
 0x2f8   : > { %3160 = vbcast.lane.b32.xlu1 %v3158_v32, 256  ;;  %v6958_v46 = vpop.permute.xlu1 %2712  ;;  %v3361_v32 = vrot.slane %v6940_v33, %v6554_v53 }
 0x2f9   : > { %v6960_v23 = vpop.permute.xlu0 %2901 }
 0x2fa   : > { %8089 = vst [vmem:[#allocation124_spill] sm:$0xff] %v6960_v23  ;;  %3335 = vbcast.lane.b32.xlu0 %v3333_v5, 256  ;;  %v6975_v23 = vld [vmem:[%s6506_s27 + $0x68] sm:$0xff] }
 0x2fc   : > { %3174 = vbcast.lane.b32.xlu1 %v3172_v61, 256  ;;  %v6966_v19 = vpop.permute.xlu1 %2726  ;;  %v3200_v61 = vrot.slane %v6839_v38, %v6671_v17 }
 0x2fd   : > { %v6968_v27 = vpop.permute.xlu0 %2915 }
 0x2fe   : > { %8090 = vst [vmem:[#allocation125_spill] sm:$0xff] %v6968_v27  ;;  %3349 = vbcast.lane.b32.xlu0 %v3347_v12, 256  ;;  %v3375_v27 = vrot.slane %v6975_v23, %v5529_v54 }
 0x300   : > { %3188 = vbcast.lane.b32.xlu1 %v3186_v6, 256  ;;  %v6977_v60 = vpop.permute.xlu1 %2740  ;;  %v3214_v6 = vrot.slane %v6872_v13, %v6512_v37 }
 0x301   : > { %v6979_v5 = vpop.permute.xlu0 %2929 }
 0x302   : > { %8091 = vst [vmem:[#allocation126_spill] sm:$0xff] %v6979_v5  ;;  %3363 = vbcast.lane.b32.xlu0 %v3361_v32, 256  ;;  %v3389_v5 = vrot.slane %v6975_v23, %v6574_v11  ;;  %v3228_v32 = vrot.slane %v6872_v13, %v6651_v57 }
 0x304   : > { %3202 = vbcast.lane.b32.xlu1 %v3200_v61, 256  ;;  %v6985_v35 = vpop.permute.xlu1 %2754  ;;  %v3403_v61 = vrot.slane %v6975_v23, %v6545_v8 }
 0x305   : > { %v6987_v12 = vpop.permute.xlu0 %2943 }
 0x306   : > { %8092 = vst [vmem:[#allocation127_spill] sm:$0xff] %v6987_v12  ;;  %3377 = vbcast.lane.b32.xlu0 %v3375_v27, 256  ;;  %v3242_v27 = vrot.slane %v6872_v13, %v6662_v21 }
 0x308   : > { %3216 = vbcast.lane.b32.xlu1 %v3214_v6, 256  ;;  %v6993_v39 = vpop.permute.xlu1 %2768  ;;  %v3417_v6 = vrot.slane %v6975_v23, %v6554_v53 }
 0x309   : > { %v6995_v38 = vpop.permute.xlu0 %2957 }
 0x30a   : > { %8093 = vst [vmem:[#allocation128_spill] sm:$0xff] %v6995_v38  ;;  %3391 = vbcast.lane.b32.xlu0 %v3389_v5, 256  ;;  %v7010_v38 = vld [vmem:[%s6506_s27 + $0x70] sm:$0xff] }
 0x30c   : > { %3230 = vbcast.lane.b32.xlu1 %v3228_v32, 256  ;;  %v7001_v12 = vpop.permute.xlu1 %2782  ;;  %v3256_v32 = vrot.slane %v6872_v13, %v6671_v17 }
 0x30d   : > { %v7003_v25 = vpop.permute.xlu0 %2971 }
 0x30e   : > { %8094 = vst [vmem:[#allocation129_spill] sm:$0xff] %v7003_v25  ;;  %3405 = vbcast.lane.b32.xlu0 %v3403_v61, 256  ;;  %v3431_v25 = vrot.slane %v7010_v38, %v5529_v54 }
 0x310   : > { %3244 = vbcast.lane.b32.xlu1 %v3242_v27, 256  ;;  %v7012_v15 = vpop.permute.xlu1 %2796  ;;  %v3270_v27 = vrot.slane %v6905_v51, %v6512_v37 }
 0x311   : > { %v7014_v5 = vpop.permute.xlu0 %2985 }
 0x312   : > { %8095 = vst [vmem:[#allocation130_spill] sm:$0xff] %v7014_v5  ;;  %3419 = vbcast.lane.b32.xlu0 %v3417_v6, 256  ;;  %v3445_v5 = vrot.slane %v7010_v38, %v6574_v11  ;;  %v3284_v6 = vrot.slane %v6905_v51, %v6651_v57 }
 0x314   : > { %3258 = vbcast.lane.b32.xlu1 %v3256_v32, 256  ;;  %v7020_v7 = vpop.permute.xlu1 %2810  ;;  %v3459_v32 = vrot.slane %v7010_v38, %v6545_v8 }
 0x315   : > { %v7022_v61 = vpop.permute.xlu0 %2999 }
 0x316   : > { %8096 = vst [vmem:[#allocation131_spill] sm:$0xff] %v7022_v61  ;;  %3433 = vbcast.lane.b32.xlu0 %v3431_v25, 256  ;;  %v3298_v25 = vrot.slane %v6905_v51, %v6662_v21 }
 0x318   : > { %3272 = vbcast.lane.b32.xlu1 %v3270_v27, 256  ;;  %v7028_v36 = vpop.permute.xlu1 %2824  ;;  %v3473_v27 = vrot.slane %v7010_v38, %v6554_v53 }
 0x319   : > { %v7030_v13 = vpop.permute.xlu0 %3013 }
 0x31a   : > { %8097 = vst [vmem:[#allocation132_spill] sm:$0xff] %v7030_v13  ;;  %3447 = vbcast.lane.b32.xlu0 %v3445_v5, 256  ;;  %v7045_v13 = vld [vmem:[%s6506_s27 + $0x78] sm:$0xff] }
 0x31c   : > { %3286 = vbcast.lane.b32.xlu1 %v3284_v6, 256  ;;  %v7036_v61 = vpop.permute.xlu1 %2838  ;;  %v3312_v6 = vrot.slane %v6905_v51, %v6671_v17 }
 0x31d   : > { %v7038_v28 = vpop.permute.xlu0 %3027 }
 0x31e   : > { %8098 = vst [vmem:[#allocation133_spill] sm:$0xff] %v7038_v28  ;;  %3461 = vbcast.lane.b32.xlu0 %v3459_v32, 256  ;;  %v3487_v28 = vrot.slane %v7045_v13, %v5529_v54  ;;  %v3340_v54 = vrot.slane %v6940_v33, %v6651_v57 }
 0x320   : > { %3300 = vbcast.lane.b32.xlu1 %v3298_v25, 256  ;;  %v7047_v58 = vpop.permute.xlu1 %2852  ;;  %v3501_v25 = vrot.slane %v7045_v13, %v6574_v11 }
 0x321   : > { %v7049_v5 = vpop.permute.xlu0 %3041 }
 0x322   : > { %8099 = vst [vmem:[#allocation134_spill] sm:$0xff] %v7049_v5  ;;  %3475 = vbcast.lane.b32.xlu0 %v3473_v27, 256  ;;  %v3515_v27 = vrot.slane %v7045_v13, %v6545_v8  ;;  %v3368_v8 = vrot.slane %v6940_v33, %v6671_v17 }
 0x324   : > { %3314 = vbcast.lane.b32.xlu1 %v3312_v6, 256  ;;  %v7055_v9 = vpop.permute.xlu1 %2866 }
 0x325   : > { %v7057_v32 = vpop.permute.xlu0 %3055 }
 0x326   : > { %8100 = vst [vmem:[#allocation135_spill] sm:$0xff] %v7057_v32  ;;  %3489 = vbcast.lane.b32.xlu0 %v3487_v28, 256  ;;  %v3354_v28 = vrot.slane %v6940_v33, %v6662_v21 }
 0x328   : > { %3328 = vbcast.lane.b32.xlu1 %v3326_v59, 256  ;;  %v7063_v5 = vpop.permute.xlu1 %2880  ;;  %v3529_v59 = vrot.slane %v7045_v13, %v6554_v53  ;;  %v3382_v53 = vrot.slane %v6975_v23, %v6512_v37 }
 0x329   : > { %v7065_v51 = vpop.permute.xlu0 %3069 }
 0x32a   : > { %8101 = vst [vmem:[#allocation136_spill] sm:$0xff] %v7065_v51  ;;  %3503 = vbcast.lane.b32.xlu0 %v3501_v25, 256  ;;  %v3668_v25 = vadd.f32 %v6816_v56, %v6103_v31  ;;  %v3396_v31 = vrot.slane %v6975_v23, %v6651_v57  ;;  %v3673_v56 = vadd.f32 %v6942_v45, %v6255_v0 }
 0x32b   : > { %v3424_v0 = vrot.slane %v6975_v23, %v6671_v17  ;;  %v3677_v45 = vadd.f32 %v6958_v46, %v6081_v20  ;;  %v3452_v20 = vrot.slane %v7010_v38, %v6651_v57  ;;  %v3681_v46 = vadd.f32 %v6977_v60, %v6178_v34 }
 0x32c   : > { %3342 = vbcast.lane.b32.xlu1 %v3340_v54, 256  ;;  %v7071_v6 = vpop.permute.xlu1 %2894  ;;  %v3480_v34 = vrot.slane %v7010_v38, %v6671_v17  ;;  %v3685_v60 = vadd.f32 %v6993_v39, %v6395_v41  ;;  %v3508_v41 = vrot.slane %v7045_v13, %v6651_v57  ;;  %v3689_v39 = vadd.f32 %v7012_v15, %v6497_v16 }
 0x32d   : > { %v7073_v32 = vpop.permute.xlu0 %3083  ;;  %v3536_v15 = vrot.slane %v7045_v13, %v6671_v17  ;;  %v3693_v16 = vadd.f32 %v7028_v36, %v6325_v3  ;;  %v3670_v3 = vadd.f32 %v6923_v49, %v6116_v1  ;;  %v3697_v36 = vadd.f32 %v7047_v58, %v6459_v52 }
 0x32e   : > { %8102 = vst [vmem:[#allocation137_spill] sm:$0xff] %v7073_v32  ;;  %3517 = vbcast.lane.b32.xlu0 %v3515_v27, 256  ;;  %v3671_v27 = vadd.f32 %v6931_v18, %v6234_v42  ;;  %v3410_v42 = vrot.slane %v6975_v23, %v6662_v21  ;;  %v3675_v18 = vadd.f32 %v6950_v50, %v6378_v30 }
 0x32f   : > { %v3438_v30 = vrot.slane %v7010_v38, %v6512_v37  ;;  %v3679_v50 = vadd.f32 %v6966_v19, %v6158_v26  ;;  %v3466_v26 = vrot.slane %v7010_v38, %v6662_v21  ;;  %v3683_v19 = vadd.f32 %v6985_v35, %v6308_v43 }
 0x330   : > { %3356 = vbcast.lane.b32.xlu1 %v3354_v28, 256  ;;  %v7079_v11 = vpop.permute.xlu1 %2908  ;;  %v3494_v43 = vrot.slane %v7045_v13, %v6512_v37  ;;  %v3687_v35 = vadd.f32 %v7001_v12, %v6490_v63  ;;  %v3522_v63 = vrot.slane %v7045_v13, %v6662_v21  ;;  %v3691_v12 = vadd.f32 %v7020_v7, %v6547_v40 }
 0x331   : > { %v7081_v51 = vpop.permute.xlu0 %3097  ;;  %v3669_v40 = vadd.f32 %v6880_v2, %v6224_v22  ;;  %v3695_v7 = vadd.f32 %v7036_v61, %v6444_v14  ;;  %v3672_v14 = vadd.f32 %v6824_v29, %v6240_v55  ;;  %v3699_v22 = vadd.f32 %v7055_v9, %v6526_v48 }
 0x332   : > { %3531 = vbcast.lane.b32.xlu0 %v3529_v59, 256  ;;  %v3674_v1 = vadd.f32 %v6832_v10, %v6365_v62  ;;  %v3701_v52 = vadd.f32 %v7063_v5, %v6556_v4  ;;  %v3676_v55 = vadd.f32 %v6841_v24, %v6068_v47  ;;  %v3703_v9 = vadd.f32 %v7071_v6, %v6631_v44  ;;  %v8104_v62 = vld [vmem:[#allocation10_spill] sm:$0xff]  ;;  %v8105_v10 = vld [vmem:[#allocation105_spill] sm:$0xff]  ;;  %v8106_v5 = vld [vmem:[#allocation68_spill] sm:$0xff] }
 0x333   : > { %v3678_v4 = vadd.f32 %v8105_v10, %v8104_v62  ;;  %v8108_v47 = vld [vmem:[#allocation11_spill] sm:$0xff]  ;;  %v8110_v6 = vld [vmem:[#allocation85_spill] sm:$0xff] }
 0x334   : > { %3370 = vbcast.lane.b32.xlu1 %v3368_v8, 256  ;;  %v7087_v54 = vpop.permute.xlu1 %2922  ;;  %v8109_v44 = vld [vmem:[#allocation107_spill] sm:$0xff]  ;;  %v8120_v62 = vld [vmem:[#allocation37_spill] sm:$0xff] }
 0x335   : > { %v7089_v32 = vpop.permute.xlu0 %3111  ;;  %v3680_v24 = vadd.f32 %v8109_v44, %v8108_v47  ;;  %v8124_v44 = vld [vmem:[#allocation38_spill] sm:$0xff] }
 0x336   : > { %3925 = vperm.xlu0 %5231, %v3668_v25  }
 0x338   : > { %3384 = vbcast.lane.b32.xlu1 %v3382_v53, 256  ;;  %v7095_v28 = vpop.permute.xlu1 %2936 }
 0x339   : > { %v7097_v33 = vpop.permute.xlu0 %3125 }
 0x33a   : > { %3934 = vperm.xlu0 %5231, %v3671_v27  }
 0x33c   : > { %3398 = vbcast.lane.b32.xlu1 %v3396_v31, 256  ;;  %v7103_v59 = vpop.permute.xlu1 %2950 }
 0x33d   : > { %v7105_v8 = vpop.permute.xlu0 %3139 }
 0x33e   : > { %3940 = vperm.xlu0 %5231, %v3673_v56  }
 0x340   : > { %3412 = vbcast.lane.b32.xlu1 %v3410_v42, 256  ;;  %v7111_v25 = vpop.permute.xlu1 %2964 }
 0x341   : > { %v7113_v53 = vpop.permute.xlu0 %3153 }
 0x342   : > { %3946 = vperm.xlu0 %5231, %v3675_v18  }
 0x344   : > { %3426 = vbcast.lane.b32.xlu1 %v3424_v0, 256  ;;  %v7119_v27 = vpop.permute.xlu1 %2978 }
 0x345   : > { %v7121_v31 = vpop.permute.xlu0 %3167 }
 0x346   : > { %3952 = vperm.xlu0 %5231, %v3677_v45  }
 0x348   : > { %3440 = vbcast.lane.b32.xlu1 %v3438_v30, 256  ;;  %v7127_v56 = vpop.permute.xlu1 %2992 }
 0x349   : > { %v7129_v23 = vpop.permute.xlu0 %3181 }
 0x34a   : > { %3958 = vperm.xlu0 %5231, %v3679_v50  }
 0x34c   : > { %3454 = vbcast.lane.b32.xlu1 %v3452_v20, 256  ;;  %v7135_v42 = vpop.permute.xlu1 %3006 }
 0x34d   : > { %v7137_v18 = vpop.permute.xlu0 %3195 }
 0x34e   : > { %3964 = vperm.xlu0 %5231, %v3681_v46  }
 0x350   : > { %3468 = vbcast.lane.b32.xlu1 %v3466_v26, 256  ;;  %v7143_v0 = vpop.permute.xlu1 %3020 }
 0x351   : > { %v7145_v45 = vpop.permute.xlu0 %3209 }
 0x352   : > { %3970 = vperm.xlu0 %5231, %v3683_v19  }
 0x354   : > { %3482 = vbcast.lane.b32.xlu1 %v3480_v34, 256  ;;  %v7151_v30 = vpop.permute.xlu1 %3034 }
 0x355   : > { %v7153_v50 = vpop.permute.xlu0 %3223 }
 0x356   : > { %3976 = vperm.xlu0 %5231, %v3685_v60  }
 0x358   : > { %3496 = vbcast.lane.b32.xlu1 %v3494_v43, 256  ;;  %v7159_v20 = vpop.permute.xlu1 %3048  ;;  %v3705_v43 = vadd.f32 %v7079_v11, %v8106_v5  ;;  %v8113_v11 = vld [vmem:[#allocation108_spill] sm:$0xff] }
 0x359   : > { %v7161_v38 = vpop.permute.xlu0 %3237 }
 0x35a   : > { %3982 = vperm.xlu0 %5231, %v3687_v35  }
 0x35c   : > { %3510 = vbcast.lane.b32.xlu1 %v3508_v41, 256  ;;  %v7167_v46 = vpop.permute.xlu1 %3062 }
 0x35d   : > { %v7169_v37 = vpop.permute.xlu0 %3251 }
 0x35e   : > { %3988 = vperm.xlu0 %5231, %v3689_v39   ;;  %v3707_v39 = vadd.f32 %v7087_v54, %v8110_v6  ;;  %v8117_v54 = vld [vmem:[#allocation110_spill] sm:$0xff]  ;;  %v8126_v6 = vld [vmem:[#allocation75_spill] sm:$0xff] }
 0x360   : > { %3524 = vbcast.lane.b32.xlu1 %v3522_v63, 256  ;;  %v7175_v26 = vpop.permute.xlu1 %3076 }
 0x361   : > { %v7177_v57 = vpop.permute.xlu0 %3265 }
 0x362   : > { %3994 = vperm.xlu0 %5231, %v3691_v12  }
 0x364   : > { %3538 = vbcast.lane.b32.xlu1 %v3536_v15, 256  ;;  %v7183_v19 = vpop.permute.xlu1 %3090  ;;  %v8112_v15 = vld [vmem:[#allocation20_spill] sm:$0xff] }
 0x365   : > { %v7185_v21 = vpop.permute.xlu0 %3279 }
 0x366   : > { %4000 = vperm.xlu0 %5231, %v3693_v16   ;;  %v3682_v16 = vadd.f32 %v8113_v11, %v8112_v15 }
 0x368   : > { %3928 = vperm.xlu1 %5232, %v3669_v40   ;;  %v7191_v34 = vpop.permute.xlu1 %3104  ;;  %v8114_v40 = vld [vmem:[#allocation45_spill] sm:$0xff] }
 0x369   : > { %v7193_v17 = vpop.permute.xlu0 %3293 }
 0x36a   : > { %4006 = vperm.xlu0 %5231, %v3695_v7   ;;  %v3709_v7 = vadd.f32 %v7095_v28, %v8114_v40  ;;  %v8121_v28 = vld [vmem:[#allocation111_spill] sm:$0xff] }
 0x36b   : > { %v3686_v10 = vadd.f32 %v8121_v28, %v8120_v62  ;;  %v8134_v62 = vld [vmem:[#allocation103_spill] sm:$0xff] }
 0x36c   : > { %3931 = vperm.xlu1 %5232, %v3670_v3   ;;  %v7199_v13 = vpop.permute.xlu1 %3118  ;;  %v3719_v28 = vadd.f32 %v7135_v42, %v8134_v62  ;;  %v8140_v42 = vld [vmem:[#allocation120_spill] sm:$0xff]  ;;  %v8145_v62 = vld [vmem:[#allocation78_spill] sm:$0xff] }
 0x36d   : > { %v7201_v60 = vpop.permute.xlu0 %3307 }
 0x36e   : > { %4012 = vperm.xlu0 %5231, %v3697_v36  }
 0x370   : > { %3937 = vperm.xlu1 %5232, %v3672_v14   ;;  %v7207_v2 = vpop.permute.xlu1 %3132  ;;  %v8116_v14 = vld [vmem:[#allocation26_spill] sm:$0xff] }
 0x371   : > { %v7209_v61 = vpop.permute.xlu0 %3321 }
 0x372   : > { %4018 = vperm.xlu0 %5231, %v3699_v22   ;;  %v3684_v22 = vadd.f32 %v8117_v54, %v8116_v14 }
 0x374   : > { %3943 = vperm.xlu1 %5232, %v3674_v1   ;;  %v7215_v58 = vpop.permute.xlu1 %3146  ;;  %v8118_v1 = vld [vmem:[#allocation57_spill] sm:$0xff] }
 0x375   : > { %v7217_v49 = vpop.permute.xlu0 %3335 }
 0x376   : > { %4024 = vperm.xlu0 %5231, %v3701_v52   ;;  %v3711_v52 = vadd.f32 %v7103_v59, %v8118_v1  ;;  %v8125_v59 = vld [vmem:[#allocation113_spill] sm:$0xff] }
 0x377   : > { %v8132_v1 = vld [vmem:[#allocation21_spill] sm:$0xff] }
 0x378   : > { %3949 = vperm.xlu1 %5232, %v3676_v55   ;;  %v7223_v48 = vpop.permute.xlu1 %3160 }
 0x379   : > { %v7225_v29 = vpop.permute.xlu0 %3349 }
 0x37a   : > { %8103 = vst [vmem:[#allocation138_spill] sm:$0xff] %v7225_v29  ;;  %4030 = vperm.xlu0 %5231, %v3703_v9  }
 0x37c   : > { %3955 = vperm.xlu1 %5232, %v3678_v4   ;;  %v7231_v35 = vpop.permute.xlu1 %3174  ;;  %v8122_v4 = vld [vmem:[#allocation59_spill] sm:$0xff] }
 0x37d   : > { %v7233_v41 = vpop.permute.xlu0 %3363  ;;  %v3713_v5 = vadd.f32 %v7111_v25, %v8122_v4  ;;  %v8129_v25 = vld [vmem:[#allocation115_spill] sm:$0xff] }
 0x37e   : > { %8107 = vst [vmem:[#allocation10_spill] sm:$0xff] %v7233_v41  ;;  %4036 = vperm.xlu0 %5231, %v3705_v43  }
 0x380   : > { %3961 = vperm.xlu1 %5232, %v3680_v24   ;;  %v7239_v63 = vpop.permute.xlu1 %3188  ;;  %v3688_v24 = vadd.f32 %v8125_v59, %v8124_v44  ;;  %v8138_v59 = vld [vmem:[#allocation104_spill] sm:$0xff] }
 0x381   : > { %v7241_v12 = vpop.permute.xlu0 %3377 }
 0x382   : > { %8111 = vst [vmem:[#allocation105_spill] sm:$0xff] %v7241_v12  ;;  %4042 = vperm.xlu0 %5231, %v3707_v39   ;;  %v3715_v39 = vadd.f32 %v7119_v27, %v8126_v6  ;;  %v8133_v27 = vld [vmem:[#allocation117_spill] sm:$0xff]  ;;  %v8198_v12 = vlaneseq }
 0x384   : > { %3967 = vperm.xlu1 %5232, %v3682_v16   ;;  %v7247_v3 = vpop.permute.xlu1 %3202  ;;  %v8128_v16 = vld [vmem:[#allocation50_spill] sm:$0xff] }
 0x385   : > { %v7249_v36 = vpop.permute.xlu0 %3391  ;;  %v3690_v40 = vadd.f32 %v8129_v25, %v8128_v16  ;;  %v8139_v16 = vld [vmem:[#allocation32_spill] sm:$0xff] }
 0x386   : > { %8115 = vst [vmem:[#allocation68_spill] sm:$0xff] %v7249_v36  ;;  %4048 = vperm.xlu0 %5231, %v3709_v7   ;;  %v8130_v7 = vld [vmem:[#allocation88_spill] sm:$0xff]  ;;  %v3696_v25 = vadd.f32 %v8140_v42, %v8139_v16 }
 0x387   : > { %v3717_v14 = vadd.f32 %v7127_v56, %v8130_v7  ;;  %v8137_v56 = vld [vmem:[#allocation119_spill] sm:$0xff] }
 0x388   : > { %3973 = vperm.xlu1 %5232, %v3684_v22   ;;  %v7255_v55 = vpop.permute.xlu1 %3216 }
 0x389   : > { %v7257_v9 = vpop.permute.xlu0 %3405 }
 0x38a   : > { %8119 = vst [vmem:[#allocation11_spill] sm:$0xff] %v7257_v9  ;;  %4054 = vperm.xlu0 %5231, %v3711_v52   ;;  %v3692_v52 = vadd.f32 %v8133_v27, %v8132_v1  ;;  %v8143_v27 = vld [vmem:[#allocation43_spill] sm:$0xff] }
 0x38c   : > { %3979 = vperm.xlu1 %5232, %v3686_v10   ;;  %v7263_v43 = vpop.permute.xlu1 %3230 }
 0x38d   : > { %v7265_v47 = vpop.permute.xlu0 %3419 }
 0x38e   : > { %8123 = vst [vmem:[#allocation107_spill] sm:$0xff] %v7265_v47  ;;  %4060 = vperm.xlu0 %5231, %v3713_v5   ;;  %v8136_v5 = vld [vmem:[#allocation31_spill] sm:$0xff] }
 0x38f   : > { %v3694_v44 = vadd.f32 %v8137_v56, %v8136_v5 }
 0x390   : > { %3985 = vperm.xlu1 %5232, %v3688_v24   ;;  %v7271_v15 = vpop.permute.xlu1 %3244  ;;  %v3721_v24 = vadd.f32 %v7143_v0, %v8138_v59  ;;  %v8144_v0 = vld [vmem:[#allocation121_spill] sm:$0xff] }
 0x391   : > { %v7273_v11 = vpop.permute.xlu0 %3433 }
 0x392   : > { %8127 = vst [vmem:[#allocation85_spill] sm:$0xff] %v7273_v11  ;;  %4066 = vperm.xlu0 %5231, %v3715_v39  }
 0x394   : > { %3991 = vperm.xlu1 %5232, %v3690_v40   ;;  %v7279_v54 = vpop.permute.xlu1 %3258  ;;  %v8141_v40 = vld [vmem:[#allocation116_spill] sm:$0xff] }
 0x395   : > { %v7281_v22 = vpop.permute.xlu0 %3447  ;;  %v3723_v7 = vadd.f32 %v7151_v30, %v8141_v40  ;;  %v8147_v30 = vld [vmem:[#allocation122_spill] sm:$0xff]  ;;  %v8150_v40 = vld [vmem:[#allocation123_spill] sm:$0xff] }
 0x396   : > { %8131 = vst [vmem:[#allocation20_spill] sm:$0xff] %v7281_v22  ;;  %4072 = vperm.xlu0 %5231, %v3717_v14  }
 0x398   : > { %3997 = vperm.xlu1 %5232, %v3692_v52   ;;  %v7287_v10 = vpop.permute.xlu1 %3272  ;;  %v3698_v52 = vadd.f32 %v8144_v0, %v8143_v27  ;;  %v8151_v27 = vld [vmem:[#allocation98_spill] sm:$0xff] }
 0x399   : > { %v7289_v4 = vpop.permute.xlu0 %3461  ;;  %v3729_v0 = vadd.f32 %v7175_v26, %v8151_v27  ;;  %v8158_v26 = vld [vmem:[#allocation9_spill] sm:$0xff] }
 0x39a   : > { %8135 = vst [vmem:[#allocation108_spill] sm:$0xff] %v7289_v4  ;;  %4078 = vperm.xlu0 %5231, %v3719_v28   ;;  %v3725_v28 = vadd.f32 %v7159_v20, %v8145_v62  ;;  %v8152_v62 = vld [vmem:[#allocation65_spill] sm:$0xff] }
 0x39c   : > { %4003 = vperm.xlu1 %5232, %v3694_v44   ;;  %v7295_v6 = vpop.permute.xlu1 %3286  ;;  %v8146_v44 = vld [vmem:[#allocation51_spill] sm:$0xff] }
 0x39d   : > { %v7297_v39 = vpop.permute.xlu0 %3475  ;;  %v3700_v59 = vadd.f32 %v8147_v30, %v8146_v44 }
 0x39e   : > { %4084 = vperm.xlu0 %5231, %v3721_v24   ;;  %v8148_v24 = vld [vmem:[#allocation95_spill] sm:$0xff] }
 0x39f   : > { %v3727_v16 = vadd.f32 %v7167_v46, %v8148_v24  ;;  %v8154_v46 = vld [vmem:[#allocation112_spill] sm:$0xff] }
 0x3a0   : > { %4009 = vperm.xlu1 %5232, %v3696_v25   ;;  %v7303_v14 = vpop.permute.xlu1 %3300  ;;  %v8149_v25 = vld [vmem:[#allocation63_spill] sm:$0xff]  ;;  %v3731_v30 = vadd.f32 %v7183_v19, %v8154_v46  ;;  %v8160_v19 = vld [vmem:[#allocation126_spill] sm:$0xff]  ;;  %v8161_v46 = vld [vmem:[#allocation17_spill] sm:$0xff] }
 0x3a1   : > { %v7305_v1 = vpop.permute.xlu0 %3489 }
 0x3a2   : > { %8142 = vst [vmem:[#allocation45_spill] sm:$0xff] %v7305_v1  ;;  %4090 = vperm.xlu0 %5231, %v3723_v7   ;;  %v3702_v7 = vadd.f32 %v8150_v40, %v8149_v25  ;;  %v8157_v25 = vld [vmem:[#allocation125_spill] sm:$0xff] }
 0x3a4   : > { %4015 = vperm.xlu1 %5232, %v3698_v52   ;;  %v7311_v5 = vpop.permute.xlu1 %3314 }
 0x3a5   : > { %v7313_v56 = vpop.permute.xlu0 %3503 }
 0x3a6   : > { %4096 = vperm.xlu0 %5231, %v3725_v28   ;;  %v8153_v28 = vld [vmem:[#allocation124_spill] sm:$0xff] }
 0x3a7   : > { %v3704_v44 = vadd.f32 %v8153_v28, %v8152_v62  ;;  %v8159_v62 = vld [vmem:[#allocation44_spill] sm:$0xff] }
 0x3a8   : > { %4021 = vperm.xlu1 %5232, %v3700_v59   ;;  %v7319_v42 = vpop.permute.xlu1 %3328  ;;  %v3708_v28 = vadd.f32 %v8160_v19, %v8159_v62  ;;  %v8165_v62 = vld [vmem:[#allocation58_spill] sm:$0xff] }
 0x3a9   : > { %v7323_v20 = vpop.permute.xlu0 %3517 }
 0x3aa   : > { %4102 = vperm.xlu0 %5231, %v3727_v16   ;;  %v8156_v16 = vld [vmem:[#allocation76_spill] sm:$0xff] }
 0x3ab   : > { %v3706_v40 = vadd.f32 %v8157_v25, %v8156_v16  ;;  %v8162_v16 = vld [vmem:[#allocation56_spill] sm:$0xff] }
 0x3ac   : > { %4027 = vperm.xlu1 %5232, %v3702_v7   ;;  %v7327_v52 = vpop.permute.xlu1 %3342  ;;  %v3733_v7 = vadd.f32 %v7191_v34, %v8158_v26  ;;  %v8163_v34 = vld [vmem:[#allocation127_spill] sm:$0xff] }
 0x3ad   : > { %v7333_v59 = vpop.permute.xlu0 %3531  ;;  %v3710_v25 = vadd.f32 %v8163_v34, %v8162_v16  ;;  %v8168_v16 = vld [vmem:[#allocation69_spill] sm:$0xff] }
 0x3ae   : > { %4108 = vperm.xlu0 %5231, %v3729_v0   ;;  %8155 = vst [vmem:[#allocation26_spill] sm:$0xff] %v7333_v59 }
 0x3b0   : > { %4033 = vperm.xlu1 %5232, %v3704_v44   ;;  %v7335_v24 = vpop.permute.xlu1 %3356  ;;  %v3735_v44 = vadd.f32 %v7199_v13, %v8161_v46  ;;  %v8166_v13 = vld [vmem:[#allocation128_spill] sm:$0xff] }
 0x3b1   : > { %v3712_v19 = vadd.f32 %v8166_v13, %v8165_v62  ;;  %v8171_v62 = vld [vmem:[#allocation77_spill] sm:$0xff] }
 0x3b2   : > { %4114 = vperm.xlu0 %5231, %v3731_v30  }
 0x3b4   : > { %4039 = vperm.xlu1 %5232, %v3706_v40   ;;  %v7341_v27 = vpop.permute.xlu1 %3370  ;;  %v8164_v40 = vld [vmem:[#allocation19_spill] sm:$0xff] }
 0x3b5   : > { %v7343_v0 = vpop.permute.xlu0 %3925  ;;  %v3737_v26 = vadd.f32 %v7207_v2, %v8164_v40  ;;  %v8169_v2 = vld [vmem:[#allocation129_spill] sm:$0xff] }
 0x3b6   : > { %4120 = vperm.xlu0 %5231, %v3733_v7   ;;  %v3714_v34 = vadd.f32 %v8169_v2, %v8168_v16  ;;  %v8174_v16 = vld [vmem:[#allocation89_spill] sm:$0xff] }
 0x3b8   : > { %4045 = vperm.xlu1 %5232, %v3708_v28   ;;  %v7349_v30 = vpop.permute.xlu1 %3384  ;;  %v8167_v28 = vld [vmem:[#allocation28_spill] sm:$0xff] }
 0x3b9   : > { %v7351_v59 = vpop.permute.xlu0 %3934  ;;  %v3739_v46 = vadd.f32 %v7215_v58, %v8167_v28  ;;  %v8172_v58 = vld [vmem:[#allocation130_spill] sm:$0xff] }
 0x3ba   : > { %4126 = vperm.xlu0 %5231, %v3735_v44   ;;  %v3716_v13 = vadd.f32 %v8172_v58, %v8171_v62  ;;  %v8178_v62 = vld [vmem:[#allocation91_spill] sm:$0xff] }
 0x3bc   : > { %4051 = vperm.xlu1 %5232, %v3710_v25   ;;  %v7357_v7 = vpop.permute.xlu1 %3398  ;;  %v8170_v25 = vld [vmem:[#allocation7_spill] sm:$0xff] }
 0x3bd   : > { %v7359_v47 = vpop.permute.xlu0 %3940  ;;  %v3741_v40 = vadd.f32 %v7223_v48, %v8170_v25  ;;  %v8175_v48 = vld [vmem:[#allocation131_spill] sm:$0xff] }
 0x3be   : > { %4132 = vperm.xlu0 %5231, %v3737_v26   ;;  %v3718_v2 = vadd.f32 %v8175_v48, %v8174_v16  ;;  %v8182_v16 = vld [vmem:[#allocation99_spill] sm:$0xff] }
 0x3c0   : > { %4057 = vperm.xlu1 %5232, %v3712_v19   ;;  %v7365_v44 = vpop.permute.xlu1 %3412  ;;  %v8173_v19 = vld [vmem:[#allocation13_spill] sm:$0xff] }
 0x3c1   : > { %v7367_v4 = vpop.permute.xlu0 %3946  ;;  %v3743_v28 = vadd.f32 %v7231_v35, %v8173_v19  ;;  %v8179_v35 = vld [vmem:[#allocation132_spill] sm:$0xff] }
 0x3c2   : > { %4138 = vperm.xlu0 %5231, %v3739_v46   ;;  %v3720_v58 = vadd.f32 %v8179_v35, %v8178_v62  ;;  %v8186_v62 = vld [vmem:[#allocation71_spill] sm:$0xff] }
 0x3c4   : > { %4063 = vperm.xlu1 %5232, %v3714_v34   ;;  %v7373_v26 = vpop.permute.xlu1 %3426  ;;  %v8176_v34 = vld [vmem:[#allocation15_spill] sm:$0xff] }
 0x3c5   : > { %v7375_v22 = vpop.permute.xlu0 %3952  ;;  %v3745_v25 = vadd.f32 %v7239_v63, %v8176_v34  ;;  %v8183_v63 = vld [vmem:[#allocation133_spill] sm:$0xff] }
 0x3c6   : > { %4144 = vperm.xlu0 %5231, %v3741_v40   ;;  %v3722_v48 = vadd.f32 %v8183_v63, %v8182_v16  ;;  %v8189_v16 = vld [vmem:[#allocation82_spill] sm:$0xff] }
 0x3c8   : > { %4069 = vperm.xlu1 %5232, %v3716_v13   ;;  %v7381_v46 = vpop.permute.xlu1 %3440  ;;  %v8180_v13 = vld [vmem:[#allocation23_spill] sm:$0xff] }
 0x3c9   : > { %v7383_v1 = vpop.permute.xlu0 %3958  ;;  %v3747_v19 = vadd.f32 %v7247_v3, %v8180_v13  ;;  %v8187_v3 = vld [vmem:[#allocation134_spill] sm:$0xff] }
 0x3ca   : > { %4150 = vperm.xlu0 %5231, %v3743_v28   ;;  %v3724_v35 = vadd.f32 %v8187_v3, %v8186_v62  ;;  %v8192_v62 = vld [vmem:[#allocation84_spill] sm:$0xff] }
 0x3cc   : > { %4075 = vperm.xlu1 %5232, %v3718_v2   ;;  %v7389_v40 = vpop.permute.xlu1 %3454  ;;  %v8184_v2 = vld [vmem:[#allocation30_spill] sm:$0xff] }
 0x3cd   : > { %8177 = vst [vmem:[#allocation110_spill] sm:$0xff] %v7389_v40  ;;  %v7391_v11 = vpop.permute.xlu0 %3964  ;;  %v3749_v34 = vadd.f32 %v7255_v55, %v8184_v2  ;;  %v8190_v55 = vld [vmem:[#allocation135_spill] sm:$0xff] }
 0x3ce   : > { %4156 = vperm.xlu0 %5231, %v3745_v25   ;;  %v3726_v63 = vadd.f32 %v8190_v55, %v8189_v16  ;;  %v8195_v16 = vld [vmem:[#allocation96_spill] sm:$0xff] }
 0x3d0   : > { %4081 = vperm.xlu1 %5232, %v3720_v58   ;;  %v7397_v28 = vpop.permute.xlu1 %3468  ;;  %v8188_v58 = vld [vmem:[#allocation40_spill] sm:$0xff] }
 0x3d1   : > { %8181 = vst [vmem:[#allocation57_spill] sm:$0xff] %v7397_v28  ;;  %v7399_v9 = vpop.permute.xlu0 %3970  ;;  %v3751_v13 = vadd.f32 %v7263_v43, %v8188_v58  ;;  %v8193_v43 = vld [vmem:[#allocation136_spill] sm:$0xff] }
 0x3d2   : > { %4162 = vperm.xlu0 %5231, %v3747_v19   ;;  %v3728_v3 = vadd.f32 %v8193_v43, %v8192_v62 }
 0x3d4   : > { %4087 = vperm.xlu1 %5232, %v3722_v48   ;;  %v7405_v25 = vpop.permute.xlu1 %3482  ;;  %v8191_v48 = vld [vmem:[#allocation42_spill] sm:$0xff] }
 0x3d5   : > { %8185 = vst [vmem:[#allocation37_spill] sm:$0xff] %v7405_v25  ;;  %v7407_v40 = vpop.permute.xlu0 %3976  ;;  %v3753_v2 = vadd.f32 %v7271_v15, %v8191_v48  ;;  %v8196_v15 = vld [vmem:[#allocation137_spill] sm:$0xff] }
 0x3d6   : > { %4168 = vperm.xlu0 %5231, %v3749_v34   ;;  %v3730_v55 = vadd.f32 %v8196_v15, %v8195_v16 }
 0x3d8   : > { %4093 = vperm.xlu1 %5232, %v3724_v35   ;;  %v7413_v19 = vpop.permute.xlu1 %3496  ;;  %v8194_v35 = vld [vmem:[#allocation53_spill] sm:$0xff] }
 0x3d9   : > { %v7415_v28 = vpop.permute.xlu0 %3982  ;;  %v3755_v58 = vadd.f32 %v7279_v54, %v8194_v35  ;;  %v8199_v54 = vld [vmem:[#allocation8_spill] sm:$0xff] }
 0x3da   : > { %4174 = vperm.xlu0 %5231, %v3751_v13   ;;  %v3732_v43 = vadd.f32 %v7081_v51, %v8199_v54 }
 0x3dc   : > { %4099 = vperm.xlu1 %5232, %v3726_v63   ;;  %v7421_v34 = vpop.permute.xlu1 %3510  ;;  %v8197_v63 = vld [vmem:[#allocation25_spill] sm:$0xff] }
 0x3dd   : > { %v7423_v25 = vpop.permute.xlu0 %3988  ;;  %v3757_v48 = vadd.f32 %v7287_v10, %v8197_v63  ;;  %v8203_v63 = vld [vmem:[#allocation36_spill] sm:$0xff] }
 0x3de   : > { %4180 = vperm.xlu0 %5231, %v3753_v2   ;;  %v4309_v2 = vand.u32 127, %v8198_v12  ;;  %v8202_v12 = vld [vmem:[#allocation16_spill] sm:$0xff] }
 0x3df   : > { %v3734_v15 = vadd.f32 %v7089_v32, %v8202_v12 }
 0x3e0   : > { %4105 = vperm.xlu1 %5232, %v3728_v3   ;;  %v7429_v13 = vpop.permute.xlu1 %3524  ;;  %v8200_v3 = vld [vmem:[#allocation34_spill] sm:$0xff] }
 0x3e1   : > { %v7431_v36 = vpop.permute.xlu0 %3994  ;;  %v3759_v35 = vadd.f32 %v7295_v6, %v8200_v3 }
 0x3e2   : > { %4186 = vperm.xlu0 %5231, %v3755_v58   ;;  %v8201_v58 = vld [vmem:[#allocation5_spill] sm:$0xff] }
 0x3e3   : > { %v7447_v29 = vsub.s32 %v4309_v2, %v8201_v58 }
 0x3e4   : > { %4111 = vperm.xlu1 %5232, %v3730_v55   ;;  %v7438_v41 = vpop.permute.xlu1 %3538 }
 0x3e5   : > { %v7440_v62 = vpop.permute.xlu0 %4000  ;;  %v4313_v51 = vrot.slane %v7343_v0, %v7447_v29  ;;  %v4325_v0 = vrot.slane %v7351_v59, %v7447_v29  ;;  %v4333_v59 = vrot.slane %v7359_v47, %v7447_v29  ;;  %v4341_v47 = vrot.slane %v7367_v4, %v7447_v29 }
 0x3e6   : > { %4192 = vperm.xlu0 %5231, %v3757_v48   ;;  %v3761_v48 = vadd.f32 %v7303_v14, %v8203_v63  ;;  %v8207_v63 = vld [vmem:[#allocation55_spill] sm:$0xff] }
 0x3e8   : > { %4117 = vperm.xlu1 %5232, %v3732_v43   ;;  %v3929_v16 = vpop.permute.xlu1 %3928  ;;  %v8204_v43 = vld [vmem:[#allocation18_spill] sm:$0xff] }
 0x3e9   : > { %v7449_v10 = vpop.permute.xlu0 %4006  ;;  %v4317_v55 = vrot.slane %v3929_v16, %v7447_v29  ;;  %v3736_v32 = vadd.f32 %v7097_v33, %v8204_v43  ;;  %v8206_v33 = vld [vmem:[#allocation27_spill] sm:$0xff] }
 0x3ea   : > { %4198 = vperm.xlu0 %5231, %v3759_v35   ;;  %v8205_v35 = vld [vmem:[#allocation47_spill] sm:$0xff] }
 0x3eb   : > { %v4823_v3 = vsel %vm4822_vm1, %v4317_v55, %v4313_v51  ;;  %v3763_v14 = vadd.f32 %v7311_v5, %v8205_v35  ;;  %v3738_v55 = vadd.f32 %v7105_v8, %v8206_v33  ;;  %v8208_v8 = vld [vmem:[#allocation6_spill] sm:$0xff]  ;;  %v8211_v33 = vld [vmem:[#allocation73_spill] sm:$0xff] }
 0x3ec   : > { %4123 = vperm.xlu1 %5232, %v3734_v15   ;;  %v3932_v6 = vpop.permute.xlu1 %3931 }
 0x3ed   : > { %v7458_v2 = vpop.permute.xlu0 %4012  ;;  %v4321_v54 = vrot.slane %v3932_v6, %v7447_v29 }
 0x3ee   : > { %4204 = vperm.xlu0 %5231, %v3761_v48   ;;  %v3765_v48 = vadd.f32 %v7319_v42, %v8207_v63  ;;  %v3740_v42 = vadd.f32 %v7113_v53, %v8208_v8  ;;  %v8210_v53 = vld [vmem:[#allocation12_spill] sm:$0xff] }
 0x3ef   : > { %v4825_v58 = vsel %vm4824_vm2, %v4321_v54, %v4823_v3  ;;  %v8209_v3 = vld [vmem:[#allocation70_spill] sm:$0xff]  ;;  %v3742_v4 = vadd.f32 %v7121_v31, %v8210_v53 }
 0x3f0   : > { %4129 = vperm.xlu1 %5232, %v3736_v32   ;;  %v3938_v16 = vpop.permute.xlu1 %3937  ;;  %v4827_v5 = vsel %vm4826_vm3, %v4325_v0, %v4825_v58  ;;  %v3767_v35 = vadd.f32 %v7327_v52, %v8209_v3  ;;  %v4349_v52 = vrot.slane %v7375_v22, %v7447_v29  ;;  %v4357_v22 = vrot.slane %v7383_v1, %v7447_v29 }
 0x3f1   : > { %v7469_v12 = vpop.permute.xlu0 %4018  ;;  %v4329_v15 = vrot.slane %v3938_v16, %v7447_v29  ;;  %v4365_v1 = vrot.slane %v7391_v11, %v7447_v29 }
 0x3f2   : > { %4210 = vperm.xlu0 %5231, %v3763_v14  }
 0x3f3   : > { %v4829_v51 = vsel %vm4828_vm4, %v4329_v15, %v4827_v5 }
 0x3f4   : > { %4135 = vperm.xlu1 %5232, %v3738_v55   ;;  %v3944_v6 = vpop.permute.xlu1 %3943  ;;  %v4831_v32 = vsel %vm4830_vm5, %v4333_v59, %v4829_v51  ;;  %v3769_v55 = vadd.f32 %v7335_v24, %v8211_v33  ;;  %v8212_v51 = vld [vmem:[#allocation14_spill] sm:$0xff]  ;;  %v8217_v33 = vld [vmem:[#allocation61_spill] sm:$0xff] }
 0x3f5   : > { %v7480_v54 = vpop.permute.xlu0 %4024  ;;  %v4337_v43 = vrot.slane %v3944_v6, %v7447_v29  ;;  %v3744_v59 = vadd.f32 %v7129_v23, %v8212_v51  ;;  %v8213_v6 = vld [vmem:[#allocation90_spill] sm:$0xff] }
 0x3f6   : > { %4216 = vperm.xlu0 %5231, %v3765_v48  }
 0x3f7   : > { %v4833_v14 = vsel %vm4832_vm6, %v4337_v43, %v4831_v32  ;;  %v3771_v43 = vadd.f32 %v7341_v27, %v8213_v6  ;;  %v8214_v32 = vld [vmem:[#allocation22_spill] sm:$0xff] }
 0x3f8   : > { %v4835_v58 = vsel %vm4834_vm7, %v4341_v47, %v4833_v14  ;;  %4141 = vperm.xlu1 %5232, %v3740_v42   ;;  %v3950_v0 = vpop.permute.xlu1 %3949  ;;  %v3746_v23 = vadd.f32 %v7137_v18, %v8214_v32 }
 0x3f9   : > { %v7498_v16 = vpop.permute.xlu0 %4030  ;;  %4958 = vst.msk [vmem:[%s7487_s22] sm:$0xff] %vm4957_vm8, %v4835_v58  ;;  %v4345_v15 = vrot.slane %v3950_v0, %v7447_v29 }
 0x3fa   : > { %4222 = vperm.xlu0 %5231, %v3767_v35   ;;  %v8215_v35 = vld [vmem:[#allocation49_spill] sm:$0xff] }
 0x3fb   : > { %v4836_v31 = vsel %vm4822_vm1, %v4349_v52, %v4345_v15  ;;  %v3773_v27 = vadd.f32 %v7349_v30, %v8215_v35  ;;  %v4373_v15 = vrot.slane %v7399_v9, %v7447_v29 }
 0x3fc   : > { %4147 = vperm.xlu1 %5232, %v3742_v4   ;;  %v3956_v5 = vpop.permute.xlu1 %3955  ;;  %v8216_v4 = vld [vmem:[#allocation29_spill] sm:$0xff] }
 0x3fd   : > { %v7509_v63 = vpop.permute.xlu0 %4036  ;;  %v4353_v48 = vrot.slane %v3956_v5, %v7447_v29  ;;  %v3748_v18 = vadd.f32 %v7145_v45, %v8216_v4  ;;  %v8218_v45 = vld [vmem:[#allocation39_spill] sm:$0xff] }
 0x3fe   : > { %4228 = vperm.xlu0 %5231, %v3769_v55   ;;  %v3775_v55 = vadd.f32 %v7357_v7, %v8217_v33  ;;  %v3750_v51 = vadd.f32 %v7153_v50, %v8218_v45  ;;  %v4381_v7 = vrot.slane %v7407_v40, %v7447_v29  ;;  %v4389_v40 = vrot.slane %v7415_v28, %v7447_v29  ;;  %v8225_v33 = vld [vmem:[#allocation86_spill] sm:$0xff] }
 0x3ff   : > { %v4837_v24 = vsel %vm4824_vm2, %v4353_v48, %v4836_v31  ;;  %v4397_v28 = vrot.slane %v7423_v25, %v7447_v29 }
 0x400   : > { %4153 = vperm.xlu1 %5232, %v3744_v59   ;;  %v3962_v8 = vpop.permute.xlu1 %3961  ;;  %v4838_v3 = vsel %vm4826_vm3, %v4357_v22, %v4837_v24  ;;  %v8219_v59 = vld [vmem:[#allocation64_spill] sm:$0xff]  ;;  %v8220_v22 = vld [vmem:[#allocation41_spill] sm:$0xff] }
 0x401   : > { %v7520_v42 = vpop.permute.xlu0 %4042  ;;  %v4361_v47 = vrot.slane %v3962_v8, %v7447_v29  ;;  %v3777_v31 = vadd.f32 %v7365_v44, %v8219_v59  ;;  %v3752_v8 = vadd.f32 %v7161_v38, %v8220_v22  ;;  %v8229_v22 = vld [vmem:[#allocation87_spill] sm:$0xff] }
 0x402   : > { %4234 = vperm.xlu0 %5231, %v3771_v43  }
 0x403   : > { %v4839_v14 = vsel %vm4828_vm4, %v4361_v47, %v4838_v3  ;;  %v8221_v47 = vld [vmem:[#allocation93_spill] sm:$0xff] }
 0x404   : > { %4159 = vperm.xlu1 %5232, %v3746_v23   ;;  %v3968_v58 = vpop.permute.xlu1 %3967  ;;  %v4840_v30 = vsel %vm4830_vm5, %v4365_v1, %v4839_v14  ;;  %v3781_v32 = vadd.f32 %v7381_v46, %v8221_v47  ;;  %v8223_v1 = vld [vmem:[#allocation83_spill] sm:$0xff] }
 0x405   : > { %v7531_v0 = vpop.permute.xlu0 %4048  ;;  %v4369_v53 = vrot.slane %v3968_v58, %v7447_v29  ;;  %v3789_v46 = vadd.f32 %v7413_v19, %v8223_v1  ;;  %v8232_v1 = vld [vmem:[#allocation54_spill] sm:$0xff] }
 0x406   : > { %4240 = vperm.xlu0 %5231, %v3773_v27   ;;  %v8222_v27 = vld [vmem:[#allocation52_spill] sm:$0xff] }
 0x407   : > { %v4841_v11 = vsel %vm4832_vm6, %v4369_v53, %v4840_v30  ;;  %v3754_v38 = vadd.f32 %v7169_v37, %v8222_v27  ;;  %v4405_v30 = vrot.slane %v7431_v36, %v7447_v29 }
 0x408   : > { %v4842_v52 = vsel %vm4834_vm7, %v4373_v15, %v4841_v11  ;;  %4165 = vperm.xlu1 %5232, %v3748_v18   ;;  %v3974_v5 = vpop.permute.xlu1 %3973  ;;  %v8224_v15 = vld [vmem:[#allocation24_spill] sm:$0xff] }
 0x409   : > { %v7543_v48 = vpop.permute.xlu0 %4054  ;;  %4959 = vst.msk [vmem:[%s7487_s22 + $0x8] sm:$0xff] %vm4957_vm8, %v4842_v52  ;;  %v4377_v9 = vrot.slane %v3974_v5, %v7447_v29  ;;  %v3756_v37 = vadd.f32 %v7177_v57, %v8224_v15  ;;  %v8226_v57 = vld [vmem:[#allocation33_spill] sm:$0xff] }
 0x40a   : > { %4246 = vperm.xlu0 %5231, %v3775_v55   ;;  %v3790_v55 = vadd.f32 %v7313_v56, %v8225_v33  ;;  %v3758_v45 = vadd.f32 %v7185_v21, %v8226_v57  ;;  %v4413_v56 = vrot.slane %v7440_v62, %v7447_v29  ;;  %v4421_v62 = vrot.slane %v7449_v10, %v7447_v29 }
 0x40b   : > { %v4843_v50 = vsel %vm4822_vm1, %v4381_v7, %v4377_v9  ;;  %v4429_v10 = vrot.slane %v7458_v2, %v7447_v29 }
 0x40c   : > { %4171 = vperm.xlu1 %5232, %v3750_v51   ;;  %v3980_v6 = vpop.permute.xlu1 %3979  ;;  %v8227_v51 = vld [vmem:[#allocation100_spill] sm:$0xff] }
 0x40d   : > { %v7554_v43 = vpop.permute.xlu0 %4060  ;;  %v4385_v24 = vrot.slane %v3980_v6, %v7447_v29  ;;  %v3791_v9 = vadd.f32 %v7421_v34, %v8227_v51  ;;  %v8228_v6 = vld [vmem:[#allocation35_spill] sm:$0xff] }
 0x40e   : > { %4252 = vperm.xlu0 %5231, %v3777_v31  }
 0x40f   : > { %v4844_v44 = vsel %vm4824_vm2, %v4385_v24, %v4843_v50  ;;  %v3760_v24 = vadd.f32 %v7193_v17, %v8228_v6 }
 0x410   : > { %4177 = vperm.xlu1 %5232, %v3752_v8   ;;  %v3986_v23 = vpop.permute.xlu1 %3985  ;;  %v4845_v14 = vsel %vm4826_vm3, %v4389_v40, %v4844_v44  ;;  %v3792_v8 = vadd.f32 %v7323_v20, %v8229_v22  ;;  %v8230_v44 = vld [vmem:[#allocation46_spill] sm:$0xff] }
 0x411   : > { %v7565_v3 = vpop.permute.xlu0 %4066  ;;  %v4393_v35 = vrot.slane %v3986_v23, %v7447_v29  ;;  %v3762_v17 = vadd.f32 %v7201_v60, %v8230_v44  ;;  %v8231_v23 = vld [vmem:[#allocation102_spill] sm:$0xff]  ;;  %v3764_v60 = vadd.f32 %v7209_v61, %v8232_v1 }
 0x412   : > { %4264 = vperm.xlu0 %5231, %v3781_v32   ;;  %v3793_v20 = vadd.f32 %v7429_v13, %v8231_v23  ;;  %v8234_v61 = vld [vmem:[#allocation66_spill] sm:$0xff] }
 0x413   : > { %v4846_v58 = vsel %vm4828_vm4, %v4393_v35, %v4845_v14 }
 0x414   : > { %4183 = vperm.xlu1 %5232, %v3754_v38   ;;  %v3992_v53 = vpop.permute.xlu1 %3991  ;;  %v4847_v19 = vsel %vm4830_vm5, %v4397_v28, %v4846_v58  ;;  %v8233_v58 = vld [vmem:[#allocation101_spill] sm:$0xff] }
 0x415   : > { %v7576_v4 = vpop.permute.xlu0 %4072  ;;  %v4401_v18 = vrot.slane %v3992_v53, %v7447_v29  ;;  %v3786_v28 = vadd.f32 %v7297_v39, %v8233_v58  ;;  %v4445_v39 = vrot.slane %v7480_v54, %v7447_v29  ;;  %v4453_v54 = vrot.slane %v7498_v16, %v7447_v29 }
 0x416   : > { %4288 = vperm.xlu0 %5231, %v3789_v46   ;;  %v4437_v46 = vrot.slane %v7469_v12, %v7447_v29 }
 0x417   : > { %v4848_v25 = vsel %vm4832_vm6, %v4401_v18, %v4847_v19 }
 0x418   : > { %v4849_v11 = vsel %vm4834_vm7, %v4405_v30, %v4848_v25  ;;  %4189 = vperm.xlu1 %5232, %v3756_v37   ;;  %v3998_v52 = vpop.permute.xlu1 %3997  ;;  %v3766_v37 = vadd.f32 %v7217_v49, %v8234_v61  ;;  %v8235_v30 = vld [vmem:[#allocation80_spill] sm:$0xff] }
 0x419   : > { %v7588_v5 = vpop.permute.xlu0 %4078  ;;  %4960 = vst.msk [vmem:[%s7487_s22 + $0x10] sm:$0xff] %vm4957_vm8, %v4849_v11  ;;  %v4409_v36 = vrot.slane %v3998_v52, %v7447_v29  ;;  %v3779_v19 = vadd.f32 %v7373_v26, %v8235_v30  ;;  %v8236_v11 = vld [vmem:[#allocation67_spill] sm:$0xff]  ;;  %v8237_v52 = vld [vmem:[#allocation138_spill] sm:$0xff] }
 0x41a   : > { %4291 = vperm.xlu0 %5231, %v3790_v55   ;;  %v3768_v57 = vadd.f32 %v8237_v52, %v8236_v11  ;;  %v8249_v52 = vld [vmem:[#allocation74_spill] sm:$0xff] }
 0x41b   : > { %v4850_v21 = vsel %vm4822_vm1, %v4413_v56, %v4409_v36 }
 0x41c   : > { %4195 = vperm.xlu1 %5232, %v3758_v45   ;;  %v4004_v59 = vpop.permute.xlu1 %4003  ;;  %v8238_v45 = vld [vmem:[#allocation114_spill] sm:$0xff] }
 0x41d   : > { %v7599_v31 = vpop.permute.xlu0 %4084  ;;  %v4417_v7 = vrot.slane %v4004_v59, %v7447_v29  ;;  %v3795_v36 = vadd.f32 %v7438_v41, %v8238_v45  ;;  %v8239_v59 = vld [vmem:[#allocation79_spill] sm:$0xff]  ;;  %v4501_v45 = vrot.slane %v7565_v3, %v7447_v29  ;;  %v4509_v3 = vrot.slane %v7576_v4, %v7447_v29 }
 0x41e   : > { %4294 = vperm.xlu0 %5231, %v3791_v9  }
 0x41f   : > { %v4851_v34 = vsel %vm4824_vm2, %v4417_v7, %v4850_v21  ;;  %v8240_v7 = vld [vmem:[#allocation10_spill] sm:$0xff]  ;;  %v4461_v21 = vrot.slane %v7509_v63, %v7447_v29 }
 0x420   : > { %4201 = vperm.xlu1 %5232, %v3760_v24   ;;  %v4010_v50 = vpop.permute.xlu1 %4009  ;;  %v4852_v40 = vsel %vm4826_vm3, %v4421_v62, %v4851_v34  ;;  %v3770_v6 = vadd.f32 %v8240_v7, %v8239_v59  ;;  %v8241_v34 = vld [vmem:[#allocation48_spill] sm:$0xff]  ;;  %v8242_v62 = vld [vmem:[#allocation105_spill] sm:$0xff] }
 0x421   : > { %v7610_v47 = vpop.permute.xlu0 %4090  ;;  %v4425_v32 = vrot.slane %v4010_v50, %v7447_v29  ;;  %v3772_v50 = vadd.f32 %v8242_v62, %v8241_v34  ;;  %v8252_v59 = vld [vmem:[#allocation20_spill] sm:$0xff] }
 0x422   : > { %4297 = vperm.xlu0 %5231, %v3792_v8  }
 0x423   : > { %v4853_v35 = vsel %vm4828_vm4, %v4425_v32, %v4852_v40  ;;  %v4469_v32 = vrot.slane %v7520_v42, %v7447_v29  ;;  %v4477_v42 = vrot.slane %v7531_v0, %v7447_v29 }
 0x424   : > { %4207 = vperm.xlu1 %5232, %v3762_v17   ;;  %v4016_v27 = vpop.permute.xlu1 %4015  ;;  %v4854_v13 = vsel %vm4830_vm5, %v4429_v10, %v4853_v35  ;;  %v8244_v35 = vld [vmem:[#allocation68_spill] sm:$0xff] }
 0x425   : > { %v7621_v38 = vpop.permute.xlu0 %4096  ;;  %v4433_v14 = vrot.slane %v4016_v27, %v7447_v29 }
 0x426   : > { %4300 = vperm.xlu0 %5231, %v3793_v20   ;;  %v8243_v20 = vld [vmem:[#allocation60_spill] sm:$0xff] }
 0x427   : > { %v4855_v2 = vsel %vm4832_vm6, %v4433_v14, %v4854_v13  ;;  %v3774_v10 = vadd.f32 %v8244_v35, %v8243_v20  ;;  %v8246_v13 = vld [vmem:[#allocation11_spill] sm:$0xff] }
 0x428   : > { %v4856_v53 = vsel %vm4834_vm7, %v4437_v46, %v4855_v2  ;;  %4213 = vperm.xlu1 %5232, %v3764_v60   ;;  %v4022_v18 = vpop.permute.xlu1 %4021  ;;  %v8245_v46 = vld [vmem:[#allocation62_spill] sm:$0xff] }
 0x429   : > { %v7633_v15 = vpop.permute.xlu0 %4102  ;;  %4961 = vst.msk [vmem:[%s7487_s22 + $0x18] sm:$0xff] %vm4957_vm8, %v4856_v53  ;;  %v4441_v12 = vrot.slane %v4022_v18, %v7447_v29  ;;  %v3776_v58 = vadd.f32 %v8246_v13, %v8245_v46  ;;  %v4485_v53 = vrot.slane %v7543_v48, %v7447_v29  ;;  %v8258_v46 = vld [vmem:[#allocation57_spill] sm:$0xff] }
 0x42a   : > { %4279 = vperm.xlu0 %5231, %v3786_v28  }
 0x42b   : > { %v4857_v49 = vsel %vm4822_vm1, %v4445_v39, %v4441_v12  ;;  %v8248_v12 = vld [vmem:[#allocation85_spill] sm:$0xff] }
 0x42c   : > { %4219 = vperm.xlu1 %5232, %v3766_v37   ;;  %v4028_v33 = vpop.permute.xlu1 %4027  ;;  %v8247_v37 = vld [vmem:[#allocation81_spill] sm:$0xff] }
 0x42d   : > { %v7644_v55 = vpop.permute.xlu0 %4108  ;;  %v4449_v25 = vrot.slane %v4028_v33, %v7447_v29  ;;  %v3780_v30 = vadd.f32 %v8248_v12, %v8247_v37  ;;  %v4493_v33 = vrot.slane %v7554_v43, %v7447_v29 }
 0x42e   : > { %4258 = vperm.xlu0 %5231, %v3779_v19  }
 0x42f   : > { %v4858_v26 = vsel %vm4824_vm2, %v4449_v25, %v4857_v49 }
 0x430   : > { %4225 = vperm.xlu1 %5232, %v3768_v57   ;;  %v4034_v51 = vpop.permute.xlu1 %4033  ;;  %v4859_v24 = vsel %vm4826_vm3, %v4453_v54, %v4858_v26  ;;  %v8250_v57 = vld [vmem:[#allocation45_spill] sm:$0xff] }
 0x431   : > { %v7655_v9 = vpop.permute.xlu0 %4114  ;;  %v4457_v56 = vrot.slane %v4034_v51, %v7447_v29  ;;  %v3788_v49 = vadd.f32 %v8250_v57, %v8249_v52 }
 0x432   : > { %4306 = vperm.xlu0 %5231, %v3795_v36  }
 0x433   : > { %v4860_v41 = vsel %vm4828_vm4, %v4457_v56, %v4859_v24  ;;  %v8251_v56 = vld [vmem:[#allocation92_spill] sm:$0xff] }
 0x434   : > { %4231 = vperm.xlu1 %5232, %v3770_v6   ;;  %v4040_v16 = vpop.permute.xlu1 %4039  ;;  %v4861_v44 = vsel %vm4830_vm5, %v4461_v21, %v4860_v41  ;;  %v3782_v7 = vadd.f32 %v8252_v59, %v8251_v56 }
 0x435   : > { %v7664_v22 = vpop.permute.xlu0 %4120  ;;  %v4465_v8 = vrot.slane %v4040_v16, %v7447_v29  ;;  %v8253_v16 = vld [vmem:[#allocation106_spill] sm:$0xff] }
 0x437   : > { %v4862_v17 = vsel %vm4832_vm6, %v4465_v8, %v4861_v44  ;;  %v8254_v8 = vld [vmem:[#allocation110_spill] sm:$0xff] }
 0x438   : > { %v4863_v40 = vsel %vm4834_vm7, %v4469_v32, %v4862_v17  ;;  %4237 = vperm.xlu1 %5232, %v3772_v50   ;;  %v4046_v63 = vpop.permute.xlu1 %4045  ;;  %v3783_v34 = vadd.f32 %v8254_v8, %v8253_v16  ;;  %v4517_v32 = vrot.slane %v7588_v5, %v7447_v29 }
 0x439   : > { %v7674_v23 = vpop.permute.xlu0 %4126  ;;  %4962 = vst.msk [vmem:[%s7487_s22 + $0x20] sm:$0xff] %vm4957_vm8, %v4863_v40  ;;  %v4473_v27 = vrot.slane %v4046_v63, %v7447_v29  ;;  %v8255_v40 = vld [vmem:[#allocation94_spill] sm:$0xff]  ;;  %v8256_v63 = vld [vmem:[#allocation108_spill] sm:$0xff] }
 0x43a   : > { %v3784_v20 = vadd.f32 %v8256_v63, %v8255_v40  ;;  %v4581_v40 = vrot.slane %v7674_v23, %v7447_v29 }
 0x43b   : > { %v4864_v28 = vsel %vm4822_vm1, %v4477_v42, %v4473_v27  ;;  %v4525_v27 = vrot.slane %v7599_v31, %v7447_v29 }
 0x43c   : > { %4243 = vperm.xlu1 %5232, %v3774_v10   ;;  %v4052_v14 = vpop.permute.xlu1 %4051 }
 0x43d   : > { %v7683_v1 = vpop.permute.xlu0 %4132  ;;  %v4481_v60 = vrot.slane %v4052_v14, %v7447_v29 }
 0x43f   : > { %v4865_v2 = vsel %vm4824_vm2, %v4481_v60, %v4864_v28  ;;  %v8257_v60 = vld [vmem:[#allocation109_spill] sm:$0xff] }
 0x440   : > { %4249 = vperm.xlu1 %5232, %v3776_v58   ;;  %v4058_v18 = vpop.permute.xlu1 %4057  ;;  %v4866_v19 = vsel %vm4826_vm3, %v4485_v53, %v4865_v2  ;;  %v3785_v13 = vadd.f32 %v8258_v46, %v8257_v60  ;;  %v4533_v58 = vrot.slane %v7610_v47, %v7447_v29  ;;  %v4541_v47 = vrot.slane %v7621_v38, %v7447_v29 }
 0x441   : > { %v7692_v61 = vpop.permute.xlu0 %4138  ;;  %v4489_v0 = vrot.slane %v4058_v18, %v7447_v29  ;;  %v8259_v18 = vld [vmem:[#allocation72_spill] sm:$0xff] }
 0x442   : > { %v4597_v60 = vrot.slane %v7692_v61, %v7447_v29 }
 0x443   : > { %v4867_v39 = vsel %vm4828_vm4, %v4489_v0, %v4866_v19  ;;  %v8260_v0 = vld [vmem:[#allocation107_spill] sm:$0xff] }
 0x444   : > { %4261 = vperm.xlu1 %5232, %v3780_v30   ;;  %v4064_v25 = vpop.permute.xlu1 %4063  ;;  %v4868_v36 = vsel %vm4830_vm5, %v4493_v33, %v4867_v39  ;;  %v3778_v37 = vadd.f32 %v8260_v0, %v8259_v18  ;;  %v8261_v33 = vld [vmem:[#allocation97_spill] sm:$0xff] }
 0x445   : > { %v7701_v48 = vpop.permute.xlu0 %4144  ;;  %v4497_v11 = vrot.slane %v4064_v25, %v7447_v29  ;;  %v8262_v25 = vld [vmem:[#allocation26_spill] sm:$0xff] }
 0x447   : > { %v4869_v26 = vsel %vm4832_vm6, %v4497_v11, %v4868_v36  ;;  %v3794_v11 = vadd.f32 %v8262_v25, %v8261_v33 }
 0x448   : > { %v4870_v54 = vsel %vm4834_vm7, %v4501_v45, %v4869_v26  ;;  %4285 = vperm.xlu1 %5232, %v3788_v49   ;;  %v4070_v43 = vpop.permute.xlu1 %4069  ;;  %v4549_v49 = vrot.slane %v7633_v15, %v7447_v29  ;;  %v8263_v26 = vld [vmem:[#allocation118_spill] sm:$0xff] }
 0x449   : > { %v7711_v51 = vpop.permute.xlu0 %4150  ;;  %4963 = vst.msk [vmem:[%s7487_s22 + $0x28] sm:$0xff] %vm4957_vm8, %v4870_v54  ;;  %v4505_v6 = vrot.slane %v4070_v43, %v7447_v29  ;;  %v8264_v54 = vld [vmem:[#allocation37_spill] sm:$0xff] }
 0x44a   : > { %v3787_v43 = vadd.f32 %v8264_v54, %v8263_v26 }
 0x44b   : > { %v4871_v62 = vsel %vm4822_vm1, %v4509_v3, %v4505_v6  ;;  %v4565_v3 = vrot.slane %v7655_v9, %v7447_v29 }
 0x44c   : > { %4267 = vperm.xlu1 %5232, %v3782_v7   ;;  %v4076_v24 = vpop.permute.xlu1 %4075  ;;  %v4557_v7 = vrot.slane %v7644_v55, %v7447_v29 }
 0x44d   : > { %v7720_v41 = vpop.permute.xlu0 %4156  ;;  %v4513_v21 = vrot.slane %v4076_v24, %v7447_v29 }
 0x44f   : > { %v4872_v50 = vsel %vm4824_vm2, %v4513_v21, %v4871_v62  ;;  %v4573_v62 = vrot.slane %v7664_v22, %v7447_v29 }
 0x450   : > { %4270 = vperm.xlu1 %5232, %v3783_v34   ;;  %v4082_v44 = vpop.permute.xlu1 %4081  ;;  %v4873_v35 = vsel %vm4826_vm3, %v4517_v32, %v4872_v50 }
 0x451   : > { %v7729_v17 = vpop.permute.xlu0 %4162  ;;  %v4521_v4 = vrot.slane %v4082_v44, %v7447_v29 }
 0x453   : > { %v4874_v10 = vsel %vm4828_vm4, %v4521_v4, %v4873_v35 }
 0x454   : > { %4273 = vperm.xlu1 %5232, %v3784_v20   ;;  %v4088_v42 = vpop.permute.xlu1 %4087  ;;  %v4875_v28 = vsel %vm4830_vm5, %v4525_v27, %v4874_v10  ;;  %v4589_v27 = vrot.slane %v7683_v1, %v7447_v29  ;;  %v4605_v1 = vrot.slane %v7701_v48, %v7447_v29  ;;  %v4621_v48 = vrot.slane %v7720_v41, %v7447_v29 }
 0x455   : > { %v4529_v5 = vrot.slane %v4088_v42, %v7447_v29  ;;  %v7739_v14 = vpop.permute.xlu0 %4168 }
 0x456   : > { %v4637_v41 = vrot.slane %v7739_v14, %v7447_v29 }
 0x457   : > { %v4876_v2 = vsel %vm4832_vm6, %v4529_v5, %v4875_v28 }
 0x458   : > { %v4877_v53 = vsel %vm4834_vm7, %v4533_v58, %v4876_v2  ;;  %4276 = vperm.xlu1 %5232, %v3785_v13   ;;  %v4094_v31 = vpop.permute.xlu1 %4093 }
 0x459   : > { %4964 = vst.msk [vmem:[%s7487_s22 + $0x30] sm:$0xff] %vm4957_vm8, %v4877_v53  ;;  %v4537_v12 = vrot.slane %v4094_v31, %v7447_v29  ;;  %v7753_v30 = vpop.permute.xlu0 %4174 }
 0x45b   : > { %v4878_v52 = vsel %vm4822_vm1, %v4541_v47, %v4537_v12 }
 0x45c   : > { %4255 = vperm.xlu1 %5232, %v3778_v37   ;;  %v4100_v19 = vpop.permute.xlu1 %4099  ;;  %v4613_v37 = vrot.slane %v7711_v51, %v7447_v29 }
 0x45d   : > { %v4545_v39 = vrot.slane %v4100_v19, %v7447_v29  ;;  %v7764_v36 = vpop.permute.xlu0 %4180 }
 0x45e   : > { %v4653_v14 = vrot.slane %v7764_v36, %v7447_v29 }
 0x45f   : > { %v4879_v57 = vsel %vm4824_vm2, %v4545_v39, %v4878_v52  ;;  %v4629_v52 = vrot.slane %v7729_v17, %v7447_v29 }
 0x460   : > { %4303 = vperm.xlu1 %5232, %v3794_v11   ;;  %v4106_v45 = vpop.permute.xlu1 %4105  ;;  %v4880_v56 = vsel %vm4826_vm3, %v4549_v49, %v4879_v57 }
 0x461   : > { %v4553_v38 = vrot.slane %v4106_v45, %v7447_v29  ;;  %v7777_v21 = vpop.permute.xlu0 %4186 }
 0x463   : > { %v4881_v59 = vsel %vm4828_vm4, %v4553_v38, %v4880_v56 }
 0x464   : > { %4282 = vperm.xlu1 %5232, %v3787_v43   ;;  %v4112_v6 = vpop.permute.xlu1 %4111  ;;  %v4882_v24 = vsel %vm4830_vm5, %v4557_v7, %v4881_v59  ;;  %v4645_v59 = vrot.slane %v7753_v30, %v7447_v29 }
 0x465   : > { %v4561_v15 = vrot.slane %v4112_v6, %v7447_v29  ;;  %v7786_v32 = vpop.permute.xlu0 %4192 }
 0x466   : > { %v4669_v36 = vrot.slane %v7786_v32, %v7447_v29 }
 0x467   : > { %v4883_v16 = vsel %vm4832_vm6, %v4561_v15, %v4882_v24 }
 0x468   : > { %v4884_v8 = vsel %vm4834_vm7, %v4565_v3, %v4883_v16  ;;  %v4118_v34 = vpop.permute.xlu1 %4117 }
 0x469   : > { %4965 = vst.msk [vmem:[%s7487_s22 + $0x38] sm:$0xff] %vm4957_vm8, %v4884_v8  ;;  %v4569_v55 = vrot.slane %v4118_v34, %v7447_v29  ;;  %v7795_v10 = vpop.permute.xlu0 %4198  ;;  %v4661_v34 = vrot.slane %v7777_v21, %v7447_v29 }
 0x46b   : > { %v4885_v44 = vsel %vm4822_vm1, %v4573_v62, %v4569_v55 }
 0x46c   : > { %v4124_v50 = vpop.permute.xlu1 %4123 }
 0x46d   : > { %v4577_v9 = vrot.slane %v4124_v50, %v7447_v29  ;;  %v7806_v28 = vpop.permute.xlu0 %4204 }
 0x46f   : > { %v4886_v4 = vsel %vm4824_vm2, %v4577_v9, %v4885_v44 }
 0x470   : > { %v4130_v63 = vpop.permute.xlu1 %4129  ;;  %v4887_v35 = vsel %vm4826_vm3, %v4581_v40, %v4886_v4 }
 0x471   : > { %v4585_v20 = vrot.slane %v4130_v63, %v7447_v29  ;;  %v4211_v18 = vpop.permute.xlu0 %4210 }
 0x473   : > { %v4888_v22 = vsel %vm4828_vm4, %v4585_v20, %v4887_v35  ;;  %v4677_v35 = vrot.slane %v7795_v10, %v7447_v29 }
 0x474   : > { %v4136_v42 = vpop.permute.xlu1 %4135  ;;  %v4889_v23 = vsel %vm4830_vm5, %v4589_v27, %v4888_v22 }
 0x475   : > { %v4593_v5 = vrot.slane %v4136_v42, %v7447_v29  ;;  %v4217_v25 = vpop.permute.xlu0 %4216 }
 0x477   : > { %v4890_v46 = vsel %vm4832_vm6, %v4593_v5, %v4889_v23 }
 0x478   : > { %v4891_v13 = vsel %vm4834_vm7, %v4597_v60, %v4890_v46  ;;  %v4142_v58 = vpop.permute.xlu1 %4141  ;;  %v4685_v60 = vrot.slane %v7806_v28, %v7447_v29  ;;  %v4701_v28 = vrot.slane %v4217_v25, %v7447_v29 }
 0x479   : > { %4966 = vst.msk [vmem:[%s7487_s22 + $0x40] sm:$0xff] %vm4957_vm8, %v4891_v13  ;;  %v4601_v2 = vrot.slane %v4142_v58, %v7447_v29  ;;  %v4223_v26 = vpop.permute.xlu0 %4222  ;;  %v4693_v13 = vrot.slane %v4211_v18, %v7447_v29 }
 0x47b   : > { %v4892_v61 = vsel %vm4822_vm1, %v4605_v1, %v4601_v2 }
 0x47c   : > { %v4148_v53 = vpop.permute.xlu1 %4147 }
 0x47d   : > { %v4609_v31 = vrot.slane %v4148_v53, %v7447_v29  ;;  %v4229_v6 = vpop.permute.xlu0 %4228 }
 0x47e   : > { %v4717_v25 = vrot.slane %v4229_v6, %v7447_v29 }
 0x47f   : > { %v4893_v0 = vsel %vm4824_vm2, %v4609_v31, %v4892_v61 }
 0x480   : > { %v4154_v12 = vpop.permute.xlu1 %4153  ;;  %v4894_v19 = vsel %vm4826_vm3, %v4613_v37, %v4893_v0 }
 0x481   : > { %v4617_v47 = vrot.slane %v4154_v12, %v7447_v29  ;;  %v4235_v30 = vpop.permute.xlu0 %4234 }
 0x483   : > { %v4895_v39 = vsel %vm4828_vm4, %v4617_v47, %v4894_v19  ;;  %v4709_v47 = vrot.slane %v4223_v26, %v7447_v29 }
 0x484   : > { %v4160_v33 = vpop.permute.xlu1 %4159  ;;  %v4896_v57 = vsel %vm4830_vm5, %v4621_v48, %v4895_v39 }
 0x485   : > { %v4625_v11 = vrot.slane %v4160_v33, %v7447_v29  ;;  %v4241_v40 = vpop.permute.xlu0 %4240 }
 0x487   : > { %v4897_v51 = vsel %vm4832_vm6, %v4625_v11, %v4896_v57 }
 0x488   : > { %v4898_v49 = vsel %vm4834_vm7, %v4629_v52, %v4897_v51  ;;  %v4166_v45 = vpop.permute.xlu1 %4165  ;;  %v4725_v51 = vrot.slane %v4235_v30, %v7447_v29 }
 0x489   : > { %4967 = vst.msk [vmem:[%s7487_s22 + $0x48] sm:$0xff] %vm4957_vm8, %v4898_v49  ;;  %v4633_v38 = vrot.slane %v4166_v45, %v7447_v29  ;;  %v7862_v5 = vpop.permute.xlu0 %4246 }
 0x48b   : > { %v4899_v17 = vsel %vm4822_vm1, %v4637_v41, %v4633_v38 }
 0x48c   : > { %v4172_v54 = vpop.permute.xlu1 %4171 }
 0x48d   : > { %v4641_v43 = vrot.slane %v4172_v54, %v7447_v29  ;;  %v7872_v53 = vpop.permute.xlu0 %4252 }
 0x48f   : > { %v4900_v56 = vsel %vm4824_vm2, %v4641_v43, %v4899_v17 }
 0x490   : > { %v4178_v7 = vpop.permute.xlu1 %4177  ;;  %v4901_v3 = vsel %vm4826_vm3, %v4645_v59, %v4900_v56 }
 0x491   : > { %v4649_v15 = vrot.slane %v4178_v7, %v7447_v29  ;;  %v4265_v37 = vpop.permute.xlu0 %4264 }
 0x493   : > { %v4902_v24 = vsel %vm4828_vm4, %v4649_v15, %v4901_v3 }
 0x494   : > { %v4184_v16 = vpop.permute.xlu1 %4183  ;;  %v4903_v55 = vsel %vm4830_vm5, %v4653_v14, %v4902_v24 }
 0x495   : > { %v4657_v8 = vrot.slane %v4184_v16, %v7447_v29  ;;  %v4289_v52 = vpop.permute.xlu0 %4288 }
 0x497   : > { %v4904_v62 = vsel %vm4832_vm6, %v4657_v8, %v4903_v55  ;;  %v4797_v55 = vrot.slane %v4289_v52, %v7447_v29 }
 0x498   : > { %v4905_v50 = vsel %vm4834_vm7, %v4661_v34, %v4904_v62  ;;  %v4190_v9 = vpop.permute.xlu1 %4189  ;;  %v4733_v34 = vrot.slane %v4241_v40, %v7447_v29 }
 0x499   : > { %4968 = vst.msk [vmem:[%s7487_s22 + $0x50] sm:$0xff] %vm4957_vm8, %v4905_v50  ;;  %v4665_v44 = vrot.slane %v4190_v9, %v7447_v29  ;;  %v4292_v41 = vpop.permute.xlu0 %4291 }
 0x49a   : > { %v4801_v9 = vrot.slane %v4292_v41, %v7447_v29 }
 0x49b   : > { %v4906_v21 = vsel %vm4822_vm1, %v4669_v36, %v4665_v44 }
 0x49c   : > { %v4196_v4 = vpop.permute.xlu1 %4195 }
 0x49d   : > { %v4673_v63 = vrot.slane %v4196_v4, %v7447_v29  ;;  %v4295_v17 = vpop.permute.xlu0 %4294  ;;  %v4741_v4 = vrot.slane %v7862_v5, %v7447_v29 }
 0x49f   : > { %v4907_v20 = vsel %vm4824_vm2, %v4673_v63, %v4906_v21 }
 0x4a0   : > { %v4202_v22 = vpop.permute.xlu1 %4201  ;;  %v4908_v42 = vsel %vm4826_vm3, %v4677_v35, %v4907_v20  ;;  %v4805_v20 = vrot.slane %v4295_v17, %v7447_v29 }
 0x4a1   : > { %v4681_v27 = vrot.slane %v4202_v22, %v7447_v29  ;;  %v4298_v59 = vpop.permute.xlu0 %4297 }
 0x4a3   : > { %v4909_v32 = vsel %vm4828_vm4, %v4681_v27, %v4908_v42  ;;  %v4749_v42 = vrot.slane %v7872_v53, %v7447_v29 }
 0x4a4   : > { %v4208_v23 = vpop.permute.xlu1 %4207  ;;  %v4910_v58 = vsel %vm4830_vm5, %v4685_v60, %v4909_v32 }
 0x4a5   : > { %v4689_v46 = vrot.slane %v4208_v23, %v7447_v29  ;;  %v4301_v15 = vpop.permute.xlu0 %4300  ;;  %v4765_v23 = vrot.slane %v4265_v37, %v7447_v29 }
 0x4a7   : > { %v4911_v10 = vsel %vm4832_vm6, %v4689_v46, %v4910_v58  ;;  %v4809_v46 = vrot.slane %v4298_v59, %v7447_v29 }
 0x4a8   : > { %v4912_v2 = vsel %vm4834_vm7, %v4693_v13, %v4911_v10  ;;  %v4214_v1 = vpop.permute.xlu1 %4213 }
 0x4a9   : > { %4969 = vst.msk [vmem:[%s7487_s22 + $0x58] sm:$0xff] %vm4957_vm8, %v4912_v2  ;;  %v4697_v31 = vrot.slane %v4214_v1, %v7447_v29  ;;  %v4280_v16 = vpop.permute.xlu0 %4279 }
 0x4ab   : > { %v4913_v18 = vsel %vm4822_vm1, %v4701_v28, %v4697_v31 }
 0x4ac   : > { %v4220_v61 = vpop.permute.xlu1 %4219 }
 0x4ad   : > { %v4705_v0 = vrot.slane %v4220_v61, %v7447_v29  ;;  %v4259_v21 = vpop.permute.xlu0 %4258 }
 0x4ae   : > { %v4757_v10 = vrot.slane %v4259_v21, %v7447_v29 }
 0x4af   : > { %v4914_v12 = vsel %vm4824_vm2, %v4705_v0, %v4913_v18  ;;  %v4813_v18 = vrot.slane %v4301_v15, %v7447_v29 }
 0x4b0   : > { %v4226_v19 = vpop.permute.xlu1 %4225  ;;  %v4915_v48 = vsel %vm4826_vm3, %v4709_v47, %v4914_v12 }
 0x4b1   : > { %v4713_v39 = vrot.slane %v4226_v19, %v7447_v29  ;;  %v4307_v53 = vpop.permute.xlu0 %4306 }
 0x4b3   : > { %v4916_v33 = vsel %vm4828_vm4, %v4713_v39, %v4915_v48  ;;  %v4821_v48 = vrot.slane %v4307_v53, %v7447_v29 }
 0x4b4   : > { %v4232_v11 = vpop.permute.xlu1 %4231  ;;  %v4917_v49 = vsel %vm4830_vm5, %v4717_v25, %v4916_v33 }
 0x4b5   : > { %v4721_v57 = vrot.slane %v4232_v11, %v7447_v29 }
 0x4b7   : > { %v4918_v45 = vsel %vm4832_vm6, %v4721_v57, %v4917_v49  ;;  %v4785_v57 = vrot.slane %v4280_v16, %v7447_v29 }
 0x4b8   : > { %v4919_v38 = vsel %vm4834_vm7, %v4725_v51, %v4918_v45  ;;  %v4238_v26 = vpop.permute.xlu1 %4237 }
 0x4b9   : > { %4970 = vst.msk [vmem:[%s7487_s22 + $0x60] sm:$0xff] %vm4957_vm8, %v4919_v38  ;;  %v4729_v24 = vrot.slane %v4238_v26, %v7447_v29 }
 0x4bb   : > { %v4920_v62 = vsel %vm4822_vm1, %v4733_v34, %v4729_v24 }
 0x4bc   : > { %v4244_v54 = vpop.permute.xlu1 %4243 }
 0x4bd   : > { %v4737_v8 = vrot.slane %v4244_v54, %v7447_v29 }
 0x4bf   : > { %v4921_v44 = vsel %vm4824_vm2, %v4737_v8, %v4920_v62 }
 0x4c0   : > { %v4250_v43 = vpop.permute.xlu1 %4249  ;;  %v4922_v35 = vsel %vm4826_vm3, %v4741_v4, %v4921_v44 }
 0x4c1   : > { %v4745_v36 = vrot.slane %v4250_v43, %v7447_v29 }
 0x4c3   : > { %v4923_v22 = vsel %vm4828_vm4, %v4745_v36, %v4922_v35 }
 0x4c4   : > { %v4262_v56 = vpop.permute.xlu1 %4261  ;;  %v4924_v1 = vsel %vm4830_vm5, %v4749_v42, %v4923_v22 }
 0x4c5   : > { %v4761_v27 = vrot.slane %v4262_v56, %v7447_v29 }
 0x4c7   : > { %v4927_v31 = vsel %vm4822_vm1, %v4765_v23, %v4761_v27 }
 0x4c8   : > { %v4286_v7 = vpop.permute.xlu1 %4285 }
 0x4c9   : > { %v4793_v14 = vrot.slane %v4286_v7, %v7447_v29 }
 0x4cb   : > { %v4934_v50 = vsel %vm4822_vm1, %v4797_v55, %v4793_v14 }
 0x4cc   : > { %v4268_v6 = vpop.permute.xlu1 %4267  ;;  %v4935_v40 = vsel %vm4824_vm2, %v4801_v9, %v4934_v50 }
 0x4cd   : > { %v4936_v32 = vsel %vm4826_vm3, %v4805_v20, %v4935_v40  ;;  %v4769_v60 = vrot.slane %v4268_v6, %v7447_v29 }
 0x4ce   : > { %v4937_v0 = vsel %vm4828_vm4, %v4809_v46, %v4936_v32 }
 0x4cf   : > { %v4928_v37 = vsel %vm4824_vm2, %v4769_v60, %v4927_v31  ;;  %v4938_v25 = vsel %vm4830_vm5, %v4813_v18, %v4937_v0 }
 0x4d0   : > { %v4271_v3 = vpop.permute.xlu1 %4270 }
 0x4d1   : > { %v4773_v13 = vrot.slane %v4271_v3, %v7447_v29 }
 0x4d3   : > { %v4929_v19 = vsel %vm4826_vm3, %v4773_v13, %v4928_v37 }
 0x4d4   : > { %v4274_v30 = vpop.permute.xlu1 %4273 }
 0x4d5   : > { %v4777_v2 = vrot.slane %v4274_v30, %v7447_v29 }
 0x4d7   : > { %v4930_v33 = vsel %vm4828_vm4, %v4777_v2, %v4929_v19 }
 0x4d8   : > { %v4277_v63 = vpop.permute.xlu1 %4276 }
 0x4d9   : > { %v4781_v28 = vrot.slane %v4277_v63, %v7447_v29 }
 0x4db   : > { %v4931_v11 = vsel %vm4830_vm5, %v4781_v28, %v4930_v33 }
 0x4dc   : > { %v4256_v5 = vpop.permute.xlu1 %4255  ;;  %v4932_v38 = vsel %vm4832_vm6, %v4785_v57, %v4931_v11 }
 0x4dd   : > { %v4753_v58 = vrot.slane %v4256_v5, %v7447_v29 }
 0x4df   : > { %v4925_v61 = vsel %vm4832_vm6, %v4753_v58, %v4924_v1 }
 0x4e0   : > { %v4926_v12 = vsel %vm4834_vm7, %v4757_v10, %v4925_v61  ;;  %v4304_v47 = vpop.permute.xlu1 %4303 }
 0x4e1   : > { %4971 = vst.msk [vmem:[%s7487_s22 + $0x68] sm:$0xff] %vm4957_vm8, %v4926_v12  ;;  %v4817_v39 = vrot.slane %v4304_v47, %v7447_v29 }
 0x4e3   : > { %v4939_v52 = vsel %vm4832_vm6, %v4817_v39, %v4938_v25 }
 0x4e4   : > { %v4940_v51 = vsel %vm4834_vm7, %v4821_v48, %v4939_v52  ;;  %v4283_v49 = vpop.permute.xlu1 %4282 }
 0x4e5   : > { %4973 = vst.msk [vmem:[%s7487_s22 + $0x78] sm:$0xff] %vm4957_vm8, %v4940_v51  ;;  %v4789_v45 = vrot.slane %v4283_v49, %v7447_v29 }
 0x4e7   : > { %v4933_v26 = vsel %vm4834_vm7, %v4789_v45, %v4932_v38 }
 0x4e8   : > { %4972 = vst.msk [vmem:[%s7487_s22 + $0x70] sm:$0xff] %vm4957_vm8, %v4933_v26 }
 0x4e9 PF: > { %p15_p7 = scmp.ge.s32.totalorder %s5355_s23, 4   ;;  %s8265_s18 = smov %s5290_s19 }
 0x4ea   : > { %s8266_s19 = smov %s5294_s20  ;;  %s8267_s20 = smov %s5365_s26 }
 0x4eb   : > { %s8268_s21 = smov %s5355_s23  ;;  %17 = sbr.rel (!%p15_p7) target bundleno = 3 (0x3), region = 86 }
 0x4f2   :  { %4996 = vsyncpa [#allocation3], 1 }
 0x4f3   :  { %4998 = vsyncpa [#allocation3 + $0x1], 1 }

</bundles_post_ra>
